<compile_context>
chip_gen: v7x
topology: tpu7x:2x2x1
jax: 0.10.0
libtpu: 0.0.40
codegen_flags: <defaults>
</compile_context>

<pallas_src>
import functools

import jax
import jax.numpy as jnp
from jax.experimental import pallas as pl
from jax.experimental.pallas import tpu as pltpu


# ---------------------------------------------------------------------------
# Small utilities
# ---------------------------------------------------------------------------
def _round_up(v, m):
    return ((v + m - 1) // m) * m


def _tpu_vmem_capacity_bytes():
    """Per-core VMEM capacity; conservative fallback if the query is unavailable."""
    try:
        return int(pltpu.get_tpu_info().vmem_capacity_bytes)
    except Exception:
        return 64 << 20


def _probe_single_buffer_support():
    """Return True iff pipeline_mode=pl.Buffered(1) lowers AND produces correct data."""
    def _copy(x_ref, o_ref):
        o_ref[...] = x_ref[...]

    try:
        x = jnp.arange(8 * 128, dtype=jnp.float32).reshape(8, 128)
        fn = pl.pallas_call(
            _copy,
            out_shape=jax.ShapeDtypeStruct((16, 128), jnp.float32),
            grid=(2,),
            in_specs=[pl.BlockSpec((8, 128), lambda i: (0, 0),
                                   pipeline_mode=pl.Buffered(1))],
            out_specs=pl.BlockSpec((8, 128), lambda i: (i, 0)),
        )
        out = jax.block_until_ready(fn(x))
        return bool(jnp.allclose(out[:8], x)) and bool(jnp.allclose(out[8:], x))
    except Exception:
        return False


# Probed eagerly at import (must NOT be first evaluated inside a jit trace).
_SINGLE_BUFFER_CONSTANTS = _probe_single_buffer_support()


# ---------------------------------------------------------------------------
# Fused Pallas kernel
# ---------------------------------------------------------------------------
def _fused_gcn_kernel(x_ref, a_ref, pw_ref, pb_ref, w_ref, b_ref,
                      pool_ref, fcw_ref, fcb_ref, out_ref,
                      h_ref, hw_ref, pooled_ref):
    l = pl.program_id(0)                 # layer index (outer, sequential)
    r = pl.program_id(1)                 # A_hat row-block index (inner, sequential)
    num_l = pl.num_programs(0)
    num_r = pl.num_programs(1)
    tm = a_ref.shape[0]                  # static row-tile size

    # ---- (l==0, r==0) prologue: input projection + pooled-accumulator init ----
    @pl.when(jnp.logical_and(l == 0, r == 0))
    def _():
        h0 = (jnp.dot(x_ref[...], pw_ref[...], preferred_element_type=jnp.float32)
              + pb_ref[...])
        h_ref[...] = h0.astype(jnp.bfloat16)
        pooled_ref[...] = jnp.zeros_like(pooled_ref)

    # ---- once per layer: hw = h @ W_l (bf16 MXU inputs, f32 accumulate) -------
    @pl.when(r == 0)
    def _():
        hw_ref[...] = jnp.dot(h_ref[...], w_ref[...],
                              preferred_element_type=jnp.float32).astype(jnp.bfloat16)

    # ---- row-block aggregation: relu(A_hat[rows_r, :] @ hw + b_l) -------------
    agg = jnp.dot(a_ref[...], hw_ref[...], preferred_element_type=jnp.float32)
    relu_tile = jnp.maximum(agg + b_ref[...], 0.0)
    row0 = pl.multiple_of(r * tm, tm)

    # carry h to the next layer (not needed after the last layer)
    @pl.when(l < num_l - 1)
    def _():
        h_ref[pl.ds(row0, tm), :] = relu_tile.astype(jnp.bfloat16)

    # ---- last layer: accumulate the global mean pool incrementally ------------
    @pl.when(l == num_l - 1)
    def _():
        pooled_ref[...] += jnp.dot(pool_ref[...], relu_tile.astype(jnp.bfloat16),
                                   preferred_element_type=jnp.float32)

    # ---- final grid step: fc head (bf16 MXU, f32 accumulate + f32 bias) -------
    @pl.when(jnp.logical_and(l == num_l - 1, r == num_r - 1))
    def _():
        out_ref[...] = (
            jnp.dot(pooled_ref[...].astype(jnp.bfloat16), fcw_ref[...],
                    preferred_element_type=jnp.float32)
            + fcb_ref[...]
        )


def fused_gcn_forward(x, a_hat, pool_mat, proj_w, proj_b, conv_w, conv_b,
                      fc_w, fc_b, *, tm):
    """Single fused pallas_call for the whole forward pass.

    x:        (N, F)    f32    node features (N multiple of tm)
    a_hat:    (N, N)    bf16   normalized dense adjacency
    pool_mat: (Gp, N)   bf16   mean-pool matrix, graph rows padded to multiple of 8
    proj_w:   (F, H)    f32,   proj_b: (1, H) f32
    conv_w:   (L, H, H) bf16   (in, out) layout, conv_b: (L, 1, H) f32
    fc_w:     (H, E)    bf16,  fc_b:   (1, E) f32
    """
    N, F = x.shape
    Gp = pool_mat.shape[0]
    L, H, _ = conv_w.shape
    E = fc_w.shape[1]
    assert N % tm == 0 and N % 8 == 0 and Gp % 8 == 0
    n_row_blocks = N // tm

    cbuf = 1 if _SINGLE_BUFFER_CONSTANTS else 2

    def _const_spec(shape):
        # Grid-invariant inputs: single-buffer when supported (double-buffering a
        # constant-index_map input only burns VMEM, it overlaps nothing).
        if _SINGLE_BUFFER_CONSTANTS:
            return pl.BlockSpec(shape, lambda l, r: (0, 0), pipeline_mode=pl.Buffered(1))
        return pl.BlockSpec(shape, lambda l, r: (0, 0))

    # Footprint-derived, generation-clamped VMEM budget.
    vmem_need = (
        2 * tm * N * 2                               # A_hat row tile (bf16, double-buffered)
        + 2 * Gp * tm * 2                            # pool column tile (bf16, double-buffered)
        + 2 * (H * H * 2 + H * 4)                    # conv_w[l] (bf16) + conv_b[l]
        + cbuf * (N * F * 4 + F * H * 4 + H * 4      # x, proj_w, proj_b
                  + H * E * 2 + E * 4)               # fc_w (bf16), fc_b
        + 2 * Gp * E * 4                             # output block
        + 2 * N * H * 2                              # h + hw scratch (bf16)
        + Gp * H * 4                                 # pooled accumulator (f32)
        + (4 << 20)                                  # compiler-internal scratch headroom
    )
    vmem_cap = _tpu_vmem_capacity_bytes()
    vmem_clamp = (vmem_cap - (8 << 20)) if vmem_cap <= (64 << 20) else (100 << 20)
    # TODO(synk): if vmem_need > vmem_clamp (very large N*H), spill h to HBM with manual
    # per-layer DMAs instead of failing; unnecessary at these shapes.
    vmem_bytes = int(min(max(vmem_need, 16 << 20), vmem_clamp))

    return pl.pallas_call(
        _fused_gcn_kernel,
        out_shape=jax.ShapeDtypeStruct((Gp, E), jnp.float32),
        grid_spec=pltpu.PrefetchScalarGridSpec(
            num_scalar_prefetch=0,
            grid=(L, n_row_blocks),
            in_specs=[
                _const_spec((N, F)),                                          # x (l==0 only)
                pl.BlockSpec((tm, N), lambda l, r: (r, 0)),                   # A_hat row tile
                _const_spec((F, H)),                                          # proj_w
                _const_spec((1, H)),                                          # proj_b
                pl.BlockSpec((pl.Squeezed(), H, H), lambda l, r: (l, 0, 0)),  # conv_w[l] -> (H,H)
                pl.BlockSpec((pl.Squeezed(), 1, H), lambda l, r: (l, 0, 0)),  # conv_b[l] -> (1,H)
                pl.BlockSpec((Gp, tm), lambda l, r: (0, r)),                  # pool col tile
                _const_spec((H, E)),                                          # fc_w
                _const_spec((1, E)),                                          # fc_b
            ],
            out_specs=pl.BlockSpec((Gp, E), lambda l, r: (0, 0)),
            scratch_shapes=[
                pltpu.VMEM((N, H), jnp.bfloat16),   # h, resident across all layers
                pltpu.VMEM((N, H), jnp.bfloat16),   # hw = h @ W_l
                pltpu.VMEM((Gp, H), jnp.float32),   # pooled accumulator
            ],
        ),
        compiler_params=pltpu.CompilerParams(
            # Both axes carry VMEM-resident state (h across layers, hw/pooled across row
            # blocks) -> arbitrary. Using v7x's second TensorCore would need a core_map
            # feature-axis split (not implemented).
            dimension_semantics=("arbitrary", "arbitrary"),
            vmem_limit_bytes=vmem_bytes,
        ),
    )(x, a_hat, proj_w, proj_b, conv_w, conv_b, pool_mat, fc_w, fc_b)


# ---------------------------------------------------------------------------
# Glue (plain JAX): graph preprocessing + parameter setup
# ---------------------------------------------------------------------------
def build_norm_adj(edge_index, num_nodes, dtype=jnp.bfloat16):
    """Dense D^{-1/2}(A + I)D^{-1/2} matching torch_geometric GCNConv gcn_norm
    (deg = in-degree + 1, message src -> dst). Emitted directly in `dtype`."""
    src, dst = edge_index[0], edge_index[1]
    a = jnp.zeros((num_nodes, num_nodes), jnp.float32)
    a = a.at[dst, src].add(1.0)
    a = a + jnp.eye(num_nodes, dtype=jnp.float32)
    deg = a.sum(axis=1)
    d_inv_sqrt = jnp.where(deg > 0, 1.0 / jnp.sqrt(deg), 0.0)
    return (a * d_inv_sqrt[:, None] * d_inv_sqrt[None, :]).astype(dtype)


def build_mean_pool_matrix(batch, num_graphs, dtype=jnp.bfloat16):
    onehot = (batch[None, :] == jnp.arange(num_graphs)[:, None]).astype(jnp.float32)
    counts = jnp.maximum(onehot.sum(axis=1, keepdims=True), 1.0)
    return (onehot / counts).astype(dtype)


def init_params(key, num_node_features, hidden_dim, embedding_dim, num_layers):
    """Deterministic synthetic params in PyTorch (out, in) convention."""
    keys = jax.random.split(key, 2 * num_layers + 4)
    s = 0.02
    params = {
        "proj_w": s * jax.random.normal(keys[0], (hidden_dim, num_node_features), jnp.float32),
        "proj_b": s * jax.random.normal(keys[1], (hidden_dim,), jnp.float32),
        "fc_w": s * jax.random.normal(keys[2], (embedding_dim, hidden_dim), jnp.float32),
        "fc_b": s * jax.random.normal(keys[3], (embedding_dim,), jnp.float32),
        "conv_w": jnp.stack(
            [s * jax.random.normal(keys[4 + 2 * i], (hidden_dim, hidden_dim), jnp.float32)
             for i in range(num_layers)]
        ),
        "conv_b": jnp.stack(
            [s * jax.random.normal(keys[5 + 2 * i], (hidden_dim,), jnp.float32)
             for i in range(num_layers)]
        ),
    }
    return params


@functools.partial(jax.jit, static_argnames=("num_graphs",))
def gcn_baseline_forward(params, x, edge_index, batch, num_graphs):
    n_raw = x.shape[0]
    a_hat = build_norm_adj(edge_index, n_raw, dtype=jnp.bfloat16)
    pool_mat = build_mean_pool_matrix(batch, num_graphs, dtype=jnp.bfloat16)

    # Fixed, generation-aware row tile (64 MiB-class VMEM -> 256; 128 MiB-class -> 512),
    # with the node axis padded up to a tile multiple. Zero-padded rows/cols cannot change
    # the pooled output (A_hat[real, pad] = 0 and pool_mat[:, pad] = 0); padded h rows do
    # accumulate relu(b_l), which only matters for a future target_idx gather path.
    tm_target = 256 if _tpu_vmem_capacity_bytes() <= (64 << 20) else 512
    if n_raw <= tm_target:
        n = _round_up(n_raw, 8)
        tm = n                                   # single row block (full-dim tile)
    else:
        n = _round_up(n_raw, tm_target)
        tm = tm_target
    if n != n_raw:
        x = jnp.pad(x, ((0, n - n_raw), (0, 0)))
        a_hat = jnp.pad(a_hat, ((0, n - n_raw), (0, n - n_raw)))
        pool_mat = jnp.pad(pool_mat, ((0, 0), (0, n - n_raw)))
    # Pad the graph axis to 8 sublanes so the epilogue stores are unmasked.
    gp = _round_up(num_graphs, 8)
    if gp != num_graphs:
        pool_mat = jnp.pad(pool_mat, ((0, gp - num_graphs), (0, 0)))

    h_dim = params["proj_w"].shape[0]
    e_dim = params["fc_w"].shape[0]

    proj_w = params["proj_w"].T                                               # (F, H) f32
    proj_b = params["proj_b"].reshape(1, h_dim)                               # (1, H) f32
    conv_w = jnp.transpose(params["conv_w"], (0, 2, 1)).astype(jnp.bfloat16)  # (L, Hin, Hout)
    conv_b = params["conv_b"][:, None, :]                                     # (L, 1, H) f32
    fc_w = params["fc_w"].T.astype(jnp.bfloat16)                              # (H, E) bf16
    fc_b = params["fc_b"].reshape(1, e_dim)                                   # (1, E) f32

    # TODO(synk): target_idx gather branch not implemented; only the global_mean_pool path.
    out = fused_gcn_forward(x, a_hat, pool_mat, proj_w, proj_b, conv_w, conv_b,
                            fc_w, fc_b, tm=tm)
    return out[:num_graphs]


def reference_forward(params, x, edge_index, batch, num_graphs):
    """Pure-JAX f32 reference of the same forward pass."""
    a_hat = build_norm_adj(edge_index, x.shape[0], dtype=jnp.float32)
    pool = build_mean_pool_matrix(batch, num_graphs, dtype=jnp.float32)
    h = x @ params["proj_w"].T + params["proj_b"]
    for wl, bl in zip(params["conv_w"], params["conv_b"]):
        h = jnp.maximum(a_hat @ (h @ wl.T) + bl, 0.0)
    return pool @ h @ params["fc_w"].T + params["fc_b"]


# ---------------------------------------------------------------------------
# Demo
# ---------------------------------------------------------------------------
if __name__ == "__main__":
    NUM_NODE_FEATURES = 5
    HIDDEN_DIM = 128        # lane-dense (real model uses 768 = 6*128)
    EMBEDDING_DIM = 128     # lane-dense (real model uses 512 = 4*128)
    NUM_LAYERS = 4
    NODES_PER_GRAPH = 160
    NUM_GRAPHS = 4
    N = NODES_PER_GRAPH * NUM_GRAPHS   # 640 -> padded to 768/1024 inside the wrapper

    key = jax.random.PRNGKey(0)
    k_param, k_x = jax.random.split(key)

    params = init_params(k_param, NUM_NODE_FEATURES, HIDDEN_DIM, EMBEDDING_DIM, NUM_LAYERS)

    # node features
    x = jax.random.normal(k_x, (N, NUM_NODE_FEATURES), jnp.float32)

    # a directed ring inside each graph
    src, dst = [], []
    for g in range(NUM_GRAPHS):
        base = g * NODES_PER_GRAPH
        for i in range(NODES_PER_GRAPH):
            src.append(base + i)
            dst.append(base + (i + 1) % NODES_PER_GRAPH)
    edge_index = jnp.array([src, dst], dtype=jnp.int32)        # (2, E)

    batch = jnp.repeat(jnp.arange(NUM_GRAPHS, dtype=jnp.int32), NODES_PER_GRAPH)  # (N,)

    out = gcn_baseline_forward(params, x, edge_index, batch, NUM_GRAPHS)
    out = jax.block_until_ready(out)
    assert out.shape == (NUM_GRAPHS, EMBEDDING_DIM)

    # correctness check vs. f32 reference (bf16 A_hat / weights / activations -> small drift)
    ref = reference_forward(params, x, edge_index, batch, NUM_GRAPHS)
    max_err = float(jnp.max(jnp.abs(out - ref)))
    assert max_err < 2e-2, f"mismatch vs f32 reference: max abs err = {max_err}"

    print("KERNEL_OK")
</pallas_src>

<mosaic_0001>
module attributes {stable_mosaic.version = 11 : i64} {
  func.func @_copy(%arg0: i32, %arg1: memref<8x128xf32, #tpu.memory_space<vmem>>, %arg2: memref<8x128xf32, #tpu.memory_space<vmem>>) attributes {dimension_semantics = [#tpu.dimension_semantics<arbitrary>], iteration_bounds = array<i64: 2>, scalar_prefetch = 0 : i64, scratch_operands = 0 : i64, tpu.core_type = #tpu.core_type<tc>, window_params = [{pipeline_mode = #tpu.pipeline_mode<synchronous>, transform_indices = @transform_0, window_bounds = array<i64: 8, 128>}, {transform_indices = @transform_1, window_bounds = array<i64: 8, 128>}]} {
    %c0 = arith.constant 0 : index
    %c0_0 = arith.constant 0 : index
    %0 = vector.load %arg1[%c0, %c0_0] : memref<8x128xf32, #tpu.memory_space<vmem>>, vector<8x128xf32>
    %c0_1 = arith.constant 0 : index
    %c0_2 = arith.constant 0 : index
    %1 = vector.load %arg2[%c0_1, %c0_2] : memref<8x128xf32, #tpu.memory_space<vmem>>, vector<8x128xf32>
    tpu.vector_store %arg2[%c0_1, %c0_2], %0 {strides = array<i32>} : memref<8x128xf32, #tpu.memory_space<vmem>>, vector<8x128xf32>,
    return
  }
  func.func @transform_0(%arg0: i32) -> (i32, i32) {
    %c0_i32 = arith.constant 0 : i32
    %c0_i32_0 = arith.constant 0 : i32
    %c0_i32_1 = arith.constant 0 : i32
    return %c0_i32, %c0_i32_0 : i32, i32
  }
  func.func @transform_1(%arg0: i32) -> (i32, i32) {
    %c0_i32 = arith.constant 0 : i32
    %c0_i32_0 = arith.constant 0 : i32
    return %arg0, %c0_i32 : i32, i32
  }
}

module attributes {stable_mosaic.version = 11 : i64} {
  func.func private @main(%arg0: i32) attributes {dimension_semantics = [#tpu.dimension_semantics<core_parallel>], iteration_bounds = array<i64: 2>, tpu.core_type = #tpu.core_type<sc_scalar_subcore>, window_params = []} {
    return
  }
}

module attributes {stable_mosaic.version = 11 : i64} {
  func.func private @main(%arg0: i32) attributes {dimension_semantics = [#tpu.dimension_semantics<core_parallel>], iteration_bounds = array<i64: 2>, tpu.core_type = #tpu.core_type<sc_scalar_subcore>, window_params = []} {
    return
  }
}

module attributes {stable_mosaic.version = 11 : i64} {
  func.func @_fused_gcn_kernel(%arg0: i32, %arg1: i32, %arg2: memref<768x5xf32, #tpu.memory_space<vmem>>, %arg3: memref<256x768xbf16, #tpu.memory_space<vmem>>, %arg4: memref<5x128xf32, #tpu.memory_space<vmem>>, %arg5: memref<1x128xf32, #tpu.memory_space<vmem>>, %arg6: memref<1x128x128xbf16, #tpu.memory_space<vmem>>, %arg7: memref<1x1x128xf32, #tpu.memory_space<vmem>>, %arg8: memref<8x256xbf16, #tpu.memory_space<vmem>>, %arg9: memref<128x128xbf16, #tpu.memory_space<vmem>>, %arg10: memref<1x128xf32, #tpu.memory_space<vmem>>, %arg11: memref<8x128xf32, #tpu.memory_space<vmem>>, %arg12: memref<768x128xbf16, #tpu.memory_space<vmem>>, %arg13: memref<768x128xbf16, #tpu.memory_space<vmem>>, %arg14: memref<8x128xf32, #tpu.memory_space<vmem>>) attributes {dimension_semantics = [#tpu.dimension_semantics<arbitrary>, #tpu.dimension_semantics<arbitrary>], iteration_bounds = array<i64: 4, 3>, scalar_prefetch = 0 : i64, scratch_operands = 3 : i64, tpu.core_type = #tpu.core_type<tc>, window_params = [{pipeline_mode = #tpu.pipeline_mode<synchronous>, transform_indices = @transform_0, window_bounds = array<i64: 768, 5>}, {transform_indices = @transform_1, window_bounds = array<i64: 256, 768>}, {pipeline_mode = #tpu.pipeline_mode<synchronous>, transform_indices = @transform_2, window_bounds = array<i64: 5, 128>}, {pipeline_mode = #tpu.pipeline_mode<synchronous>, transform_indices = @transform_3, window_bounds = array<i64: 1, 128>}, {transform_indices = @transform_4, window_bounds = array<i64: 1, 128, 128>}, {transform_indices = @transform_5, window_bounds = array<i64: 1, 1, 128>}, {transform_indices = @transform_6, window_bounds = array<i64: 8, 256>}, {pipeline_mode = #tpu.pipeline_mode<synchronous>, transform_indices = @transform_7, window_bounds = array<i64: 128, 128>}, {pipeline_mode = #tpu.pipeline_mode<synchronous>, transform_indices = @transform_8, window_bounds = array<i64: 1, 128>}, {pipeline_mode = #tpu.pipeline_mode<synchronous>, transform_indices = @transform_9, window_bounds = array<i64: 8, 128>}]} {
    %c0_i32 = arith.constant 0 : i32
    %0 = arith.cmpi eq, %arg0, %c0_i32 : i32
    %c0_i32_0 = arith.constant 0 : i32
    %1 = arith.cmpi eq, %arg1, %c0_i32_0 : i32
    %2 = arith.andi %0, %1 : i1
    %3 = arith.extui %2 : i1 to i32
    %c0_i32_1 = arith.constant 0 : i32
    %4 = arith.cmpi ne, %3, %c0_i32_1 : i32
    scf.if %4 {
      %c0_16 = arith.constant 0 : index
      %c0_17 = arith.constant 0 : index
      %30 = vector.load %arg2[%c0_16, %c0_17] : memref<768x5xf32, #tpu.memory_space<vmem>>, vector<768x5xf32>
      %c0_18 = arith.constant 0 : index
      %c0_19 = arith.constant 0 : index
      %31 = vector.load %arg4[%c0_18, %c0_19] : memref<5x128xf32, #tpu.memory_space<vmem>>, vector<5x128xf32>
      %cst_20 = arith.constant dense<0.000000e+00> : vector<768x128xf32>
      %32 = tpu.matmul %30, %31, %cst_20 {dimension_numbers = #tpu.dot_dimension_numbers<[1], [0], [0], [1], [0, 0, 1, 1], [], []>} : vector<768x5xf32>, vector<5x128xf32>, vector<768x128xf32> -> vector<768x128xf32>
      %c0_21 = arith.constant 0 : index
      %c0_22 = arith.constant 0 : index
      %33 = vector.load %arg5[%c0_21, %c0_22] : memref<1x128xf32, #tpu.memory_space<vmem>>, vector<1x128xf32>
      %34 = vector.broadcast %33 : vector<1x128xf32> to vector<768x128xf32>
      %35 = arith.addf %32, %34 : vector<768x128xf32>
      %36 = arith.truncf %35 : vector<768x128xf32> to vector<768x128xbf16>
      %c0_23 = arith.constant 0 : index
      %c0_24 = arith.constant 0 : index
      %37 = vector.load %arg12[%c0_23, %c0_24] : memref<768x128xbf16, #tpu.memory_space<vmem>>, vector<768x128xbf16>
      tpu.vector_store %arg12[%c0_23, %c0_24], %36 {strides = array<i32>} : memref<768x128xbf16, #tpu.memory_space<vmem>>, vector<768x128xbf16>,
      %cst_25 = arith.constant 0.000000e+00 : f32
      %38 = vector.broadcast %cst_25 : f32 to vector<8x128xf32>
      %c0_26 = arith.constant 0 : index
      %c0_27 = arith.constant 0 : index
      %39 = vector.load %arg14[%c0_26, %c0_27] : memref<8x128xf32, #tpu.memory_space<vmem>>, vector<8x128xf32>
      tpu.vector_store %arg14[%c0_26, %c0_27], %38 {strides = array<i32>} : memref<8x128xf32, #tpu.memory_space<vmem>>, vector<8x128xf32>,
    } else {
    }
    %c0_i32_2 = arith.constant 0 : i32
    %5 = arith.cmpi eq, %arg1, %c0_i32_2 : i32
    %6 = arith.extui %5 : i1 to i32
    %c0_i32_3 = arith.constant 0 : i32
    %7 = arith.cmpi ne, %6, %c0_i32_3 : i32
    scf.if %7 {
      %c0_16 = arith.constant 0 : index
      %c0_17 = arith.constant 0 : index
      %30 = vector.load %arg12[%c0_16, %c0_17] : memref<768x128xbf16, #tpu.memory_space<vmem>>, vector<768x128xbf16>
      %c0_18 = arith.constant 0 : index
      %c0_19 = arith.constant 0 : index
      %c0_20 = arith.constant 0 : index
      %31 = vector.load %arg6[%c0_18, %c0_19, %c0_20] : memref<1x128x128xbf16, #tpu.memory_space<vmem>>, vector<1x128x128xbf16>
      %32 = vector.shape_cast %31 : vector<1x128x128xbf16> to vector<128x128xbf16>
      %cst_21 = arith.constant dense<0.000000e+00> : vector<768x128xf32>
      %33 = tpu.matmul %30, %32, %cst_21 {dimension_numbers = #tpu.dot_dimension_numbers<[1], [0], [0], [1], [0, 0, 1, 1], [], []>} : vector<768x128xbf16>, vector<128x128xbf16>, vector<768x128xf32> -> vector<768x128xf32>
      %34 = arith.truncf %33 : vector<768x128xf32> to vector<768x128xbf16>
      %c0_22 = arith.constant 0 : index
      %c0_23 = arith.constant 0 : index
      %35 = vector.load %arg13[%c0_22, %c0_23] : memref<768x128xbf16, #tpu.memory_space<vmem>>, vector<768x128xbf16>
      tpu.vector_store %arg13[%c0_22, %c0_23], %34 {strides = array<i32>} : memref<768x128xbf16, #tpu.memory_space<vmem>>, vector<768x128xbf16>,
    } else {
    }
    %c0 = arith.constant 0 : index
    %c0_4 = arith.constant 0 : index
    %8 = vector.load %arg3[%c0, %c0_4] : memref<256x768xbf16, #tpu.memory_space<vmem>>, vector<256x768xbf16>
    %c0_5 = arith.constant 0 : index
    %c0_6 = arith.constant 0 : index
    %9 = vector.load %arg13[%c0_5, %c0_6] : memref<768x128xbf16, #tpu.memory_space<vmem>>, vector<768x128xbf16>
    %cst = arith.constant dense<0.000000e+00> : vector<256x128xf32>
    %10 = tpu.matmul %8, %9, %cst {dimension_numbers = #tpu.dot_dimension_numbers<[1], [0], [0], [1], [0, 0, 1, 1], [], []>} : vector<256x768xbf16>, vector<768x128xbf16>, vector<256x128xf32> -> vector<256x128xf32>
    %c0_7 = arith.constant 0 : index
    %c0_8 = arith.constant 0 : index
    %c0_9 = arith.constant 0 : index
    %11 = vector.load %arg7[%c0_7, %c0_8, %c0_9] : memref<1x1x128xf32, #tpu.memory_space<vmem>>, vector<1x1x128xf32>
    %12 = vector.shape_cast %11 : vector<1x1x128xf32> to vector<1x128xf32>
    %13 = vector.broadcast %12 : vector<1x128xf32> to vector<256x128xf32>
    %14 = arith.addf %10, %13 : vector<256x128xf32>
    %cst_10 = arith.constant 0.000000e+00 : f32
    %15 = vector.broadcast %cst_10 : f32 to vector<256x128xf32>
    %16 = arith.maximumf %14, %15 : vector<256x128xf32>
    %c256_i32 = arith.constant 256 : i32
    %17 = arith.muli %arg1, %c256_i32 : i32
    %18 = tpu.assume_multiple %17, 256 : i32
    %c3_i32 = arith.constant 3 : i32
    %19 = arith.cmpi slt, %arg0, %c3_i32 : i32
    %20 = arith.extui %19 : i1 to i32
    %c0_i32_11 = arith.constant 0 : i32
    %21 = arith.cmpi ne, %20, %c0_i32_11 : i32
    scf.if %21 {
      %30 = arith.truncf %16 : vector<256x128xf32> to vector<256x128xbf16>
      %31 = arith.index_cast %18 : i32 to index
      %c0_16 = arith.constant 0 : index
      %32 = vector.load %arg12[%31, %c0_16] : memref<768x128xbf16, #tpu.memory_space<vmem>>, vector<256x128xbf16>
      tpu.vector_store %arg12[%31, %c0_16], %30 {strides = array<i32>} : memref<768x128xbf16, #tpu.memory_space<vmem>>, vector<256x128xbf16>,
    } else {
    }
    %c3_i32_12 = arith.constant 3 : i32
    %22 = arith.cmpi eq, %arg0, %c3_i32_12 : i32
    %23 = arith.extui %22 : i1 to i32
    %c0_i32_13 = arith.constant 0 : i32
    %24 = arith.cmpi ne, %23, %c0_i32_13 : i32
    scf.if %24 {
      %c0_16 = arith.constant 0 : index
      %c0_17 = arith.constant 0 : index
      %30 = vector.load %arg14[%c0_16, %c0_17] : memref<8x128xf32, #tpu.memory_space<vmem>>, vector<8x128xf32>
      %c0_18 = arith.constant 0 : index
      %c0_19 = arith.constant 0 : index
      %31 = vector.load %arg8[%c0_18, %c0_19] : memref<8x256xbf16, #tpu.memory_space<vmem>>, vector<8x256xbf16>
      %32 = arith.truncf %16 : vector<256x128xf32> to vector<256x128xbf16>
      %cst_20 = arith.constant dense<0.000000e+00> : vector<8x128xf32>
      %33 = tpu.matmul %31, %32, %cst_20 {dimension_numbers = #tpu.dot_dimension_numbers<[1], [0], [0], [1], [0, 0, 1, 1], [], []>} : vector<8x256xbf16>, vector<256x128xbf16>, vector<8x128xf32> -> vector<8x128xf32>
      %34 = arith.addf %30, %33 : vector<8x128xf32>
      %c0_21 = arith.constant 0 : index
      %c0_22 = arith.constant 0 : index
      %35 = vector.load %arg14[%c0_21, %c0_22] : memref<8x128xf32, #tpu.memory_space<vmem>>, vector<8x128xf32>
      tpu.vector_store %arg14[%c0_21, %c0_22], %34 {strides = array<i32>} : memref<8x128xf32, #tpu.memory_space<vmem>>, vector<8x128xf32>,
    } else {
    }
    %c3_i32_14 = arith.constant 3 : i32
    %25 = arith.cmpi eq, %arg0, %c3_i32_14 : i32
    %c2_i32 = arith.constant 2 : i32
    %26 = arith.cmpi eq, %arg1, %c2_i32 : i32
    %27 = arith.andi %25, %26 : i1
    %28 = arith.extui %27 : i1 to i32
    %c0_i32_15 = arith.constant 0 : i32
    %29 = arith.cmpi ne, %28, %c0_i32_15 : i32
    scf.if %29 {
      %c0_16 = arith.constant 0 : index
      %c0_17 = arith.constant 0 : index
      %30 = vector.load %arg14[%c0_16, %c0_17] : memref<8x128xf32, #tpu.memory_space<vmem>>, vector<8x128xf32>
      %31 = arith.truncf %30 : vector<8x128xf32> to vector<8x128xbf16>
      %c0_18 = arith.constant 0 : index
      %c0_19 = arith.constant 0 : index
      %32 = vector.load %arg9[%c0_18, %c0_19] : memref<128x128xbf16, #tpu.memory_space<vmem>>, vector<128x128xbf16>
      %cst_20 = arith.constant dense<0.000000e+00> : vector<8x128xf32>
      %33 = tpu.matmul %31, %32, %cst_20 {dimension_numbers = #tpu.dot_dimension_numbers<[1], [0], [0], [1], [0, 0, 1, 1], [], []>} : vector<8x128xbf16>, vector<128x128xbf16>, vector<8x128xf32> -> vector<8x128xf32>
      %c0_21 = arith.constant 0 : index
      %c0_22 = arith.constant 0 : index
      %34 = vector.load %arg10[%c0_21, %c0_22] : memref<1x128xf32, #tpu.memory_space<vmem>>, vector<1x128xf32>
      %35 = vector.broadcast %34 : vector<1x128xf32> to vector<8x128xf32>
      %36 = arith.addf %33, %35 : vector<8x128xf32>
      %c0_23 = arith.constant 0 : index
      %c0_24 = arith.constant 0 : index
      %37 = vector.load %arg11[%c0_23, %c0_24] : memref<8x128xf32, #tpu.memory_space<vmem>>, vector<8x128xf32>
      tpu.vector_store %arg11[%c0_23, %c0_24], %36 {strides = array<i32>} : memref<8x128xf32, #tpu.memory_space<vmem>>, vector<8x128xf32>,
    } else {
    }
    return
  }
  func.func @transform_0(%arg0: i32, %arg1: i32) -> (i32, i32) {
    %c0_i32 = arith.constant 0 : i32
    %c0_i32_0 = arith.constant 0 : i32
    %c0_i32_1 = arith.constant 0 : i32
    return %c0_i32, %c0_i32_0 : i32, i32
  }
  func.func @transform_1(%arg0: i32, %arg1: i32) -> (i32, i32) {
    %c0_i32 = arith.constant 0 : i32
    %c0_i32_0 = arith.constant 0 : i32
    return %arg1, %c0_i32 : i32, i32
  }
  func.func @transform_2(%arg0: i32, %arg1: i32) -> (i32, i32) {
    %c0_i32 = arith.constant 0 : i32
    %c0_i32_0 = arith.constant 0 : i32
    %c0_i32_1 = arith.constant 0 : i32
    return %c0_i32, %c0_i32_0 : i32, i32
  }
  func.func @transform_3(%arg0: i32, %arg1: i32) -> (i32, i32) {
    %c0_i32 = arith.constant 0 : i32
    %c0_i32_0 = arith.constant 0 : i32
    %c0_i32_1 = arith.constant 0 : i32
    return %c0_i32, %c0_i32_0 : i32, i32
  }
  func.func @transform_4(%arg0: i32, %arg1: i32) -> (i32, i32, i32) {
    %c0_i32 = arith.constant 0 : i32
    %c0_i32_0 = arith.constant 0 : i32
    %c0_i32_1 = arith.constant 0 : i32
    return %arg0, %c0_i32, %c0_i32_0 : i32, i32, i32
  }
  func.func @transform_5(%arg0: i32, %arg1: i32) -> (i32, i32, i32) {
    %c0_i32 = arith.constant 0 : i32
    %c0_i32_0 = arith.constant 0 : i32
    %c0_i32_1 = arith.constant 0 : i32
    return %arg0, %c0_i32, %c0_i32_0 : i32, i32, i32
  }
  func.func @transform_6(%arg0: i32, %arg1: i32) -> (i32, i32) {
    %c0_i32 = arith.constant 0 : i32
    %c0_i32_0 = arith.constant 0 : i32
    return %c0_i32, %arg1 : i32, i32
  }
  func.func @transform_7(%arg0: i32, %arg1: i32) -> (i32, i32) {
    %c0_i32 = arith.constant 0 : i32
    %c0_i32_0 = arith.constant 0 : i32
    %c0_i32_1 = arith.constant 0 : i32
    return %c0_i32, %c0_i32_0 : i32, i32
  }
  func.func @transform_8(%arg0: i32, %arg1: i32) -> (i32, i32) {
    %c0_i32 = arith.constant 0 : i32
    %c0_i32_0 = arith.constant 0 : i32
    %c0_i32_1 = arith.constant 0 : i32
    return %c0_i32, %c0_i32_0 : i32, i32
  }
  func.func @transform_9(%arg0: i32, %arg1: i32) -> (i32, i32) {
    %c0_i32 = arith.constant 0 : i32
    %c0_i32_0 = arith.constant 0 : i32
    %c0_i32_1 = arith.constant 0 : i32
    return %c0_i32, %c0_i32_0 : i32, i32
  }
}

</mosaic_0001>

<bundles_post_ra>
// kernel: tpu_custom_call.1
= control target key start
LH: loop header
LB: loop body
LE: loop exit
PB: predicated region body
PF: predicated region fallthrough
CT: control target
= control target key end

     0   :  { %6 = vsyncpa [#allocation3], 0  ;;  %s481_s0 = inlined_call_operand.hbm [shape: f32[8,128], index: 0, kind: input, shape index: {}]   ;;  %s482_s1 = inlined_call_operand.hbm [shape: f32[16,128], index: 1, kind: output, shape index: {}]  }
   0x1   :  { %7 = vsyncpa [#allocation4], 0 }
   0x2   :  { %9 = vsyncpa [#allocation4 + $0x1], 0  ;;  %s351_s6 = smov 0   ;;  %s353_s7 = smov 0  }
   0x3   :  { %s355_s8 = smov 0   ;;  %s357_s9 = smov 0  }
   0x4 LB: > { %s372_s10 = sadd.s32 4294967295, %s337_s9   ;;  %s183_s11 = sadd.s32 4294967294, %s337_s9   ;;  %s337_s9 = sphi %s357_s9, %s498_s9   ;;  %s333_s8 = sphi %s355_s8, %s497_s8   ;;  %s329_s7 = sphi %s353_s7, %s496_s7   ;;  %s325_s6 = sphi %s351_s6, %s495_s6  }
   0x5   : > { %s376_s12 = sadd.s32 1, %s337_s9   ;;  %s43_s13 = sadd.s32 1, %s333_s8 }
   0x6   : > { %s40_s14 = ssub.s32 %s337_s9, %s376_s12  ;;  %p53_p0 = scmp.ne.s32.totalorder %s333_s8, %s329_s7 }
   0x7   : > { %p41_p1 = scmp.eq.s32.totalorder %s40_s14, 0  ;;  %p54_p2 = scmp.eq.s32.totalorder %s372_s10, 1 }
   0x8   : > { %p59_p3 = scmp.ne.s32.totalorder %s329_s7, %s325_s6  ;;  %p60_p4 = scmp.eq.s32.totalorder %s183_s11, 1 }
   0x9   : > { %s387_s15 = scalar_select %p41_p1, %s333_s8, %s43_s13  }
   0xa   : > { %p389_p5 = por %p54_p2, %p53_p0  ;;  %p393_p6 = por %p60_p4, %p59_p3 }
   0xb   : > { %p184_p7 = scmp.ge.s32.totalorder %s337_s9, 1  ;;  %p67_p8 = scmp.lt.s32.totalorder %s337_s9, 3 }
   0xc   : > { %s486_s16 = scalar_select %p389_p5, 1, 0 }
   0xd   : > { %s487_s17 = scalar_select %p393_p6, 1, 0 }
   0xe   : > { %p483_p9 = scmp.eq.s32.totalorder %s372_s10, 0  ;;  %p400_p10 = pnand %p184_p7, %p67_p8 }
   0xf   : > { %s339_s19 = smov [#allocation2]   ;;  %s243_s24 = scalar_lea.hbm %s481_s0, 128 }
  0x10   : > { %s488_s18 = scalar_select %p400_p10, 1, 0 }
  0x11   : > { %s80_s20 = sshll.u32 %s339_s19, 4  ;;  %p199_p11 = pneg %p400_p10  ;;  %s81_s20 = int_to_ptr.vmem [resolvable:$true] %s80_s20 }
  0x12   : > { %p244_p13 = scmp.ne.s32.totalorder %s481_s0, %s243_s24  ;;  %p250_p3 = scmp.lt.u32.totalorder %s243_s24, %s481_s0 }
  0x13   : > { %p408_p12 = pnand %p483_p9, %p199_p11 }
  0x15   : > { %p245_p0 = pneg %p408_p12 }
  0x17   : > { %p246_p1 = pnand %p245_p0, %p244_p13 }
  0x19   : > { %p247_p2 = pneg %p246_p1 }
  0x1b   : > { %p252_p4 = pnand %p250_p3, %p247_p2 }
  0x1d   : > { %255 = shalt.err (!%p252_p4)
}
  0x1e   : > { %s256_s29 = scalar_lea.vmem %s81_s20, 128  ;;  %p264_p9 = scmp.lt.s32.totalorder %s81_s20, %s81_s20 }
  0x1f   : > { %p257_p7 = scmp.ne.s32.totalorder %s81_s20, %s256_s29  ;;  %p265_p6 = scmp.lt.s32.totalorder %s256_s29, %s256_s29 }
  0x21   : > { %p259_p8 = pnand %p257_p7, %p245_p0  ;;  %p266_p5 = por %p265_p6, %p264_p9 }
  0x23   : > { %p260_p11 = pneg %p259_p8 }
  0x25   : > { %p267_p10 = pnand %p266_p5, %p260_p11 }
  0x27   : > { %270 = shalt.err (!%p267_p10)
}
  0x28   : > { %202 = dma.hbm_to_vmem [thread:$0]  (!%p408_p12), %s481_s0, 128, %s81_s20, [#allocation3]  }
  0x29   : > { %p490_p13 = scmp.ne.s32.totalorder %s488_s18, 0 }
  0x2a   : > { %p491_p1 = scmp.eq.s32.totalorder (!%p490_p13), %s372_s10, 0 }
  0x2b   : > { %93 = sbr.rel (%p490_p13) target bundleno = 77 (0x4d), region = 24 }
  0x32   : > { %316 = dma.done.wait (%p491_p1), [#allocation3], 128   ;;  %p492_p0 = pmov %p491_p1 }
  0x33   : > { %s105_s3 = sand.u32 1, %s329_s7   ;;  %s190_s13 = sshll.u32 %s372_s10, 7  ;;  %v108_v0 = vld [vmem:[#allocation2] sm:$0xff] }
  0x34   : > { %318 = vsyncadd (%p492_p0), [#allocation3], 4294967168  ;;  %s188_s4 = sshll.u32 %s105_s3, 3  ;;  %s441_s18 = scalar_lea.hbm %s482_s1, %s190_s13 }
  0x35   : > { %s107_s5 = scalar_lea.vmem [#allocation5], %s188_s4  ;;  %s111_s20 = scalar_lea.sflag [#allocation4], %s105_s3 }
  0x36   : > { %s124_s11 = sshll.u32 %s107_s5, 4  ;;  %109 = vst [vmem:[%s107_s5] sm:$0xff] %v108_v0  ;;  %p493_p6 = scmp.ne.s32.totalorder %s486_s16, 0  ;;  %s436_s11 = int_to_ptr.vmem [resolvable:$true] %s124_s11 }
  0x37   : > { %s271_s21 = scalar_lea.vmem %s436_s11, 128  ;;  %s340_s22 = smov [#allocation5]  }
  0x38   : > { %p272_p5 = scmp.ne.s32.totalorder %s436_s11, %s271_s21  ;;  %s275_s10 = sshll.u32 %s340_s22, 4  ;;  %s276_s10 = int_to_ptr.vmem [resolvable:$false] %s275_s10 }
  0x39   : > { %s277_s23 = scalar_lea.vmem %s276_s10, 256  ;;  %p278_p12 = scmp.lt.s32.totalorder %s436_s11, %s276_s10 }
  0x3a   : > { %p273_p9 = pnand %p272_p5, %p493_p6  ;;  %p279_p2 = scmp.lt.s32.totalorder %s277_s23, %s271_s21 }
  0x3c   : > { %p274_p10 = pneg %p273_p9  ;;  %p280_p3 = por %p279_p2, %p278_p12 }
  0x3e   : > { %p281_p4 = pnand %p280_p3, %p274_p10 }
  0x40   : > { %284 = shalt.err (!%p281_p4)
}
  0x41   : > { %s285_s24 = scalar_lea.hbm %s441_s18, 128  ;;  %s289_s27 = scalar_lea.hbm %s482_s1, 256 }
  0x42   : > { %p286_p7 = scmp.ne.s32.totalorder %s441_s18, %s285_s24  ;;  %p290_p13 = scmp.lt.u32.totalorder %s441_s18, %s482_s1 }
  0x43   : > { %p291_p1 = scmp.lt.u32.totalorder %s289_s27, %s285_s24  ;;  %p293_p5 = scmp.lt.u32.totalorder %s285_s24, %s441_s18 }
  0x44   : > { %p287_p8 = pnand %p286_p7, %p493_p6 }
  0x45   : > { %p292_p0 = por %p291_p1, %p290_p13 }
  0x46   : > { %p288_p11 = pneg %p287_p8 }
  0x47   : > { %p294_p9 = por %p293_p5, %p292_p0 }
  0x49   : > { %p295_p10 = pnand %p294_p9, %p288_p11 }
  0x4b   : > { %298 = shalt.err (!%p295_p10)
}
  0x4c   : > { %197 = dma.vmem_to_hbm [thread:$0]  (%p493_p6), %s436_s11, 128, %s441_s18, %s111_s20  }
  0x4d PF: > { %p209_p12 = scmp.ge.s32.totalorder %s337_s9, 2  ;;  %s136_s30 = sand.u32 1, %s325_s6  }
  0x4e   : > { %p494_p2 = scmp.ne.s32.totalorder %s487_s17, 0  ;;  %s137_s2 = scalar_lea.sflag [#allocation4], %s136_s30 }
  0x50   : > { %p204_p3 = pnand %p209_p12, %p494_p2 }
  0x52   : > { %320 = dma.done.wait (!%p204_p3), %s137_s2, 128  }
  0x53   : > { %322 = vsyncadd (!%p204_p3), %s137_s2, 4294967168  ;;  %p12_p4 = scmp.ge.s32.totalorder %s376_s12, 4   ;;  %s495_s6 = smov %s329_s7 }
  0x54   : > { %s496_s7 = smov %s333_s8  ;;  %s497_s8 = smov %s387_s15 }
  0x55   : > { %s498_s9 = smov %s376_s12  ;;  %14 = sbr.rel (!%p12_p4) target bundleno = 4 (0x4), region = 61 }
  0x5c   :  { %142 = vsyncpa [#allocation3], 1 }
  0x5d   :  { %144 = vsyncpa [#allocation3 + $0x1], 1 }
  0x5e   :  { %145 = vsyncpa [#allocation4], 1 }
  0x5f   :  { %147 = vsyncpa [#allocation4 + $0x1], 1 }

// kernel: gcn_baseline_forward.1
= control target key start
LH: loop header
LB: loop body
LE: loop exit
PB: predicated region body
PF: predicated region fallthrough
CT: control target
= control target key end

     0   :  { %s4879_s30 = smov 0   ;;  %s4881_s10 = smov 0   ;;  %s5948_s0 = inlined_call_operand.vmem [shape: f32[768,5], index: 0, kind: input, shape index: {}]   ;;  %s5949_s1 = inlined_call_operand.vmem [shape: bf16[768,768], index: 1, kind: input, shape index: {}]   ;;  %s5950_s2 = inlined_call_operand.vmem [shape: f32[5,128], index: 2, kind: input, shape index: {}]   ;;  %s5951_s3 = inlined_call_operand.vmem [shape: f32[1,128], index: 3, kind: input, shape index: {}]   ;;  %s5952_s4 = inlined_call_operand.vmem [shape: bf16[4,128,128], index: 4, kind: input, shape index: {}]   ;;  %s5953_s5 = inlined_call_operand.vmem [shape: f32[4,1,128], index: 5, kind: input, shape index: {}]   ;;  %s5954_s6 = inlined_call_operand.vmem [shape: bf16[8,768], index: 6, kind: input, shape index: {}]   ;;  %s5955_s7 = inlined_call_operand.vmem [shape: bf16[128,128], index: 7, kind: input, shape index: {}]   ;;  %s5956_s8 = inlined_call_operand.vmem [shape: f32[1,128], index: 8, kind: input, shape index: {}]   ;;  %s5957_s9 = inlined_call_operand.vmem [shape: f32[8,128], index: 9, kind: output, shape index: {}]  }
   0x1   :  { %s4883_s11 = smov 0   ;;  %s4885_s12 = smov 0  }
   0x2   :  { %s4887_s13 = smov 0  }
   0x3 LB: > { %s28_s14 = sadd.s32 1, %s4816_s11  ;;  %s31_s15 = sadd.s32 1, %s4820_s12  ;;  %s4824_s13 = sphi %s4887_s13, %s19_s13   ;;  %s4820_s12 = sphi %s4885_s12, %s6007_s12   ;;  %s4816_s11 = sphi %s4883_s11, %s6006_s11   ;;  %s4812_s10 = sphi %s4881_s10, %s6005_s10   ;;  %s4808_s30 = sphi %s4879_s30, %s6004_s30  }
   0x4   : > { %p29_p0 = scmp.ge.s32.totalorder %s28_s14, 3  ;;  %p3519_p1 = scmp.ge.s32.totalorder %s4824_s13, 1 }
   0x5   : > { %p325_p2 = scmp.lt.s32.totalorder %s4824_s13, 13 }
   0x6   : > { %s6009_s14 = smov (%p29_p0, %s28_s14), 0  ;;  %s6011_s15 = smov (!%p29_p0, %s31_s15), %s4820_s12 }
   0x7   : > { %5962 = sst [smem:[#allocation5_spill]] %s6009_s14  ;;  %p326_p3 = pnand %p3519_p1, %p325_p2 }
   0x8   : > { %p33_p4 = scmp.ge.s32.totalorder %s6011_s15, 4  ;;  %s3520_s16 = sshll.u32 (!%p326_p3), %s4808_s30, 5 }
   0x9   : > { %329 = sbr.rel (%p326_p3) target bundleno = 1622 (0x656), region = 56  ;;  %p377_p5 = scmp.lt.s32.totalorder (!%p326_p3), %s4812_s10, 3 }
   0xa   : > { %s6013_s15 = smov (%p33_p4, %s6011_s15), 0  ;;  %p371_p6 = scmp.lt.s32.totalorder (!%p326_p3), %s3520_s16, 95 }
   0xb   : > { %5963 = sst [smem:[#allocation6_spill]] %s6013_s15  ;;  %s3524_s17 = sshll.u32 (!%p326_p3), %s4808_s30, 1 }
   0xc   : > { %p386_p7 = scmp.lt.s32.totalorder (!%p326_p3), %s3524_s17, 5  ;;  %p392_p8 = scmp.eq.s32.totalorder (!%p326_p3), %s4812_s10, 0 }
   0xd   : > { %p393_p9 = scmp.eq.s32.totalorder (!%p326_p3), %s4808_s30, 0 }
   0xf   : > { %p394_p10 = pnand (!%p326_p3), %p393_p9, %p392_p8 }
  0x10   : > { %s4917_s18 = scalar_select %p377_p5, %s4812_s10, 3 }
  0x11   : > { %s6015_s16 = smov (!%p371_p6, %s3520_s16), 95  ;;  %s6017_s17 = smov (!%p386_p7, %s3524_s17), 5 }
  0x12   : > { %s3747_s19 = sshll.u32 %s4917_s18, 6  ;;  %s384_s22 = scalar_lea.vmem %s5953_s5, %s4917_s18  ;;  %v494_v0 = vld [vmem:[%s5950_s2] sm:$0x1f] (!%p394_p10)  ;;  %vm791_vm0 = vcmask (!%p394_p10), 1044480   ;;  %vm502_vm1 = vcmask (!%p394_p10), 39936   ;;  %v399_v3 = vld [vmem:[%s5948_s0 + $0x8] sm:$0xff] (!%p394_p10) }
  0x13   : > { %s4580_s23 = smul.u32 24, %s6015_s16  ;;  %s4927_s26 = scalar_lea.vmem %s5952_s4, %s3747_s19  ;;  %v398_v1 = vld [vmem:[%s5948_s0] sm:$0xff] (!%p394_p10)  ;;  %4268 = vmatprep.subr.msk.mxu0 (!%p394_p10), %vm791_vm0, %v494_v0  ;;  %4546 = vmatprep.subr.msk.mxu1 (!%p394_p10), %vm791_vm0, %v494_v0  ;;  %v447_v4 = vld [vmem:[%s5948_s0 + $0x188] sm:$0xff] (!%p394_p10)  ;;  %v400_v5 = vld [vmem:[%s5948_s0 + $0x10] sm:$0xff] (!%p394_p10) }
  0x14   : > { %s3525_s15 = sshll.u32 %s6017_s17, 2  ;;  %397 = sbr.rel (%p394_p10) target bundleno = 332 (0x14c), region = 60  ;;  %v446_v2 = vld [vmem:[%s5948_s0 + $0x180] sm:$0xff] (!%p394_p10)  ;;  %4269 = vmatpush3.msk.msra.mxu0 (!%p394_p10), %vm791_vm0, %v494_v0  ;;  %4547 = vmatpush3.msk.msra.mxu1 (!%p394_p10), %vm791_vm0, %v494_v0  ;;  %v448_v6 = vld [vmem:[%s5948_s0 + $0x190] sm:$0xff] (!%p394_p10)  ;;  %v401_v7 = vld [vmem:[%s5948_s0 + $0x18] sm:$0xff] (!%p394_p10) }
  0x15   : > { %s4933_s29 = scalar_lea.vmem %s5949_s1, %s4580_s23  ;;  %s4939_s16 = scalar_lea.vmem %s5954_s6, %s3525_s15  ;;  %4270 = vmatprep.mubr.msk.f32.mxu0 (!%p394_p10), %vm502_vm1, %v398_v1  ;;  %4342 = vmatprep.mubr.msk.f32.mxu1 (!%p394_p10), %vm502_vm1, %v446_v2  ;;  %v449_v8 = vld [vmem:[%s5948_s0 + $0x198] sm:$0xff] (!%p394_p10)  ;;  %v402_v9 = vld [vmem:[%s5948_s0 + $0x20] sm:$0xff] (!%p394_p10)  ;;  %v403_v11 = vld [vmem:[%s5948_s0 + $0x28] sm:$0xff] (!%p394_p10) }
  0x16   : > { %4271 = vmatmul.mubr.msk.f32.vlgmr.msra.gmra.mrb[0].mxu0 (!%p394_p10), %vm502_vm1, %v399_v3  ;;  %4343 = vmatmul.mubr.msk.f32.vlgmr.msra.gmra.mrb[0].mxu1 (!%p394_p10), %vm502_vm1, %v447_v4  ;;  %v450_v10 = vld [vmem:[%s5948_s0 + $0x1a0] sm:$0xff] (!%p394_p10)  ;;  %v451_v12 = vld [vmem:[%s5948_s0 + $0x1a8] sm:$0xff] (!%p394_p10)  ;;  %v404_v13 = vld [vmem:[%s5948_s0 + $0x30] sm:$0xff] (!%p394_p10) }
  0x17   : > { %4273 = vmatprep.mubr.msk.f32.mxu0 (!%p394_p10), %vm502_vm1, %v400_v5  ;;  %4345 = vmatprep.mubr.msk.f32.mxu1 (!%p394_p10), %vm502_vm1, %v448_v6  ;;  %v452_v14 = vld [vmem:[%s5948_s0 + $0x1b0] sm:$0xff] (!%p394_p10)  ;;  %v405_v15 = vld [vmem:[%s5948_s0 + $0x38] sm:$0xff] (!%p394_p10)  ;;  %v406_v17 = vld [vmem:[%s5948_s0 + $0x40] sm:$0xff] (!%p394_p10) }
  0x18   : > { %v453_v16 = vld [vmem:[%s5948_s0 + $0x1b8] sm:$0xff] (!%p394_p10)  ;;  %v454_v18 = vld [vmem:[%s5948_s0 + $0x1c0] sm:$0xff] (!%p394_p10)  ;;  %v407_v19 = vld [vmem:[%s5948_s0 + $0x48] sm:$0xff] (!%p394_p10) }
  0x19   : > { %v455_v20 = vld [vmem:[%s5948_s0 + $0x1c8] sm:$0xff] (!%p394_p10)  ;;  %v408_v21 = vld [vmem:[%s5948_s0 + $0x50] sm:$0xff] (!%p394_p10)  ;;  %v409_v23 = vld [vmem:[%s5948_s0 + $0x58] sm:$0xff] (!%p394_p10) }
  0x1a   : > { %4274 = vmatmul.mubr.msk.f32.gmra.mrb[2].mxu0 (!%p394_p10), %vm502_vm1, %v401_v7  ;;  %4346 = vmatmul.mubr.msk.f32.gmra.mrb[2].mxu1 (!%p394_p10), %vm502_vm1, %v449_v8  ;;  %v456_v22 = vld [vmem:[%s5948_s0 + $0x1d0] sm:$0xff] (!%p394_p10)  ;;  %v457_v24 = vld [vmem:[%s5948_s0 + $0x1d8] sm:$0xff] (!%p394_p10)  ;;  %v410_v25 = vld [vmem:[%s5948_s0 + $0x60] sm:$0xff] (!%p394_p10) }
  0x1b   : > { %4276 = vmatprep.mubr.msk.f32.mxu0 %vm502_vm1, %v402_v9  ;;  %4348 = vmatprep.mubr.msk.f32.mxu1 %vm502_vm1, %v450_v10  ;;  %v458_v26 = vld [vmem:[%s5948_s0 + $0x1e0] sm:$0xff]  ;;  %v411_v27 = vld [vmem:[%s5948_s0 + $0x68] sm:$0xff]  ;;  %v412_v29 = vld [vmem:[%s5948_s0 + $0x70] sm:$0xff] }
  0x1c   : > { %v459_v28 = vld [vmem:[%s5948_s0 + $0x1e8] sm:$0xff]  ;;  %v460_v30 = vld [vmem:[%s5948_s0 + $0x1f0] sm:$0xff]  ;;  %v413_v31 = vld [vmem:[%s5948_s0 + $0x78] sm:$0xff] }
  0x1d   : > { %v461_v32 = vld [vmem:[%s5948_s0 + $0x1f8] sm:$0xff]  ;;  %v414_v33 = vld [vmem:[%s5948_s0 + $0x80] sm:$0xff]  ;;  %v415_v35 = vld [vmem:[%s5948_s0 + $0x88] sm:$0xff] }
  0x1e   : > { %4277 = vmatmul.mubr.msk.f32.gmra.mrb[4].mxu0 %vm502_vm1, %v403_v11  ;;  %4349 = vmatmul.mubr.msk.f32.gmra.mrb[4].mxu1 %vm502_vm1, %v451_v12  ;;  %v462_v34 = vld [vmem:[%s5948_s0 + $0x200] sm:$0xff]  ;;  %v463_v36 = vld [vmem:[%s5948_s0 + $0x208] sm:$0xff]  ;;  %v416_v37 = vld [vmem:[%s5948_s0 + $0x90] sm:$0xff] }
  0x1f   : > { %4279 = vmatprep.mubr.msk.f32.mxu0 %vm502_vm1, %v404_v13  ;;  %4351 = vmatprep.mubr.msk.f32.mxu1 %vm502_vm1, %v452_v14  ;;  %v464_v38 = vld [vmem:[%s5948_s0 + $0x210] sm:$0xff]  ;;  %v417_v39 = vld [vmem:[%s5948_s0 + $0x98] sm:$0xff]  ;;  %v418_v41 = vld [vmem:[%s5948_s0 + $0xa0] sm:$0xff] }
  0x20   : > { %v465_v40 = vld [vmem:[%s5948_s0 + $0x218] sm:$0xff]  ;;  %v466_v42 = vld [vmem:[%s5948_s0 + $0x220] sm:$0xff]  ;;  %v419_v43 = vld [vmem:[%s5948_s0 + $0xa8] sm:$0xff] }
  0x21   : > { %v467_v44 = vld [vmem:[%s5948_s0 + $0x228] sm:$0xff]  ;;  %v420_v45 = vld [vmem:[%s5948_s0 + $0xb0] sm:$0xff]  ;;  %v421_v47 = vld [vmem:[%s5948_s0 + $0xb8] sm:$0xff] }
  0x22   : > { %4280 = vmatmul.mubr.msk.f32.gmra.mrb[6].mxu0 %vm502_vm1, %v405_v15  ;;  %4352 = vmatmul.mubr.msk.f32.gmra.mrb[6].mxu1 %vm502_vm1, %v453_v16  ;;  %v468_v46 = vld [vmem:[%s5948_s0 + $0x230] sm:$0xff]  ;;  %v469_v48 = vld [vmem:[%s5948_s0 + $0x238] sm:$0xff]  ;;  %v422_v49 = vld [vmem:[%s5948_s0 + $0xc0] sm:$0xff] }
  0x23   : > { %4282 = vmatprep.mubr.msk.f32.mxu0 %vm502_vm1, %v406_v17  ;;  %4354 = vmatprep.mubr.msk.f32.mxu1 %vm502_vm1, %v454_v18  ;;  %v470_v50 = vld [vmem:[%s5948_s0 + $0x240] sm:$0xff]  ;;  %v423_v51 = vld [vmem:[%s5948_s0 + $0xc8] sm:$0xff]  ;;  %v424_v53 = vld [vmem:[%s5948_s0 + $0xd0] sm:$0xff] }
  0x24   : > { %v471_v52 = vld [vmem:[%s5948_s0 + $0x248] sm:$0xff]  ;;  %v472_v54 = vld [vmem:[%s5948_s0 + $0x250] sm:$0xff]  ;;  %v425_v55 = vld [vmem:[%s5948_s0 + $0xd8] sm:$0xff] }
  0x25   : > { %v473_v56 = vld [vmem:[%s5948_s0 + $0x258] sm:$0xff]  ;;  %v426_v57 = vld [vmem:[%s5948_s0 + $0xe0] sm:$0xff]  ;;  %v427_v59 = vld [vmem:[%s5948_s0 + $0xe8] sm:$0xff] }
  0x26   : > { %4283 = vmatmul.mubr.msk.f32.gmra.mrb[8].mxu0 %vm502_vm1, %v407_v19  ;;  %4355 = vmatmul.mubr.msk.f32.gmra.mrb[8].mxu1 %vm502_vm1, %v455_v20  ;;  %v474_v58 = vld [vmem:[%s5948_s0 + $0x260] sm:$0xff]  ;;  %v475_v60 = vld [vmem:[%s5948_s0 + $0x268] sm:$0xff]  ;;  %v428_v61 = vld [vmem:[%s5948_s0 + $0xf0] sm:$0xff] }
  0x27   : > { %4285 = vmatprep.mubr.msk.f32.mxu0 %vm502_vm1, %v408_v21  ;;  %4357 = vmatprep.mubr.msk.f32.mxu1 %vm502_vm1, %v456_v22  ;;  %v476_v62 = vld [vmem:[%s5948_s0 + $0x270] sm:$0xff]  ;;  %v429_v63 = vld [vmem:[%s5948_s0 + $0xf8] sm:$0xff]  ;;  %v430_v1 = vld [vmem:[%s5948_s0 + $0x100] sm:$0xff] }
  0x28   : > { %v477_v0 = vld [vmem:[%s5948_s0 + $0x278] sm:$0xff]  ;;  %v478_v2 = vld [vmem:[%s5948_s0 + $0x280] sm:$0xff]  ;;  %v431_v3 = vld [vmem:[%s5948_s0 + $0x108] sm:$0xff] }
  0x29   : > { %v479_v4 = vld [vmem:[%s5948_s0 + $0x288] sm:$0xff]  ;;  %v432_v5 = vld [vmem:[%s5948_s0 + $0x110] sm:$0xff]  ;;  %v433_v7 = vld [vmem:[%s5948_s0 + $0x118] sm:$0xff] }
  0x2a   : > { %4286 = vmatmul.mubr.msk.f32.gmra.mrb[10].mxu0 %vm502_vm1, %v409_v23  ;;  %4358 = vmatmul.mubr.msk.f32.gmra.mrb[10].mxu1 %vm502_vm1, %v457_v24  ;;  %v480_v6 = vld [vmem:[%s5948_s0 + $0x290] sm:$0xff]  ;;  %v481_v8 = vld [vmem:[%s5948_s0 + $0x298] sm:$0xff]  ;;  %v434_v9 = vld [vmem:[%s5948_s0 + $0x120] sm:$0xff] }
  0x2b   : > { %4288 = vmatprep.mubr.msk.f32.mxu0 %vm502_vm1, %v410_v25  ;;  %4360 = vmatprep.mubr.msk.f32.mxu1 %vm502_vm1, %v458_v26  ;;  %v482_v10 = vld [vmem:[%s5948_s0 + $0x2a0] sm:$0xff]  ;;  %v435_v11 = vld [vmem:[%s5948_s0 + $0x128] sm:$0xff]  ;;  %v436_v13 = vld [vmem:[%s5948_s0 + $0x130] sm:$0xff] }
  0x2c   : > { %v483_v12 = vld [vmem:[%s5948_s0 + $0x2a8] sm:$0xff]  ;;  %v484_v14 = vld [vmem:[%s5948_s0 + $0x2b0] sm:$0xff]  ;;  %v437_v15 = vld [vmem:[%s5948_s0 + $0x138] sm:$0xff] }
  0x2d   : > { %v485_v16 = vld [vmem:[%s5948_s0 + $0x2b8] sm:$0xff]  ;;  %v438_v17 = vld [vmem:[%s5948_s0 + $0x140] sm:$0xff]  ;;  %v439_v19 = vld [vmem:[%s5948_s0 + $0x148] sm:$0xff] }
  0x2e   : > { %4289 = vmatmul.mubr.msk.f32.gmra.mrb[12].mxu0 %vm502_vm1, %v411_v27  ;;  %4361 = vmatmul.mubr.msk.f32.gmra.mrb[12].mxu1 %vm502_vm1, %v459_v28  ;;  %v486_v18 = vld [vmem:[%s5948_s0 + $0x2c0] sm:$0xff]  ;;  %v487_v20 = vld [vmem:[%s5948_s0 + $0x2c8] sm:$0xff]  ;;  %v440_v21 = vld [vmem:[%s5948_s0 + $0x150] sm:$0xff] }
  0x2f   : > { %4291 = vmatprep.mubr.msk.f32.mxu0 %vm502_vm1, %v412_v29  ;;  %4363 = vmatprep.mubr.msk.f32.mxu1 %vm502_vm1, %v460_v30  ;;  %v488_v22 = vld [vmem:[%s5948_s0 + $0x2d0] sm:$0xff]  ;;  %v441_v23 = vld [vmem:[%s5948_s0 + $0x158] sm:$0xff]  ;;  %v442_v25 = vld [vmem:[%s5948_s0 + $0x160] sm:$0xff] }
  0x30   : > { %v489_v24 = vld [vmem:[%s5948_s0 + $0x2d8] sm:$0xff]  ;;  %v490_v26 = vld [vmem:[%s5948_s0 + $0x2e0] sm:$0xff]  ;;  %v443_v27 = vld [vmem:[%s5948_s0 + $0x168] sm:$0xff] }
  0x31   : > { %v491_v28 = vld [vmem:[%s5948_s0 + $0x2e8] sm:$0xff]  ;;  %v444_v29 = vld [vmem:[%s5948_s0 + $0x170] sm:$0xff] }
  0x32   : > { %4292 = vmatmul.mubr.msk.f32.gmra.mrb[14].mxu0 %vm502_vm1, %v413_v31  ;;  %4364 = vmatmul.mubr.msk.f32.gmra.mrb[14].mxu1 %vm502_vm1, %v461_v32  ;;  %v492_v30 = vld [vmem:[%s5948_s0 + $0x2f0] sm:$0xff]  ;;  %v445_v31 = vld [vmem:[%s5948_s0 + $0x178] sm:$0xff] }
  0x33   : > { %4294 = vmatprep.mubr.msk.f32.mxu0 %vm502_vm1, %v414_v33  ;;  %4366 = vmatprep.mubr.msk.f32.mxu1 %vm502_vm1, %v462_v34  ;;  %v493_v32 = vld [vmem:[%s5948_s0 + $0x2f8] sm:$0xff]  ;;  %v4826_v33 = vmov 0.0   ;;  %v5331_v34 = vld [vmem:[%s5951_s3] ss:$0 sm:$0xff] }
  0x34   : > { %1436 = vst [vmem:[#allocation4] sm:$0xff] %v4826_v33 }
  0x36   : > { %4295 = vmatmul.mubr.msk.f32.gmra.mrb[16].mxu0 %vm502_vm1, %v415_v35  ;;  %4367 = vmatmul.mubr.msk.f32.gmra.mrb[16].mxu1 %vm502_vm1, %v463_v36 }
  0x37   : > { %4297 = vmatprep.mubr.msk.f32.mxu0 %vm502_vm1, %v416_v37  ;;  %4369 = vmatprep.mubr.msk.f32.mxu1 %vm502_vm1, %v464_v38 }
  0x3a   : > { %4298 = vmatmul.mubr.msk.f32.gmra.mrb[18].mxu0 %vm502_vm1, %v417_v39  ;;  %4370 = vmatmul.mubr.msk.f32.gmra.mrb[18].mxu1 %vm502_vm1, %v465_v40 }
  0x3b   : > { %4300 = vmatprep.mubr.msk.f32.mxu0 %vm502_vm1, %v418_v41  ;;  %4372 = vmatprep.mubr.msk.f32.mxu1 %vm502_vm1, %v466_v42 }
  0x3e   : > { %4301 = vmatmul.mubr.msk.f32.gmra.mrb[20].mxu0 %vm502_vm1, %v419_v43  ;;  %4373 = vmatmul.mubr.msk.f32.gmra.mrb[20].mxu1 %vm502_vm1, %v467_v44 }
  0x3f   : > { %4303 = vmatprep.mubr.msk.f32.mxu0 %vm502_vm1, %v420_v45  ;;  %4375 = vmatprep.mubr.msk.f32.mxu1 %vm502_vm1, %v468_v46 }
  0x42   : > { %4304 = vmatmul.mubr.msk.f32.gmra.mrb[22].mxu0 %vm502_vm1, %v421_v47  ;;  %4376 = vmatmul.mubr.msk.f32.gmra.mrb[22].mxu1 %vm502_vm1, %v469_v48 }
  0x43   : > { %4306 = vmatprep.mubr.msk.f32.mxu0 %vm502_vm1, %v422_v49  ;;  %4378 = vmatprep.mubr.msk.f32.mxu1 %vm502_vm1, %v470_v50 }
  0x46   : > { %4307 = vmatmul.mubr.msk.f32.gmra.mrb[24].mxu0 %vm502_vm1, %v423_v51  ;;  %4379 = vmatmul.mubr.msk.f32.gmra.mrb[24].mxu1 %vm502_vm1, %v471_v52 }
  0x47   : > { %4309 = vmatprep.mubr.msk.f32.mxu0 %vm502_vm1, %v424_v53  ;;  %4381 = vmatprep.mubr.msk.f32.mxu1 %vm502_vm1, %v472_v54 }
  0x4a   : > { %4310 = vmatmul.mubr.msk.f32.gmra.mrb[26].mxu0 %vm502_vm1, %v425_v55  ;;  %4382 = vmatmul.mubr.msk.f32.gmra.mrb[26].mxu1 %vm502_vm1, %v473_v56 }
  0x4b   : > { %4312 = vmatprep.mubr.msk.f32.mxu0 %vm502_vm1, %v426_v57  ;;  %4384 = vmatprep.mubr.msk.f32.mxu1 %vm502_vm1, %v474_v58 }
  0x4e   : > { %4313 = vmatmul.mubr.msk.f32.gmra.mrb[28].mxu0 %vm502_vm1, %v427_v59  ;;  %4385 = vmatmul.mubr.msk.f32.gmra.mrb[28].mxu1 %vm502_vm1, %v475_v60 }
  0x4f   : > { %4315 = vmatprep.mubr.msk.f32.mxu0 %vm502_vm1, %v428_v61  ;;  %4387 = vmatprep.mubr.msk.f32.mxu1 %vm502_vm1, %v476_v62 }
  0x52   : > { %4316 = vmatmul.mubr.msk.f32.gmra.mrb[30].mxu0 %vm502_vm1, %v429_v63  ;;  %4388 = vmatmul.mubr.msk.f32.gmra.mrb[30].mxu1 %vm502_vm1, %v477_v0 }
  0x53   : > { %4318 = vmatprep.mubr.msk.f32.mxu0 %vm502_vm1, %v430_v1  ;;  %4390 = vmatprep.mubr.msk.f32.mxu1 %vm502_vm1, %v478_v2 }
  0x56   : > { %4319 = vmatmul.mubr.msk.f32.gmra.mrb[32].mxu0 %vm502_vm1, %v431_v3  ;;  %4391 = vmatmul.mubr.msk.f32.gmra.mrb[32].mxu1 %vm502_vm1, %v479_v4 }
  0x57   : > { %4321 = vmatprep.mubr.msk.f32.mxu0 %vm502_vm1, %v432_v5  ;;  %4393 = vmatprep.mubr.msk.f32.mxu1 %vm502_vm1, %v480_v6 }
  0x5a   : > { %4322 = vmatmul.mubr.msk.f32.gmra.mrb[34].mxu0 %vm502_vm1, %v433_v7  ;;  %4394 = vmatmul.mubr.msk.f32.gmra.mrb[34].mxu1 %vm502_vm1, %v481_v8 }
  0x5b   : > { %4324 = vmatprep.mubr.msk.f32.mxu0 %vm502_vm1, %v434_v9  ;;  %4396 = vmatprep.mubr.msk.f32.mxu1 %vm502_vm1, %v482_v10 }
  0x5e   : > { %4325 = vmatmul.mubr.msk.f32.gmra.mrb[36].mxu0 %vm502_vm1, %v435_v11  ;;  %4397 = vmatmul.mubr.msk.f32.gmra.mrb[36].mxu1 %vm502_vm1, %v483_v12 }
  0x5f   : > { %4327 = vmatprep.mubr.msk.f32.mxu0 %vm502_vm1, %v436_v13  ;;  %4399 = vmatprep.mubr.msk.f32.mxu1 %vm502_vm1, %v484_v14 }
  0x62   : > { %4328 = vmatmul.mubr.msk.f32.gmra.mrb[38].mxu0 %vm502_vm1, %v437_v15  ;;  %4400 = vmatmul.mubr.msk.f32.gmra.mrb[38].mxu1 %vm502_vm1, %v485_v16 }
  0x63   : > { %4330 = vmatprep.mubr.msk.f32.mxu0 %vm502_vm1, %v438_v17  ;;  %4402 = vmatprep.mubr.msk.f32.mxu1 %vm502_vm1, %v486_v18 }
  0x66   : > { %4331 = vmatmul.mubr.msk.f32.gmra.mrb[40].mxu0 %vm502_vm1, %v439_v19  ;;  %4403 = vmatmul.mubr.msk.f32.gmra.mrb[40].mxu1 %vm502_vm1, %v487_v20 }
  0x67   : > { %4333 = vmatprep.mubr.msk.f32.mxu0 %vm502_vm1, %v440_v21  ;;  %4405 = vmatprep.mubr.msk.f32.mxu1 %vm502_vm1, %v488_v22 }
  0x6a   : > { %4334 = vmatmul.mubr.msk.f32.gmra.mrb[42].mxu0 %vm502_vm1, %v441_v23  ;;  %4406 = vmatmul.mubr.msk.f32.gmra.mrb[42].mxu1 %vm502_vm1, %v489_v24 }
  0x6b   : > { %4336 = vmatprep.mubr.msk.f32.mxu0 %vm502_vm1, %v442_v25  ;;  %4408 = vmatprep.mubr.msk.f32.mxu1 %vm502_vm1, %v490_v26 }
  0x6e   : > { %4337 = vmatmul.mubr.msk.f32.gmra.mrb[44].mxu0 %vm502_vm1, %v443_v27  ;;  %4409 = vmatmul.mubr.msk.f32.gmra.mrb[44].mxu1 %vm502_vm1, %v491_v28 }
  0x6f   : > { %4339 = vmatprep.mubr.msk.f32.mxu0 %vm502_vm1, %v444_v29  ;;  %4411 = vmatprep.mubr.msk.f32.mxu1 %vm502_vm1, %v492_v30 }
  0x72   : > { %4340 = vmatmul.mubr.msk.f32.gmra.mrb[46].mxu0 %vm502_vm1, %v445_v31  ;;  %4412 = vmatmul.mubr.msk.f32.gmra.mrb[46].mxu1 %vm502_vm1, %v493_v32 }
  0xe9   : > { %v4272_v35 = vpop.f32.mrb[0].mxu0  ;;  %v4344_v36 = vpop.f32.mrb[0].mxu1 }
  0xea   : > { %v867_v37 = vadd.f32 %v4272_v35, %v5331_v34  ;;  %v1107_v38 = vadd.f32 %v4344_v36, %v5331_v34  ;;  %v861_v39 = vpop.f32.mrb[1].mxu0  ;;  %v1101_v40 = vpop.f32.mrb[1].mxu1 }
  0xeb   : > { %v862_v41 = vadd.f32 %v5331_v34, %v861_v39  ;;  %v1102_v42 = vadd.f32 %v5331_v34, %v1101_v40 }
  0xed   : > { %v1340_v43 = vpack.c.bf16 %v867_v37, %v862_v41  ;;  %v1364_v44 = vpack.c.bf16 %v1107_v38, %v1102_v42  ;;  %v4275_v45 = vpop.f32.mrb[2].mxu0  ;;  %v4347_v46 = vpop.f32.mrb[2].mxu1 }
  0xee   : > { %v877_v47 = vadd.f32 %v4275_v45, %v5331_v34  ;;  %v1117_v48 = vadd.f32 %v4347_v46, %v5331_v34  ;;  %v871_v49 = vpop.f32.mrb[3].mxu0  ;;  %v1111_v50 = vpop.f32.mrb[3].mxu1 }
  0xef   : > { %1388 = vst [vmem:[#allocation2] sm:$0xff] %v1340_v43  ;;  %1412 = vst [vmem:[#allocation2 + $0xc0] sm:$0xff] %v1364_v44  ;;  %v872_v51 = vadd.f32 %v5331_v34, %v871_v49  ;;  %v1112_v52 = vadd.f32 %v5331_v34, %v1111_v50 }
  0xf1   : > { %v1341_v53 = vpack.c.bf16 %v877_v47, %v872_v51  ;;  %v1365_v54 = vpack.c.bf16 %v1117_v48, %v1112_v52  ;;  %v4278_v55 = vpop.f32.mrb[4].mxu0  ;;  %v4350_v56 = vpop.f32.mrb[4].mxu1 }
  0xf2   : > { %v887_v57 = vadd.f32 %v4278_v55, %v5331_v34  ;;  %v1127_v58 = vadd.f32 %v4350_v56, %v5331_v34  ;;  %v881_v59 = vpop.f32.mrb[5].mxu0  ;;  %v1121_v60 = vpop.f32.mrb[5].mxu1 }
  0xf3   : > { %1389 = vst [vmem:[#allocation2 + $0x8] sm:$0xff] %v1341_v53  ;;  %1413 = vst [vmem:[#allocation2 + $0xc8] sm:$0xff] %v1365_v54  ;;  %v882_v61 = vadd.f32 %v5331_v34, %v881_v59  ;;  %v1122_v62 = vadd.f32 %v5331_v34, %v1121_v60 }
  0xf5   : > { %v1342_v63 = vpack.c.bf16 %v887_v57, %v882_v61  ;;  %v1366_v0 = vpack.c.bf16 %v1127_v58, %v1122_v62  ;;  %v4281_v1 = vpop.f32.mrb[6].mxu0  ;;  %v4353_v2 = vpop.f32.mrb[6].mxu1 }
  0xf6   : > { %v897_v3 = vadd.f32 %v4281_v1, %v5331_v34  ;;  %v1137_v4 = vadd.f32 %v4353_v2, %v5331_v34  ;;  %v891_v5 = vpop.f32.mrb[7].mxu0  ;;  %v1131_v6 = vpop.f32.mrb[7].mxu1 }
  0xf7   : > { %1390 = vst [vmem:[#allocation2 + $0x10] sm:$0xff] %v1342_v63  ;;  %1414 = vst [vmem:[#allocation2 + $0xd0] sm:$0xff] %v1366_v0  ;;  %v892_v7 = vadd.f32 %v5331_v34, %v891_v5  ;;  %v1132_v8 = vadd.f32 %v5331_v34, %v1131_v6 }
  0xf9   : > { %v1343_v9 = vpack.c.bf16 %v897_v3, %v892_v7  ;;  %v1367_v10 = vpack.c.bf16 %v1137_v4, %v1132_v8  ;;  %v4284_v11 = vpop.f32.mrb[8].mxu0  ;;  %v4356_v12 = vpop.f32.mrb[8].mxu1 }
  0xfa   : > { %v907_v13 = vadd.f32 %v4284_v11, %v5331_v34  ;;  %v1147_v14 = vadd.f32 %v4356_v12, %v5331_v34  ;;  %v901_v15 = vpop.f32.mrb[9].mxu0  ;;  %v1141_v16 = vpop.f32.mrb[9].mxu1 }
  0xfb   : > { %1391 = vst [vmem:[#allocation2 + $0x18] sm:$0xff] %v1343_v9  ;;  %1415 = vst [vmem:[#allocation2 + $0xd8] sm:$0xff] %v1367_v10  ;;  %v902_v17 = vadd.f32 %v5331_v34, %v901_v15  ;;  %v1142_v18 = vadd.f32 %v5331_v34, %v1141_v16 }
  0xfd   : > { %v1344_v19 = vpack.c.bf16 %v907_v13, %v902_v17  ;;  %v1368_v20 = vpack.c.bf16 %v1147_v14, %v1142_v18  ;;  %v4287_v21 = vpop.f32.mrb[10].mxu0  ;;  %v4359_v22 = vpop.f32.mrb[10].mxu1 }
  0xfe   : > { %v917_v23 = vadd.f32 %v4287_v21, %v5331_v34  ;;  %v1157_v24 = vadd.f32 %v4359_v22, %v5331_v34  ;;  %v911_v25 = vpop.f32.mrb[11].mxu0  ;;  %v1151_v26 = vpop.f32.mrb[11].mxu1 }
  0xff   : > { %1392 = vst [vmem:[#allocation2 + $0x20] sm:$0xff] %v1344_v19  ;;  %1416 = vst [vmem:[#allocation2 + $0xe0] sm:$0xff] %v1368_v20  ;;  %v912_v27 = vadd.f32 %v5331_v34, %v911_v25  ;;  %v1152_v28 = vadd.f32 %v5331_v34, %v1151_v26 }
 0x101   : > { %v1345_v29 = vpack.c.bf16 %v917_v23, %v912_v27  ;;  %v1369_v30 = vpack.c.bf16 %v1157_v24, %v1152_v28  ;;  %v4290_v31 = vpop.f32.mrb[12].mxu0  ;;  %v4362_v32 = vpop.f32.mrb[12].mxu1 }
 0x102   : > { %v927_v33 = vadd.f32 %v4290_v31, %v5331_v34  ;;  %v1167_v35 = vadd.f32 %v4362_v32, %v5331_v34  ;;  %v921_v36 = vpop.f32.mrb[13].mxu0  ;;  %v1161_v37 = vpop.f32.mrb[13].mxu1 }
 0x103   : > { %1393 = vst [vmem:[#allocation2 + $0x28] sm:$0xff] %v1345_v29  ;;  %1417 = vst [vmem:[#allocation2 + $0xe8] sm:$0xff] %v1369_v30  ;;  %v922_v38 = vadd.f32 %v5331_v34, %v921_v36  ;;  %v1162_v39 = vadd.f32 %v5331_v34, %v1161_v37 }
 0x105   : > { %v1346_v40 = vpack.c.bf16 %v927_v33, %v922_v38  ;;  %v1370_v41 = vpack.c.bf16 %v1167_v35, %v1162_v39  ;;  %v4293_v42 = vpop.f32.mrb[14].mxu0  ;;  %v4365_v43 = vpop.f32.mrb[14].mxu1 }
 0x106   : > { %v937_v44 = vadd.f32 %v4293_v42, %v5331_v34  ;;  %v1177_v45 = vadd.f32 %v4365_v43, %v5331_v34  ;;  %v931_v46 = vpop.f32.mrb[15].mxu0  ;;  %v1171_v47 = vpop.f32.mrb[15].mxu1 }
 0x107   : > { %1394 = vst [vmem:[#allocation2 + $0x30] sm:$0xff] %v1346_v40  ;;  %1418 = vst [vmem:[#allocation2 + $0xf0] sm:$0xff] %v1370_v41  ;;  %v932_v48 = vadd.f32 %v5331_v34, %v931_v46  ;;  %v1172_v49 = vadd.f32 %v5331_v34, %v1171_v47 }
 0x109   : > { %v1347_v50 = vpack.c.bf16 %v937_v44, %v932_v48  ;;  %v1371_v51 = vpack.c.bf16 %v1177_v45, %v1172_v49  ;;  %v4296_v52 = vpop.f32.mrb[16].mxu0  ;;  %v4368_v53 = vpop.f32.mrb[16].mxu1 }
 0x10a   : > { %v947_v54 = vadd.f32 %v4296_v52, %v5331_v34  ;;  %v1187_v55 = vadd.f32 %v4368_v53, %v5331_v34  ;;  %v941_v56 = vpop.f32.mrb[17].mxu0  ;;  %v1181_v57 = vpop.f32.mrb[17].mxu1 }
 0x10b   : > { %1395 = vst [vmem:[#allocation2 + $0x38] sm:$0xff] %v1347_v50  ;;  %1419 = vst [vmem:[#allocation2 + $0xf8] sm:$0xff] %v1371_v51  ;;  %v942_v58 = vadd.f32 %v5331_v34, %v941_v56  ;;  %v1182_v59 = vadd.f32 %v5331_v34, %v1181_v57 }
 0x10d   : > { %v1348_v60 = vpack.c.bf16 %v947_v54, %v942_v58  ;;  %v1372_v61 = vpack.c.bf16 %v1187_v55, %v1182_v59  ;;  %v4299_v62 = vpop.f32.mrb[18].mxu0  ;;  %v4371_v63 = vpop.f32.mrb[18].mxu1 }
 0x10e   : > { %v957_v0 = vadd.f32 %v4299_v62, %v5331_v34  ;;  %v1197_v1 = vadd.f32 %v4371_v63, %v5331_v34  ;;  %v951_v2 = vpop.f32.mrb[19].mxu0  ;;  %v1191_v3 = vpop.f32.mrb[19].mxu1 }
 0x10f   : > { %1396 = vst [vmem:[#allocation2 + $0x40] sm:$0xff] %v1348_v60  ;;  %1420 = vst [vmem:[#allocation2 + $0x100] sm:$0xff] %v1372_v61  ;;  %v952_v4 = vadd.f32 %v5331_v34, %v951_v2  ;;  %v1192_v5 = vadd.f32 %v5331_v34, %v1191_v3 }
 0x111   : > { %v1349_v6 = vpack.c.bf16 %v957_v0, %v952_v4  ;;  %v1373_v7 = vpack.c.bf16 %v1197_v1, %v1192_v5  ;;  %v4302_v8 = vpop.f32.mrb[20].mxu0  ;;  %v4374_v9 = vpop.f32.mrb[20].mxu1 }
 0x112   : > { %v967_v10 = vadd.f32 %v4302_v8, %v5331_v34  ;;  %v1207_v11 = vadd.f32 %v4374_v9, %v5331_v34  ;;  %v961_v12 = vpop.f32.mrb[21].mxu0  ;;  %v1201_v13 = vpop.f32.mrb[21].mxu1 }
 0x113   : > { %1397 = vst [vmem:[#allocation2 + $0x48] sm:$0xff] %v1349_v6  ;;  %1421 = vst [vmem:[#allocation2 + $0x108] sm:$0xff] %v1373_v7  ;;  %v962_v14 = vadd.f32 %v5331_v34, %v961_v12  ;;  %v1202_v15 = vadd.f32 %v5331_v34, %v1201_v13 }
 0x115   : > { %v1350_v16 = vpack.c.bf16 %v967_v10, %v962_v14  ;;  %v1374_v17 = vpack.c.bf16 %v1207_v11, %v1202_v15  ;;  %v4305_v18 = vpop.f32.mrb[22].mxu0  ;;  %v4377_v19 = vpop.f32.mrb[22].mxu1 }
 0x116   : > { %v977_v20 = vadd.f32 %v4305_v18, %v5331_v34  ;;  %v1217_v21 = vadd.f32 %v4377_v19, %v5331_v34  ;;  %v971_v22 = vpop.f32.mrb[23].mxu0  ;;  %v1211_v23 = vpop.f32.mrb[23].mxu1 }
 0x117   : > { %1398 = vst [vmem:[#allocation2 + $0x50] sm:$0xff] %v1350_v16  ;;  %1422 = vst [vmem:[#allocation2 + $0x110] sm:$0xff] %v1374_v17  ;;  %v972_v24 = vadd.f32 %v5331_v34, %v971_v22  ;;  %v1212_v25 = vadd.f32 %v5331_v34, %v1211_v23 }
 0x119   : > { %v1351_v26 = vpack.c.bf16 %v977_v20, %v972_v24  ;;  %v1375_v27 = vpack.c.bf16 %v1217_v21, %v1212_v25  ;;  %v4308_v28 = vpop.f32.mrb[24].mxu0  ;;  %v4380_v29 = vpop.f32.mrb[24].mxu1 }
 0x11a   : > { %v987_v30 = vadd.f32 %v4308_v28, %v5331_v34  ;;  %v1227_v31 = vadd.f32 %v4380_v29, %v5331_v34  ;;  %v981_v32 = vpop.f32.mrb[25].mxu0  ;;  %v1221_v33 = vpop.f32.mrb[25].mxu1 }
 0x11b   : > { %1399 = vst [vmem:[#allocation2 + $0x58] sm:$0xff] %v1351_v26  ;;  %1423 = vst [vmem:[#allocation2 + $0x118] sm:$0xff] %v1375_v27  ;;  %v982_v35 = vadd.f32 %v5331_v34, %v981_v32  ;;  %v1222_v36 = vadd.f32 %v5331_v34, %v1221_v33 }
 0x11d   : > { %v1352_v37 = vpack.c.bf16 %v987_v30, %v982_v35  ;;  %v1376_v38 = vpack.c.bf16 %v1227_v31, %v1222_v36  ;;  %v4311_v39 = vpop.f32.mrb[26].mxu0  ;;  %v4383_v40 = vpop.f32.mrb[26].mxu1 }
 0x11e   : > { %v997_v41 = vadd.f32 %v4311_v39, %v5331_v34  ;;  %v1237_v42 = vadd.f32 %v4383_v40, %v5331_v34  ;;  %v991_v43 = vpop.f32.mrb[27].mxu0  ;;  %v1231_v44 = vpop.f32.mrb[27].mxu1 }
 0x11f   : > { %1400 = vst [vmem:[#allocation2 + $0x60] sm:$0xff] %v1352_v37  ;;  %1424 = vst [vmem:[#allocation2 + $0x120] sm:$0xff] %v1376_v38  ;;  %v992_v45 = vadd.f32 %v5331_v34, %v991_v43  ;;  %v1232_v46 = vadd.f32 %v5331_v34, %v1231_v44 }
 0x121   : > { %v1353_v47 = vpack.c.bf16 %v997_v41, %v992_v45  ;;  %v1377_v48 = vpack.c.bf16 %v1237_v42, %v1232_v46  ;;  %v4314_v49 = vpop.f32.mrb[28].mxu0  ;;  %v4386_v50 = vpop.f32.mrb[28].mxu1 }
 0x122   : > { %v1007_v51 = vadd.f32 %v4314_v49, %v5331_v34  ;;  %v1247_v52 = vadd.f32 %v4386_v50, %v5331_v34  ;;  %v1001_v53 = vpop.f32.mrb[29].mxu0  ;;  %v1241_v54 = vpop.f32.mrb[29].mxu1 }
 0x123   : > { %1401 = vst [vmem:[#allocation2 + $0x68] sm:$0xff] %v1353_v47  ;;  %1425 = vst [vmem:[#allocation2 + $0x128] sm:$0xff] %v1377_v48  ;;  %v1002_v55 = vadd.f32 %v5331_v34, %v1001_v53  ;;  %v1242_v56 = vadd.f32 %v5331_v34, %v1241_v54 }
 0x125   : > { %v1354_v57 = vpack.c.bf16 %v1007_v51, %v1002_v55  ;;  %v1378_v58 = vpack.c.bf16 %v1247_v52, %v1242_v56  ;;  %v4317_v59 = vpop.f32.mrb[30].mxu0  ;;  %v4389_v60 = vpop.f32.mrb[30].mxu1 }
 0x126   : > { %v1017_v61 = vadd.f32 %v4317_v59, %v5331_v34  ;;  %v1257_v62 = vadd.f32 %v4389_v60, %v5331_v34  ;;  %v1011_v63 = vpop.f32.mrb[31].mxu0  ;;  %v1251_v0 = vpop.f32.mrb[31].mxu1 }
 0x127   : > { %1402 = vst [vmem:[#allocation2 + $0x70] sm:$0xff] %v1354_v57  ;;  %1426 = vst [vmem:[#allocation2 + $0x130] sm:$0xff] %v1378_v58  ;;  %v1012_v1 = vadd.f32 %v5331_v34, %v1011_v63  ;;  %v1252_v2 = vadd.f32 %v5331_v34, %v1251_v0 }
 0x129   : > { %v1355_v3 = vpack.c.bf16 %v1017_v61, %v1012_v1  ;;  %v1379_v4 = vpack.c.bf16 %v1257_v62, %v1252_v2  ;;  %v4320_v5 = vpop.f32.mrb[32].mxu0  ;;  %v4392_v6 = vpop.f32.mrb[32].mxu1 }
 0x12a   : > { %v1027_v7 = vadd.f32 %v4320_v5, %v5331_v34  ;;  %v1267_v8 = vadd.f32 %v4392_v6, %v5331_v34  ;;  %v1021_v9 = vpop.f32.mrb[33].mxu0  ;;  %v1261_v10 = vpop.f32.mrb[33].mxu1 }
 0x12b   : > { %1403 = vst [vmem:[#allocation2 + $0x78] sm:$0xff] %v1355_v3  ;;  %1427 = vst [vmem:[#allocation2 + $0x138] sm:$0xff] %v1379_v4  ;;  %v1022_v11 = vadd.f32 %v5331_v34, %v1021_v9  ;;  %v1262_v12 = vadd.f32 %v5331_v34, %v1261_v10 }
 0x12d   : > { %v1356_v13 = vpack.c.bf16 %v1027_v7, %v1022_v11  ;;  %v1380_v14 = vpack.c.bf16 %v1267_v8, %v1262_v12  ;;  %v4323_v15 = vpop.f32.mrb[34].mxu0  ;;  %v4395_v16 = vpop.f32.mrb[34].mxu1 }
 0x12e   : > { %v1037_v17 = vadd.f32 %v4323_v15, %v5331_v34  ;;  %v1277_v18 = vadd.f32 %v4395_v16, %v5331_v34  ;;  %v1031_v19 = vpop.f32.mrb[35].mxu0  ;;  %v1271_v20 = vpop.f32.mrb[35].mxu1 }
 0x12f   : > { %1404 = vst [vmem:[#allocation2 + $0x80] sm:$0xff] %v1356_v13  ;;  %1428 = vst [vmem:[#allocation2 + $0x140] sm:$0xff] %v1380_v14  ;;  %v1032_v21 = vadd.f32 %v5331_v34, %v1031_v19  ;;  %v1272_v22 = vadd.f32 %v5331_v34, %v1271_v20 }
 0x131   : > { %v1357_v23 = vpack.c.bf16 %v1037_v17, %v1032_v21  ;;  %v1381_v24 = vpack.c.bf16 %v1277_v18, %v1272_v22  ;;  %v4326_v25 = vpop.f32.mrb[36].mxu0  ;;  %v4398_v26 = vpop.f32.mrb[36].mxu1 }
 0x132   : > { %v1047_v27 = vadd.f32 %v4326_v25, %v5331_v34  ;;  %v1287_v28 = vadd.f32 %v4398_v26, %v5331_v34  ;;  %v1041_v29 = vpop.f32.mrb[37].mxu0  ;;  %v1281_v30 = vpop.f32.mrb[37].mxu1 }
 0x133   : > { %1405 = vst [vmem:[#allocation2 + $0x88] sm:$0xff] %v1357_v23  ;;  %1429 = vst [vmem:[#allocation2 + $0x148] sm:$0xff] %v1381_v24  ;;  %v1042_v31 = vadd.f32 %v5331_v34, %v1041_v29  ;;  %v1282_v32 = vadd.f32 %v5331_v34, %v1281_v30 }
 0x135   : > { %v1358_v33 = vpack.c.bf16 %v1047_v27, %v1042_v31  ;;  %v1382_v35 = vpack.c.bf16 %v1287_v28, %v1282_v32  ;;  %v4329_v36 = vpop.f32.mrb[38].mxu0  ;;  %v4401_v37 = vpop.f32.mrb[38].mxu1 }
 0x136   : > { %v1057_v38 = vadd.f32 %v4329_v36, %v5331_v34  ;;  %v1297_v39 = vadd.f32 %v4401_v37, %v5331_v34  ;;  %v1051_v40 = vpop.f32.mrb[39].mxu0  ;;  %v1291_v41 = vpop.f32.mrb[39].mxu1 }
 0x137   : > { %1406 = vst [vmem:[#allocation2 + $0x90] sm:$0xff] %v1358_v33  ;;  %1430 = vst [vmem:[#allocation2 + $0x150] sm:$0xff] %v1382_v35  ;;  %v1052_v42 = vadd.f32 %v5331_v34, %v1051_v40  ;;  %v1292_v43 = vadd.f32 %v5331_v34, %v1291_v41 }
 0x139   : > { %v1359_v44 = vpack.c.bf16 %v1057_v38, %v1052_v42  ;;  %v1383_v45 = vpack.c.bf16 %v1297_v39, %v1292_v43  ;;  %v4332_v46 = vpop.f32.mrb[40].mxu0  ;;  %v4404_v47 = vpop.f32.mrb[40].mxu1 }
 0x13a   : > { %v1067_v48 = vadd.f32 %v4332_v46, %v5331_v34  ;;  %v1307_v49 = vadd.f32 %v4404_v47, %v5331_v34  ;;  %v1061_v50 = vpop.f32.mrb[41].mxu0  ;;  %v1301_v51 = vpop.f32.mrb[41].mxu1 }
 0x13b   : > { %1407 = vst [vmem:[#allocation2 + $0x98] sm:$0xff] %v1359_v44  ;;  %1431 = vst [vmem:[#allocation2 + $0x158] sm:$0xff] %v1383_v45  ;;  %v1062_v52 = vadd.f32 %v5331_v34, %v1061_v50  ;;  %v1302_v53 = vadd.f32 %v5331_v34, %v1301_v51 }
 0x13d   : > { %v1360_v54 = vpack.c.bf16 %v1067_v48, %v1062_v52  ;;  %v1384_v55 = vpack.c.bf16 %v1307_v49, %v1302_v53  ;;  %v4335_v56 = vpop.f32.mrb[42].mxu0  ;;  %v4407_v57 = vpop.f32.mrb[42].mxu1 }
 0x13e   : > { %v1077_v58 = vadd.f32 %v4335_v56, %v5331_v34  ;;  %v1317_v59 = vadd.f32 %v4407_v57, %v5331_v34  ;;  %v1071_v60 = vpop.f32.mrb[43].mxu0  ;;  %v1311_v61 = vpop.f32.mrb[43].mxu1 }
 0x13f   : > { %1408 = vst [vmem:[#allocation2 + $0xa0] sm:$0xff] %v1360_v54  ;;  %1432 = vst [vmem:[#allocation2 + $0x160] sm:$0xff] %v1384_v55  ;;  %v1072_v62 = vadd.f32 %v5331_v34, %v1071_v60  ;;  %v1312_v63 = vadd.f32 %v5331_v34, %v1311_v61 }
 0x141   : > { %v1361_v0 = vpack.c.bf16 %v1077_v58, %v1072_v62  ;;  %v1385_v1 = vpack.c.bf16 %v1317_v59, %v1312_v63  ;;  %v4338_v2 = vpop.f32.mrb[44].mxu0  ;;  %v4410_v3 = vpop.f32.mrb[44].mxu1 }
 0x142   : > { %v1087_v4 = vadd.f32 %v4338_v2, %v5331_v34  ;;  %v1327_v5 = vadd.f32 %v4410_v3, %v5331_v34  ;;  %v1081_v6 = vpop.f32.mrb[45].mxu0  ;;  %v1321_v7 = vpop.f32.mrb[45].mxu1 }
 0x143   : > { %1409 = vst [vmem:[#allocation2 + $0xa8] sm:$0xff] %v1361_v0  ;;  %1433 = vst [vmem:[#allocation2 + $0x168] sm:$0xff] %v1385_v1  ;;  %v1082_v8 = vadd.f32 %v5331_v34, %v1081_v6  ;;  %v1322_v9 = vadd.f32 %v5331_v34, %v1321_v7 }
 0x145   : > { %v1362_v10 = vpack.c.bf16 %v1087_v4, %v1082_v8  ;;  %v1386_v11 = vpack.c.bf16 %v1327_v5, %v1322_v9  ;;  %v4341_v12 = vpop.f32.mrb[46].mxu0  ;;  %v4413_v13 = vpop.f32.mrb[46].mxu1 }
 0x146   : > { %v1097_v14 = vadd.f32 %v4341_v12, %v5331_v34  ;;  %v1337_v15 = vadd.f32 %v4413_v13, %v5331_v34  ;;  %v1091_v16 = vpop.f32.mrb[47].mxu0  ;;  %v1331_v17 = vpop.f32.mrb[47].mxu1 }
 0x147   : > { %1410 = vst [vmem:[#allocation2 + $0xb0] sm:$0xff] %v1362_v10  ;;  %1434 = vst [vmem:[#allocation2 + $0x170] sm:$0xff] %v1386_v11  ;;  %v1092_v18 = vadd.f32 %v5331_v34, %v1091_v16  ;;  %v1332_v19 = vadd.f32 %v5331_v34, %v1331_v17 }
 0x149   : > { %v1363_v20 = vpack.c.bf16 %v1097_v14, %v1092_v18  ;;  %v1387_v21 = vpack.c.bf16 %v1337_v15, %v1332_v19 }
 0x14b   : > { %1411 = vst [vmem:[#allocation2 + $0xb8] sm:$0xff] %v1363_v20  ;;  %1435 = vst [vmem:[#allocation2 + $0x178] sm:$0xff] %v1387_v21 }
 0x14c PF: > { %p3624_p11 = scmp.ne.s32.totalorder %s4808_s30, 0 }
 0x14d   : > { %v4624_v22 = vld [vmem:[%s4927_s26] sm:$0xff] (!%p3624_p11)   ;;  %v4625_v23 = vld [vmem:[%s4927_s26 + $0x8] sm:$0xff] (!%p3624_p11)   ;;  %v4626_v34 = vld [vmem:[%s4927_s26 + $0x10] sm:$0xff] (!%p3624_p11)  }
 0x14e   : > { %1439 = sbr.rel (%p3624_p11) target bundleno = 672 (0x2a0), region = 64  ;;  %4414 = vmatprep.subr.bf16.mxu0 (!%p3624_p11), %v4624_v22  ;;  %4548 = vmatprep.subr.bf16.mxu1 (!%p3624_p11), %v4624_v22  ;;  %v4627_v24 = vld [vmem:[%s4927_s26 + $0x18] sm:$0xff] (!%p3624_p11)   ;;  %v1440_v25 = vld [vmem:[#allocation2] sm:$0xff] (!%p3624_p11)  ;;  %v4629_v28 = vld [vmem:[%s4927_s26 + $0x28] sm:$0xff] (!%p3624_p11)  }
 0x14f   : > { %4415 = vmatpush3.bf16.msra.mxu0 (!%p3624_p11), %v4624_v22  ;;  %4556 = vmatpush3.bf16.msra.mxu1 (!%p3624_p11), %v4624_v22  ;;  %v1464_v26 = vld [vmem:[#allocation2 + $0xc0] sm:$0xff] (!%p3624_p11)  ;;  %v4630_v29 = vld [vmem:[%s4927_s26 + $0x30] sm:$0xff] (!%p3624_p11)   ;;  %v4631_v30 = vld [vmem:[%s4927_s26 + $0x38] sm:$0xff] (!%p3624_p11)  }
 0x150   : > { %4416 = vmatprep.subr.bf16.mxu0 (!%p3624_p11), %v4625_v23  ;;  %4549 = vmatprep.subr.bf16.mxu1 (!%p3624_p11), %v4625_v23  ;;  %v4628_v27 = vld [vmem:[%s4927_s26 + $0x20] sm:$0xff] (!%p3624_p11)   ;;  %v1441_v31 = vld [vmem:[#allocation2 + $0x8] sm:$0xff] (!%p3624_p11)  ;;  %v1442_v33 = vld [vmem:[#allocation2 + $0x10] sm:$0xff] (!%p3624_p11) }
 0x151   : > { %4430 = vmatprep.mubr.bf16.mxu0 (!%p3624_p11), %v1440_v25  ;;  %4478 = vmatprep.mubr.bf16.mxu1 (!%p3624_p11), %v1464_v26  ;;  %v1465_v32 = vld [vmem:[#allocation2 + $0xc8] sm:$0xff] (!%p3624_p11)  ;;  %v1466_v35 = vld [vmem:[#allocation2 + $0xd0] sm:$0xff] (!%p3624_p11)  ;;  %v1443_v36 = vld [vmem:[#allocation2 + $0x18] sm:$0xff] (!%p3624_p11) }
 0x152   : > { %v1467_v37 = vld [vmem:[#allocation2 + $0xd8] sm:$0xff] (!%p3624_p11)  ;;  %v1444_v38 = vld [vmem:[#allocation2 + $0x20] sm:$0xff] (!%p3624_p11)  ;;  %v1445_v40 = vld [vmem:[#allocation2 + $0x28] sm:$0xff] (!%p3624_p11) }
 0x153   : > { %4417 = vmatpush3.bf16.msra.mxu0 (!%p3624_p11), %v4625_v23  ;;  %4557 = vmatpush3.bf16.msra.mxu1 (!%p3624_p11), %v4625_v23  ;;  %v1468_v39 = vld [vmem:[#allocation2 + $0xe0] sm:$0xff] (!%p3624_p11)  ;;  %v1469_v41 = vld [vmem:[#allocation2 + $0xe8] sm:$0xff] (!%p3624_p11)  ;;  %v1446_v42 = vld [vmem:[#allocation2 + $0x30] sm:$0xff] (!%p3624_p11) }
 0x154   : > { %4418 = vmatprep.subr.bf16.mxu0 (!%p3624_p11), %v4626_v34  ;;  %4550 = vmatprep.subr.bf16.mxu1 (!%p3624_p11), %v4626_v34  ;;  %v1470_v43 = vld [vmem:[#allocation2 + $0xf0] sm:$0xff] (!%p3624_p11)  ;;  %v1447_v44 = vld [vmem:[#allocation2 + $0x38] sm:$0xff] (!%p3624_p11)  ;;  %v1448_v46 = vld [vmem:[#allocation2 + $0x40] sm:$0xff] (!%p3624_p11) }
 0x155   : > { %v1471_v45 = vld [vmem:[#allocation2 + $0xf8] sm:$0xff]  ;;  %v1472_v47 = vld [vmem:[#allocation2 + $0x100] sm:$0xff]  ;;  %v1449_v48 = vld [vmem:[#allocation2 + $0x48] sm:$0xff] }
 0x156   : > { %v1473_v49 = vld [vmem:[#allocation2 + $0x108] sm:$0xff]  ;;  %v1450_v50 = vld [vmem:[#allocation2 + $0x50] sm:$0xff]  ;;  %v1451_v52 = vld [vmem:[#allocation2 + $0x58] sm:$0xff] }
 0x157   : > { %4419 = vmatpush3.bf16.msra.mxu0 %v4626_v34  ;;  %4558 = vmatpush3.bf16.msra.mxu1 %v4626_v34  ;;  %v1474_v51 = vld [vmem:[#allocation2 + $0x110] sm:$0xff]  ;;  %v1475_v53 = vld [vmem:[#allocation2 + $0x118] sm:$0xff]  ;;  %v1452_v54 = vld [vmem:[#allocation2 + $0x60] sm:$0xff] }
 0x158   : > { %4420 = vmatprep.subr.bf16.mxu0 %v4627_v24  ;;  %4551 = vmatprep.subr.bf16.mxu1 %v4627_v24  ;;  %v1476_v55 = vld [vmem:[#allocation2 + $0x120] sm:$0xff]  ;;  %v1453_v56 = vld [vmem:[#allocation2 + $0x68] sm:$0xff]  ;;  %v1454_v58 = vld [vmem:[#allocation2 + $0x70] sm:$0xff] }
 0x159   : > { %v1477_v57 = vld [vmem:[#allocation2 + $0x128] sm:$0xff]  ;;  %v1478_v59 = vld [vmem:[#allocation2 + $0x130] sm:$0xff]  ;;  %v1455_v60 = vld [vmem:[#allocation2 + $0x78] sm:$0xff] }
 0x15a   : > { %v1479_v61 = vld [vmem:[#allocation2 + $0x138] sm:$0xff]  ;;  %v1456_v62 = vld [vmem:[#allocation2 + $0x80] sm:$0xff]  ;;  %v1457_v0 = vld [vmem:[#allocation2 + $0x88] sm:$0xff] }
 0x15b   : > { %4421 = vmatpush3.bf16.msra.mxu0 %v4627_v24  ;;  %4559 = vmatpush3.bf16.msra.mxu1 %v4627_v24  ;;  %v1480_v63 = vld [vmem:[#allocation2 + $0x140] sm:$0xff]  ;;  %v1481_v1 = vld [vmem:[#allocation2 + $0x148] sm:$0xff]  ;;  %v1458_v2 = vld [vmem:[#allocation2 + $0x90] sm:$0xff] }
 0x15c   : > { %4422 = vmatprep.subr.bf16.mxu0 %v4628_v27  ;;  %4552 = vmatprep.subr.bf16.mxu1 %v4628_v27  ;;  %v1482_v3 = vld [vmem:[#allocation2 + $0x150] sm:$0xff]  ;;  %v1459_v4 = vld [vmem:[#allocation2 + $0x98] sm:$0xff]  ;;  %v1460_v6 = vld [vmem:[#allocation2 + $0xa0] sm:$0xff] }
 0x15d   : > { %v1483_v5 = vld [vmem:[#allocation2 + $0x158] sm:$0xff]  ;;  %v1484_v7 = vld [vmem:[#allocation2 + $0x160] sm:$0xff]  ;;  %v1461_v8 = vld [vmem:[#allocation2 + $0xa8] sm:$0xff] }
 0x15e   : > { %v1485_v9 = vld [vmem:[#allocation2 + $0x168] sm:$0xff]  ;;  %v1462_v10 = vld [vmem:[#allocation2 + $0xb0] sm:$0xff]  ;;  %v1463_v12 = vld [vmem:[#allocation2 + $0xb8] sm:$0xff] }
 0x15f   : > { %4423 = vmatpush3.bf16.msra.mxu0 %v4628_v27  ;;  %4560 = vmatpush3.bf16.msra.mxu1 %v4628_v27  ;;  %v1486_v11 = vld [vmem:[#allocation2 + $0x170] sm:$0xff]  ;;  %v1487_v13 = vld [vmem:[#allocation2 + $0x178] sm:$0xff] }
 0x160   : > { %4424 = vmatprep.subr.bf16.mxu0 %v4629_v28  ;;  %4553 = vmatprep.subr.bf16.mxu1 %v4629_v28 }
 0x163   : > { %4425 = vmatpush3.bf16.msra.mxu0 %v4629_v28  ;;  %4561 = vmatpush3.bf16.msra.mxu1 %v4629_v28 }
 0x164   : > { %4426 = vmatprep.subr.bf16.mxu0 %v4630_v29  ;;  %4554 = vmatprep.subr.bf16.mxu1 %v4630_v29 }
 0x167   : > { %4427 = vmatpush3.bf16.msra.mxu0 %v4630_v29  ;;  %4562 = vmatpush3.bf16.msra.mxu1 %v4630_v29 }
 0x168   : > { %4428 = vmatprep.subr.bf16.mxu0 %v4631_v30  ;;  %4555 = vmatprep.subr.bf16.mxu1 %v4631_v30 }
 0x16b   : > { %4429 = vmatpush3.bf16.msra.mxu0 %v4631_v30  ;;  %4563 = vmatpush3.bf16.msra.mxu1 %v4631_v30 }
 0x16e   : > { %4431 = vmatmul.mubr.bf16.vlgmr.msra.gmra.mrb[0].mxu0 %v1441_v31  ;;  %4479 = vmatmul.mubr.bf16.vlgmr.msra.gmra.mrb[0].mxu1 %v1465_v32 }
 0x16f   : > { %4434 = vmatprep.mubr.bf16.mxu0 %v1442_v33  ;;  %4482 = vmatprep.mubr.bf16.mxu1 %v1466_v35 }
 0x176   : > { %4435 = vmatmul.mubr.bf16.gmra.mrb[4].mxu0 %v1443_v36  ;;  %4483 = vmatmul.mubr.bf16.gmra.mrb[4].mxu1 %v1467_v37 }
 0x177   : > { %4438 = vmatprep.mubr.bf16.mxu0 %v1444_v38  ;;  %4486 = vmatprep.mubr.bf16.mxu1 %v1468_v39 }
 0x17e   : > { %4439 = vmatmul.mubr.bf16.gmra.mrb[8].mxu0 %v1445_v40  ;;  %4487 = vmatmul.mubr.bf16.gmra.mrb[8].mxu1 %v1469_v41 }
 0x17f   : > { %4442 = vmatprep.mubr.bf16.mxu0 %v1446_v42  ;;  %4490 = vmatprep.mubr.bf16.mxu1 %v1470_v43 }
 0x186   : > { %4443 = vmatmul.mubr.bf16.gmra.mrb[12].mxu0 %v1447_v44  ;;  %4491 = vmatmul.mubr.bf16.gmra.mrb[12].mxu1 %v1471_v45 }
 0x187   : > { %4446 = vmatprep.mubr.bf16.mxu0 %v1448_v46  ;;  %4494 = vmatprep.mubr.bf16.mxu1 %v1472_v47 }
 0x18e   : > { %4447 = vmatmul.mubr.bf16.gmra.mrb[16].mxu0 %v1449_v48  ;;  %4495 = vmatmul.mubr.bf16.gmra.mrb[16].mxu1 %v1473_v49 }
 0x18f   : > { %4450 = vmatprep.mubr.bf16.mxu0 %v1450_v50  ;;  %4498 = vmatprep.mubr.bf16.mxu1 %v1474_v51 }
 0x196   : > { %4451 = vmatmul.mubr.bf16.gmra.mrb[20].mxu0 %v1451_v52  ;;  %4499 = vmatmul.mubr.bf16.gmra.mrb[20].mxu1 %v1475_v53 }
 0x197   : > { %4454 = vmatprep.mubr.bf16.mxu0 %v1452_v54  ;;  %4502 = vmatprep.mubr.bf16.mxu1 %v1476_v55 }
 0x19e   : > { %4455 = vmatmul.mubr.bf16.gmra.mrb[24].mxu0 %v1453_v56  ;;  %4503 = vmatmul.mubr.bf16.gmra.mrb[24].mxu1 %v1477_v57 }
 0x19f   : > { %4458 = vmatprep.mubr.bf16.mxu0 %v1454_v58  ;;  %4506 = vmatprep.mubr.bf16.mxu1 %v1478_v59 }
 0x1a6   : > { %4459 = vmatmul.mubr.bf16.gmra.mrb[28].mxu0 %v1455_v60  ;;  %4507 = vmatmul.mubr.bf16.gmra.mrb[28].mxu1 %v1479_v61 }
 0x1a7   : > { %4462 = vmatprep.mubr.bf16.mxu0 %v1456_v62  ;;  %4510 = vmatprep.mubr.bf16.mxu1 %v1480_v63 }
 0x1ae   : > { %4463 = vmatmul.mubr.bf16.gmra.mrb[32].mxu0 %v1457_v0  ;;  %4511 = vmatmul.mubr.bf16.gmra.mrb[32].mxu1 %v1481_v1 }
 0x1af   : > { %4466 = vmatprep.mubr.bf16.mxu0 %v1458_v2  ;;  %4514 = vmatprep.mubr.bf16.mxu1 %v1482_v3 }
 0x1b6   : > { %4467 = vmatmul.mubr.bf16.gmra.mrb[36].mxu0 %v1459_v4  ;;  %4515 = vmatmul.mubr.bf16.gmra.mrb[36].mxu1 %v1483_v5 }
 0x1b7   : > { %4470 = vmatprep.mubr.bf16.mxu0 %v1460_v6  ;;  %4518 = vmatprep.mubr.bf16.mxu1 %v1484_v7 }
 0x1be   : > { %4471 = vmatmul.mubr.bf16.gmra.mrb[40].mxu0 %v1461_v8  ;;  %4519 = vmatmul.mubr.bf16.gmra.mrb[40].mxu1 %v1485_v9 }
 0x1bf   : > { %4474 = vmatprep.mubr.bf16.mxu0 %v1462_v10  ;;  %4522 = vmatprep.mubr.bf16.mxu1 %v1486_v11 }
 0x1c6   : > { %4475 = vmatmul.mubr.bf16.gmra.mrb[44].mxu0 %v1463_v12  ;;  %4523 = vmatmul.mubr.bf16.gmra.mrb[44].mxu1 %v1487_v13 }
 0x241   : > { %v4432_v14 = vpop.f32.mrb[0].mxu0  ;;  %v4480_v15 = vpop.f32.mrb[0].mxu1 }
 0x242   : > { %v1586_v16 = vpop.f32.mrb[1].mxu0  ;;  %v1778_v17 = vpop.f32.mrb[1].mxu1 }
 0x243   : > { %v4433_v18 = vpop.f32.mrb[2].mxu0  ;;  %v4481_v19 = vpop.f32.mrb[2].mxu1 }
 0x244   : > { %v1970_v20 = vpack.c.bf16 %v4433_v18, %v4432_v14  ;;  %v1994_v21 = vpack.c.bf16 %v4481_v19, %v4480_v15  ;;  %v1589_v22 = vpop.f32.mrb[3].mxu0  ;;  %v1781_v23 = vpop.f32.mrb[3].mxu1 }
 0x245   : > { %v1969_v34 = vpack.c.bf16 %v1589_v22, %v1586_v16  ;;  %v1993_v24 = vpack.c.bf16 %v1781_v23, %v1778_v17 }
 0x246   : > { %2018 = vst [vmem:[#allocation3 + $0x8] sm:$0xff] %v1970_v20  ;;  %2042 = vst [vmem:[#allocation3 + $0xc8] sm:$0xff] %v1994_v21 }
 0x247   : > { %2017 = vst [vmem:[#allocation3] sm:$0xff] %v1969_v34  ;;  %2041 = vst [vmem:[#allocation3 + $0xc0] sm:$0xff] %v1993_v24 }
 0x249   : > { %v4436_v25 = vpop.f32.mrb[4].mxu0  ;;  %v4484_v26 = vpop.f32.mrb[4].mxu1 }
 0x24a   : > { %v1602_v27 = vpop.f32.mrb[5].mxu0  ;;  %v1794_v28 = vpop.f32.mrb[5].mxu1 }
 0x24b   : > { %v4437_v29 = vpop.f32.mrb[6].mxu0  ;;  %v4485_v30 = vpop.f32.mrb[6].mxu1 }
 0x24c   : > { %v1972_v31 = vpack.c.bf16 %v4437_v29, %v4436_v25  ;;  %v1996_v32 = vpack.c.bf16 %v4485_v30, %v4484_v26  ;;  %v1605_v33 = vpop.f32.mrb[7].mxu0  ;;  %v1797_v35 = vpop.f32.mrb[7].mxu1 }
 0x24d   : > { %v1971_v36 = vpack.c.bf16 %v1605_v33, %v1602_v27  ;;  %v1995_v37 = vpack.c.bf16 %v1797_v35, %v1794_v28 }
 0x24e   : > { %2020 = vst [vmem:[#allocation3 + $0x18] sm:$0xff] %v1972_v31  ;;  %2044 = vst [vmem:[#allocation3 + $0xd8] sm:$0xff] %v1996_v32 }
 0x24f   : > { %2019 = vst [vmem:[#allocation3 + $0x10] sm:$0xff] %v1971_v36  ;;  %2043 = vst [vmem:[#allocation3 + $0xd0] sm:$0xff] %v1995_v37 }
 0x251   : > { %v4440_v38 = vpop.f32.mrb[8].mxu0  ;;  %v4488_v39 = vpop.f32.mrb[8].mxu1 }
 0x252   : > { %v1618_v40 = vpop.f32.mrb[9].mxu0  ;;  %v1810_v41 = vpop.f32.mrb[9].mxu1 }
 0x253   : > { %v4441_v42 = vpop.f32.mrb[10].mxu0  ;;  %v4489_v43 = vpop.f32.mrb[10].mxu1 }
 0x254   : > { %v1974_v44 = vpack.c.bf16 %v4441_v42, %v4440_v38  ;;  %v1998_v45 = vpack.c.bf16 %v4489_v43, %v4488_v39  ;;  %v1621_v46 = vpop.f32.mrb[11].mxu0  ;;  %v1813_v47 = vpop.f32.mrb[11].mxu1 }
 0x255   : > { %v1973_v48 = vpack.c.bf16 %v1621_v46, %v1618_v40  ;;  %v1997_v49 = vpack.c.bf16 %v1813_v47, %v1810_v41 }
 0x256   : > { %2022 = vst [vmem:[#allocation3 + $0x28] sm:$0xff] %v1974_v44  ;;  %2046 = vst [vmem:[#allocation3 + $0xe8] sm:$0xff] %v1998_v45 }
 0x257   : > { %2021 = vst [vmem:[#allocation3 + $0x20] sm:$0xff] %v1973_v48  ;;  %2045 = vst [vmem:[#allocation3 + $0xe0] sm:$0xff] %v1997_v49 }
 0x259   : > { %v4444_v50 = vpop.f32.mrb[12].mxu0  ;;  %v4492_v51 = vpop.f32.mrb[12].mxu1 }
 0x25a   : > { %v1634_v52 = vpop.f32.mrb[13].mxu0  ;;  %v1826_v53 = vpop.f32.mrb[13].mxu1 }
 0x25b   : > { %v4445_v54 = vpop.f32.mrb[14].mxu0  ;;  %v4493_v55 = vpop.f32.mrb[14].mxu1 }
 0x25c   : > { %v1976_v56 = vpack.c.bf16 %v4445_v54, %v4444_v50  ;;  %v2000_v57 = vpack.c.bf16 %v4493_v55, %v4492_v51  ;;  %v1637_v58 = vpop.f32.mrb[15].mxu0  ;;  %v1829_v59 = vpop.f32.mrb[15].mxu1 }
 0x25d   : > { %v1975_v60 = vpack.c.bf16 %v1637_v58, %v1634_v52  ;;  %v1999_v61 = vpack.c.bf16 %v1829_v59, %v1826_v53 }
 0x25e   : > { %2024 = vst [vmem:[#allocation3 + $0x38] sm:$0xff] %v1976_v56  ;;  %2048 = vst [vmem:[#allocation3 + $0xf8] sm:$0xff] %v2000_v57 }
 0x25f   : > { %2023 = vst [vmem:[#allocation3 + $0x30] sm:$0xff] %v1975_v60  ;;  %2047 = vst [vmem:[#allocation3 + $0xf0] sm:$0xff] %v1999_v61 }
 0x261   : > { %v4448_v62 = vpop.f32.mrb[16].mxu0  ;;  %v4496_v63 = vpop.f32.mrb[16].mxu1 }
 0x262   : > { %v1650_v0 = vpop.f32.mrb[17].mxu0  ;;  %v1842_v1 = vpop.f32.mrb[17].mxu1 }
 0x263   : > { %v4449_v2 = vpop.f32.mrb[18].mxu0  ;;  %v4497_v3 = vpop.f32.mrb[18].mxu1 }
 0x264   : > { %v1978_v4 = vpack.c.bf16 %v4449_v2, %v4448_v62  ;;  %v2002_v5 = vpack.c.bf16 %v4497_v3, %v4496_v63  ;;  %v1653_v6 = vpop.f32.mrb[19].mxu0  ;;  %v1845_v7 = vpop.f32.mrb[19].mxu1 }
 0x265   : > { %v1977_v8 = vpack.c.bf16 %v1653_v6, %v1650_v0  ;;  %v2001_v9 = vpack.c.bf16 %v1845_v7, %v1842_v1 }
 0x266   : > { %2026 = vst [vmem:[#allocation3 + $0x48] sm:$0xff] %v1978_v4  ;;  %2050 = vst [vmem:[#allocation3 + $0x108] sm:$0xff] %v2002_v5 }
 0x267   : > { %2025 = vst [vmem:[#allocation3 + $0x40] sm:$0xff] %v1977_v8  ;;  %2049 = vst [vmem:[#allocation3 + $0x100] sm:$0xff] %v2001_v9 }
 0x269   : > { %v4452_v10 = vpop.f32.mrb[20].mxu0  ;;  %v4500_v11 = vpop.f32.mrb[20].mxu1 }
 0x26a   : > { %v1666_v12 = vpop.f32.mrb[21].mxu0  ;;  %v1858_v13 = vpop.f32.mrb[21].mxu1 }
 0x26b   : > { %v4453_v14 = vpop.f32.mrb[22].mxu0  ;;  %v4501_v15 = vpop.f32.mrb[22].mxu1 }
 0x26c   : > { %v1980_v16 = vpack.c.bf16 %v4453_v14, %v4452_v10  ;;  %v2004_v17 = vpack.c.bf16 %v4501_v15, %v4500_v11  ;;  %v1669_v18 = vpop.f32.mrb[23].mxu0  ;;  %v1861_v19 = vpop.f32.mrb[23].mxu1 }
 0x26d   : > { %v1979_v20 = vpack.c.bf16 %v1669_v18, %v1666_v12  ;;  %v2003_v21 = vpack.c.bf16 %v1861_v19, %v1858_v13 }
 0x26e   : > { %2028 = vst [vmem:[#allocation3 + $0x58] sm:$0xff] %v1980_v16  ;;  %2052 = vst [vmem:[#allocation3 + $0x118] sm:$0xff] %v2004_v17 }
 0x26f   : > { %2027 = vst [vmem:[#allocation3 + $0x50] sm:$0xff] %v1979_v20  ;;  %2051 = vst [vmem:[#allocation3 + $0x110] sm:$0xff] %v2003_v21 }
 0x271   : > { %v4456_v22 = vpop.f32.mrb[24].mxu0  ;;  %v4504_v23 = vpop.f32.mrb[24].mxu1 }
 0x272   : > { %v1682_v34 = vpop.f32.mrb[25].mxu0  ;;  %v1874_v24 = vpop.f32.mrb[25].mxu1 }
 0x273   : > { %v4457_v25 = vpop.f32.mrb[26].mxu0  ;;  %v4505_v26 = vpop.f32.mrb[26].mxu1 }
 0x274   : > { %v1982_v27 = vpack.c.bf16 %v4457_v25, %v4456_v22  ;;  %v2006_v28 = vpack.c.bf16 %v4505_v26, %v4504_v23  ;;  %v1685_v29 = vpop.f32.mrb[27].mxu0  ;;  %v1877_v30 = vpop.f32.mrb[27].mxu1 }
 0x275   : > { %v1981_v31 = vpack.c.bf16 %v1685_v29, %v1682_v34  ;;  %v2005_v32 = vpack.c.bf16 %v1877_v30, %v1874_v24 }
 0x276   : > { %2030 = vst [vmem:[#allocation3 + $0x68] sm:$0xff] %v1982_v27  ;;  %2054 = vst [vmem:[#allocation3 + $0x128] sm:$0xff] %v2006_v28 }
 0x277   : > { %2029 = vst [vmem:[#allocation3 + $0x60] sm:$0xff] %v1981_v31  ;;  %2053 = vst [vmem:[#allocation3 + $0x120] sm:$0xff] %v2005_v32 }
 0x279   : > { %v4460_v33 = vpop.f32.mrb[28].mxu0  ;;  %v4508_v35 = vpop.f32.mrb[28].mxu1 }
 0x27a   : > { %v1698_v36 = vpop.f32.mrb[29].mxu0  ;;  %v1890_v37 = vpop.f32.mrb[29].mxu1 }
 0x27b   : > { %v4461_v38 = vpop.f32.mrb[30].mxu0  ;;  %v4509_v39 = vpop.f32.mrb[30].mxu1 }
 0x27c   : > { %v1984_v40 = vpack.c.bf16 %v4461_v38, %v4460_v33  ;;  %v2008_v41 = vpack.c.bf16 %v4509_v39, %v4508_v35  ;;  %v1701_v42 = vpop.f32.mrb[31].mxu0  ;;  %v1893_v43 = vpop.f32.mrb[31].mxu1 }
 0x27d   : > { %v1983_v44 = vpack.c.bf16 %v1701_v42, %v1698_v36  ;;  %v2007_v45 = vpack.c.bf16 %v1893_v43, %v1890_v37 }
 0x27e   : > { %2032 = vst [vmem:[#allocation3 + $0x78] sm:$0xff] %v1984_v40  ;;  %2056 = vst [vmem:[#allocation3 + $0x138] sm:$0xff] %v2008_v41 }
 0x27f   : > { %2031 = vst [vmem:[#allocation3 + $0x70] sm:$0xff] %v1983_v44  ;;  %2055 = vst [vmem:[#allocation3 + $0x130] sm:$0xff] %v2007_v45 }
 0x281   : > { %v4464_v46 = vpop.f32.mrb[32].mxu0  ;;  %v4512_v47 = vpop.f32.mrb[32].mxu1 }
 0x282   : > { %v1714_v48 = vpop.f32.mrb[33].mxu0  ;;  %v1906_v49 = vpop.f32.mrb[33].mxu1 }
 0x283   : > { %v4465_v50 = vpop.f32.mrb[34].mxu0  ;;  %v4513_v51 = vpop.f32.mrb[34].mxu1 }
 0x284   : > { %v1986_v52 = vpack.c.bf16 %v4465_v50, %v4464_v46  ;;  %v2010_v53 = vpack.c.bf16 %v4513_v51, %v4512_v47  ;;  %v1717_v54 = vpop.f32.mrb[35].mxu0  ;;  %v1909_v55 = vpop.f32.mrb[35].mxu1 }
 0x285   : > { %v1985_v56 = vpack.c.bf16 %v1717_v54, %v1714_v48  ;;  %v2009_v57 = vpack.c.bf16 %v1909_v55, %v1906_v49 }
 0x286   : > { %2034 = vst [vmem:[#allocation3 + $0x88] sm:$0xff] %v1986_v52  ;;  %2058 = vst [vmem:[#allocation3 + $0x148] sm:$0xff] %v2010_v53 }
 0x287   : > { %2033 = vst [vmem:[#allocation3 + $0x80] sm:$0xff] %v1985_v56  ;;  %2057 = vst [vmem:[#allocation3 + $0x140] sm:$0xff] %v2009_v57 }
 0x289   : > { %v4468_v58 = vpop.f32.mrb[36].mxu0  ;;  %v4516_v59 = vpop.f32.mrb[36].mxu1 }
 0x28a   : > { %v1730_v60 = vpop.f32.mrb[37].mxu0  ;;  %v1922_v61 = vpop.f32.mrb[37].mxu1 }
 0x28b   : > { %v4469_v62 = vpop.f32.mrb[38].mxu0  ;;  %v4517_v63 = vpop.f32.mrb[38].mxu1 }
 0x28c   : > { %v1988_v0 = vpack.c.bf16 %v4469_v62, %v4468_v58  ;;  %v2012_v1 = vpack.c.bf16 %v4517_v63, %v4516_v59  ;;  %v1733_v2 = vpop.f32.mrb[39].mxu0  ;;  %v1925_v3 = vpop.f32.mrb[39].mxu1 }
 0x28d   : > { %v1987_v4 = vpack.c.bf16 %v1733_v2, %v1730_v60  ;;  %v2011_v5 = vpack.c.bf16 %v1925_v3, %v1922_v61 }
 0x28e   : > { %2036 = vst [vmem:[#allocation3 + $0x98] sm:$0xff] %v1988_v0  ;;  %2060 = vst [vmem:[#allocation3 + $0x158] sm:$0xff] %v2012_v1 }
 0x28f   : > { %2035 = vst [vmem:[#allocation3 + $0x90] sm:$0xff] %v1987_v4  ;;  %2059 = vst [vmem:[#allocation3 + $0x150] sm:$0xff] %v2011_v5 }
 0x291   : > { %v4472_v6 = vpop.f32.mrb[40].mxu0  ;;  %v4520_v7 = vpop.f32.mrb[40].mxu1 }
 0x292   : > { %v1746_v8 = vpop.f32.mrb[41].mxu0  ;;  %v1938_v9 = vpop.f32.mrb[41].mxu1 }
 0x293   : > { %v4473_v10 = vpop.f32.mrb[42].mxu0  ;;  %v4521_v11 = vpop.f32.mrb[42].mxu1 }
 0x294   : > { %v1990_v12 = vpack.c.bf16 %v4473_v10, %v4472_v6  ;;  %v2014_v13 = vpack.c.bf16 %v4521_v11, %v4520_v7  ;;  %v1749_v14 = vpop.f32.mrb[43].mxu0  ;;  %v1941_v15 = vpop.f32.mrb[43].mxu1 }
 0x295   : > { %v1989_v16 = vpack.c.bf16 %v1749_v14, %v1746_v8  ;;  %v2013_v17 = vpack.c.bf16 %v1941_v15, %v1938_v9 }
 0x296   : > { %2038 = vst [vmem:[#allocation3 + $0xa8] sm:$0xff] %v1990_v12  ;;  %2062 = vst [vmem:[#allocation3 + $0x168] sm:$0xff] %v2014_v13 }
 0x297   : > { %2037 = vst [vmem:[#allocation3 + $0xa0] sm:$0xff] %v1989_v16  ;;  %2061 = vst [vmem:[#allocation3 + $0x160] sm:$0xff] %v2013_v17 }
 0x299   : > { %v4476_v18 = vpop.f32.mrb[44].mxu0  ;;  %v4524_v19 = vpop.f32.mrb[44].mxu1 }
 0x29a   : > { %v1762_v20 = vpop.f32.mrb[45].mxu0  ;;  %v1954_v21 = vpop.f32.mrb[45].mxu1 }
 0x29b   : > { %v4477_v22 = vpop.f32.mrb[46].mxu0  ;;  %v4525_v23 = vpop.f32.mrb[46].mxu1 }
 0x29c   : > { %v1992_v34 = vpack.c.bf16 %v4477_v22, %v4476_v18  ;;  %v2016_v24 = vpack.c.bf16 %v4525_v23, %v4524_v19  ;;  %v1765_v25 = vpop.f32.mrb[47].mxu0  ;;  %v1957_v26 = vpop.f32.mrb[47].mxu1 }
 0x29d   : > { %v1991_v27 = vpack.c.bf16 %v1765_v25, %v1762_v20  ;;  %v2015_v28 = vpack.c.bf16 %v1957_v26, %v1954_v21 }
 0x29e   : > { %2040 = vst [vmem:[#allocation3 + $0xb8] sm:$0xff] %v1992_v34  ;;  %2064 = vst [vmem:[#allocation3 + $0x178] sm:$0xff] %v2016_v24 }
 0x29f   : > { %2039 = vst [vmem:[#allocation3 + $0xb0] sm:$0xff] %v1991_v27  ;;  %2063 = vst [vmem:[#allocation3 + $0x170] sm:$0xff] %v2015_v28 }
 0x2a0 PF: > { %v2169_v29 = vld [vmem:[#allocation3 + $0x40] sm:$0xff]  ;;  %v2170_v31 = vld [vmem:[#allocation3 + $0x48] sm:$0xff]  ;;  %v2171_v33 = vld [vmem:[#allocation3 + $0x50] sm:$0xff]  ;;  %s3730_s28 = sshll.u32 %s4808_s30, 8  ;;  %p3731_p12 = scmp.ge.s32.totalorder %s4812_s10, 3 }
 0x2a1   : > { %v2161_v30 = vld [vmem:[#allocation3] sm:$0xff]  ;;  %3901 = vmatprep.subr.bf16.mxu0 %v2169_v29  ;;  %4564 = vmatprep.subr.bf16.mxu1 %v2169_v29  ;;  %v2162_v32 = vld [vmem:[#allocation3 + $0x8] sm:$0xff]  ;;  %v2163_v36 = vld [vmem:[#allocation3 + $0x10] sm:$0xff]  ;;  %s3232_s18 = sshra.s32 (!%p3731_p12), %s3730_s28, 4 }
 0x2a2   : > { %3902 = vmatpush3.bf16.msra.mxu0 %v2161_v30  ;;  %4572 = vmatpush3.bf16.msra.mxu1 %v2161_v30  ;;  %v4634_v35 = vld [vmem:[%s4933_s29 + $0x4] ss:$24 sps:$4 sm:$0xff]   ;;  %v2174_v42 = vld [vmem:[#allocation3 + $0x68] sm:$0xff]  ;;  %v2175_v44 = vld [vmem:[#allocation3 + $0x70] sm:$0xff] }
 0x2a3   : > { %3903 = vmatprep.subr.bf16.mxu0 %v2170_v31  ;;  %4565 = vmatprep.subr.bf16.mxu1 %v2170_v31  ;;  %v4637_v37 = vld [vmem:[%s4933_s29 + $0x184] ss:$24 sps:$4 sm:$0xff]   ;;  %v2166_v43 = vld [vmem:[#allocation3 + $0x28] sm:$0xff]  ;;  %v2167_v45 = vld [vmem:[#allocation3 + $0x30] sm:$0xff] }
 0x2a4   : > { %v2172_v38 = vld [vmem:[#allocation3 + $0x58] sm:$0xff]  ;;  %2728 = vmatprep.mubr.bf16.mxu0 %v4634_v35  ;;  %2792 = vmatprep.mubr.bf16.mxu1 %v4637_v37  ;;  %v2173_v40 = vld [vmem:[#allocation3 + $0x60] sm:$0xff]  ;;  %v4638_v54 = vld [vmem:[%s4933_s29 + $0x34] ss:$24 sps:$4 sm:$0xff]  }
 0x2a5   : > { %v2164_v39 = vld [vmem:[#allocation3 + $0x18] sm:$0xff]  ;;  %v2165_v41 = vld [vmem:[#allocation3 + $0x20] sm:$0xff]  ;;  %v4640_v55 = vld [vmem:[%s4933_s29 + $0x1b4] ss:$24 sps:$4 sm:$0xff]  }
 0x2a6   : > { %3904 = vmatpush3.bf16.msra.mxu0 %v2162_v32  ;;  %4573 = vmatpush3.bf16.msra.mxu1 %v2162_v32  ;;  %v2176_v46 = vld [vmem:[#allocation3 + $0x78] sm:$0xff]  ;;  %v2185_v49 = vld [vmem:[#allocation3 + $0xc0] sm:$0xff]  ;;  %v2186_v56 = vld [vmem:[#allocation3 + $0xc8] sm:$0xff] }
 0x2a7   : > { %3905 = vmatprep.subr.bf16.mxu0 %v2171_v33  ;;  %4566 = vmatprep.subr.bf16.mxu1 %v2171_v33  ;;  %v2168_v47 = vld [vmem:[#allocation3 + $0x38] sm:$0xff]  ;;  %v2201_v50 = vld [vmem:[#allocation3 + $0x140] sm:$0xff]  ;;  %v2202_v57 = vld [vmem:[#allocation3 + $0x148] sm:$0xff] }
 0x2a8   : > { %v4632_v48 = vld [vmem:[%s4933_s29] ss:$24 sps:$4 sm:$0xff]   ;;  %v2178_v58 = vld [vmem:[#allocation3 + $0x88] sm:$0xff]  ;;  %v2187_v61 = vld [vmem:[#allocation3 + $0xd0] sm:$0xff] }
 0x2a9   : > { %v4635_v51 = vld [vmem:[%s4933_s29 + $0x180] ss:$24 sps:$4 sm:$0xff]   ;;  %v2194_v59 = vld [vmem:[#allocation3 + $0x108] sm:$0xff]  ;;  %v2203_v62 = vld [vmem:[#allocation3 + $0x150] sm:$0xff] }
 0x2aa   : > { %3906 = vmatpush3.bf16.msra.mxu0 %v2163_v36  ;;  %4574 = vmatpush3.bf16.msra.mxu1 %v2163_v36  ;;  %v2177_v52 = vld [vmem:[#allocation3 + $0x80] sm:$0xff]  ;;  %v4642_v60 = vld [vmem:[%s4933_s29 + $0x30] ss:$24 sps:$4 sm:$0xff]   ;;  %v2188_v4 = vld [vmem:[#allocation3 + $0xd8] sm:$0xff] }
 0x2ab   : > { %3907 = vmatprep.subr.bf16.mxu0 %v2172_v38  ;;  %4567 = vmatprep.subr.bf16.mxu1 %v2172_v38  ;;  %v2193_v53 = vld [vmem:[#allocation3 + $0x100] sm:$0xff]  ;;  %v4643_v63 = vld [vmem:[%s4933_s29 + $0x1b0] ss:$24 sps:$4 sm:$0xff]   ;;  %v2204_v5 = vld [vmem:[#allocation3 + $0x158] sm:$0xff] }
 0x2ac   : > { %v4644_v0 = vld [vmem:[%s4933_s29 + $0x64] ss:$24 sps:$4 sm:$0xff]   ;;  %v2179_v2 = vld [vmem:[#allocation3 + $0x90] sm:$0xff]  ;;  %v4648_v6 = vld [vmem:[%s4933_s29 + $0x60] ss:$24 sps:$4 sm:$0xff]  }
 0x2ad   : > { %v4646_v1 = vld [vmem:[%s4933_s29 + $0x1e4] ss:$24 sps:$4 sm:$0xff]   ;;  %v2195_v3 = vld [vmem:[#allocation3 + $0x110] sm:$0xff]  ;;  %v4649_v7 = vld [vmem:[%s4933_s29 + $0x1e0] ss:$24 sps:$4 sm:$0xff]  }
 0x2ae   : > { %3908 = vmatpush3.bf16.msra.mxu0 %v2164_v39  ;;  %4575 = vmatpush3.bf16.msra.mxu1 %v2164_v39  ;;  %v2180_v8 = vld [vmem:[#allocation3 + $0x98] sm:$0xff]  ;;  %v4650_v9 = vld [vmem:[%s4933_s29 + $0x94] ss:$24 sps:$4 sm:$0xff]   ;;  %v2189_v11 = vld [vmem:[#allocation3 + $0xe0] sm:$0xff] }
 0x2af   : > { %3909 = vmatprep.subr.bf16.mxu0 %v2173_v40  ;;  %4568 = vmatprep.subr.bf16.mxu1 %v2173_v40  ;;  %v2196_v10 = vld [vmem:[#allocation3 + $0x118] sm:$0xff]  ;;  %v2205_v12 = vld [vmem:[#allocation3 + $0x160] sm:$0xff]  ;;  %v4652_v13 = vld [vmem:[%s4933_s29 + $0x214] ss:$24 sps:$4 sm:$0xff]  }
 0x2b0   : > { %v2181_v14 = vld [vmem:[#allocation3 + $0xa0] sm:$0xff]  ;;  %v2190_v16 = vld [vmem:[#allocation3 + $0xe8] sm:$0xff]  ;;  %v2191_v23 = vld [vmem:[#allocation3 + $0xf0] sm:$0xff] }
 0x2b1   : > { %v2197_v15 = vld [vmem:[#allocation3 + $0x120] sm:$0xff]  ;;  %v2206_v17 = vld [vmem:[#allocation3 + $0x168] sm:$0xff]  ;;  %v2207_v34 = vld [vmem:[#allocation3 + $0x170] sm:$0xff] }
 0x2b2   : > { %3910 = vmatpush3.bf16.msra.mxu0 %v2165_v41  ;;  %4576 = vmatpush3.bf16.msra.mxu1 %v2165_v41  ;;  %v4654_v18 = vld [vmem:[%s4933_s29 + $0x90] ss:$24 sps:$4 sm:$0xff]   ;;  %v4656_v21 = vld [vmem:[%s4933_s29 + $0xc4] ss:$24 sps:$4 sm:$0xff]   ;;  %v4660_v29 = vld [vmem:[%s4933_s29 + $0xc0] ss:$24 sps:$4 sm:$0xff]  }
 0x2b3   : > { %3911 = vmatprep.subr.bf16.mxu0 %v2174_v42  ;;  %4569 = vmatprep.subr.bf16.mxu1 %v2174_v42  ;;  %v4655_v19 = vld [vmem:[%s4933_s29 + $0x210] ss:$24 sps:$4 sm:$0xff]   ;;  %v4658_v24 = vld [vmem:[%s4933_s29 + $0x244] ss:$24 sps:$4 sm:$0xff]   ;;  %v4661_v30 = vld [vmem:[%s4933_s29 + $0x240] ss:$24 sps:$4 sm:$0xff]  }
 0x2b4   : > { %v2182_v20 = vld [vmem:[#allocation3 + $0xa8] sm:$0xff]  ;;  %v2183_v25 = vld [vmem:[#allocation3 + $0xb0] sm:$0xff]  ;;  %v2192_v27 = vld [vmem:[#allocation3 + $0xf8] sm:$0xff] }
 0x2b5   : > { %v2198_v22 = vld [vmem:[#allocation3 + $0x128] sm:$0xff]  ;;  %v2199_v26 = vld [vmem:[#allocation3 + $0x130] sm:$0xff]  ;;  %v2208_v28 = vld [vmem:[#allocation3 + $0x178] sm:$0xff] }
 0x2b6   : > { %3912 = vmatpush3.bf16.msra.mxu0 %v2166_v43  ;;  %4577 = vmatpush3.bf16.msra.mxu1 %v2166_v43  ;;  %v2184_v31 = vld [vmem:[#allocation3 + $0xb8] sm:$0xff]  ;;  %v4662_v33 = vld [vmem:[%s4933_s29 + $0xf4] ss:$24 sps:$4 sm:$0xff]   ;;  %v4666_v36 = vld [vmem:[%s4933_s29 + $0xf0] ss:$24 sps:$4 sm:$0xff]  }
 0x2b7   : > { %3913 = vmatprep.subr.bf16.mxu0 %v2175_v44  ;;  %4570 = vmatprep.subr.bf16.mxu1 %v2175_v44  ;;  %v2200_v32 = vld [vmem:[#allocation3 + $0x138] sm:$0xff]  ;;  %v4664_v35 = vld [vmem:[%s4933_s29 + $0x274] ss:$24 sps:$4 sm:$0xff]   ;;  %v4667_v37 = vld [vmem:[%s4933_s29 + $0x270] ss:$24 sps:$4 sm:$0xff]  }
 0x2b8   : > { %v4668_v38 = vld [vmem:[%s4933_s29 + $0x124] ss:$24 sps:$4 sm:$0xff]   ;;  %v4672_v40 = vld [vmem:[%s4933_s29 + $0x120] ss:$24 sps:$4 sm:$0xff]   ;;  %v4674_v42 = vld [vmem:[%s4933_s29 + $0x154] ss:$24 sps:$4 sm:$0xff]  }
 0x2b9   : > { %v4670_v39 = vld [vmem:[%s4933_s29 + $0x2a4] ss:$24 sps:$4 sm:$0xff]   ;;  %v4673_v41 = vld [vmem:[%s4933_s29 + $0x2a0] ss:$24 sps:$4 sm:$0xff]   ;;  %v4676_v43 = vld [vmem:[%s4933_s29 + $0x2d4] ss:$24 sps:$4 sm:$0xff]  }
 0x2ba   : > { %3914 = vmatpush3.bf16.msra.mxu0 %v2167_v45  ;;  %4578 = vmatpush3.bf16.msra.mxu1 %v2167_v45  ;;  %v4678_v44 = vld [vmem:[%s4933_s29 + $0x150] ss:$24 sps:$4 sm:$0xff]  }
 0x2bb   : > { %3915 = vmatprep.subr.bf16.mxu0 %v2176_v46  ;;  %4571 = vmatprep.subr.bf16.mxu1 %v2176_v46  ;;  %v4679_v45 = vld [vmem:[%s4933_s29 + $0x2d0] ss:$24 sps:$4 sm:$0xff]   ;;  %v4682_v46 = vld [vmem:[%s4933_s29 + $0xc] ss:$24 sps:$4 sm:$0xff]  }
 0x2be   : > { %3916 = vmatpush3.bf16.msra.mxu0 %v2168_v47  ;;  %4579 = vmatpush3.bf16.msra.mxu1 %v2168_v47  ;;  %v4685_v47 = vld [vmem:[%s4933_s29 + $0x14] ss:$24 sps:$4 sm:$0xff]  }
 0x2bf   : > { %4013 = vmatprep.subr.bf16.mxu1 %v2185_v49  ;;  %4125 = vmatprep.subr.bf16.mxu0 %v2201_v50  ;;  %v4683_v49 = vld [vmem:[%s4933_s29 + $0x10] ss:$24 sps:$4 sm:$0xff]   ;;  %v4686_v50 = vld [vmem:[%s4933_s29 + $0x3c] ss:$24 sps:$4 sm:$0xff]  }
 0x2c1   : > { %2729 = vmatmul.mubr.bf16.vlgmr.msra.gmra.mrb[0].mxu0 %v4632_v48  ;;  %2793 = vmatmul.mubr.bf16.vlgmr.msra.gmra.mrb[0].mxu1 %v4635_v51  ;;  %v4680_v48 = vld [vmem:[%s4933_s29 + $0x8] ss:$24 sps:$4 sm:$0xff]   ;;  %v4688_v51 = vld [vmem:[%s4933_s29 + $0x44] ss:$24 sps:$4 sm:$0xff]  }
 0x2c2   : > { %4014 = vmatpush3.bf16.msra.mxu1 %v2177_v52  ;;  %4126 = vmatpush3.bf16.msra.mxu0 %v2193_v53  ;;  %v4690_v52 = vld [vmem:[%s4933_s29 + $0x38] ss:$24 sps:$4 sm:$0xff]  }
 0x2c3   : > { %2736 = vmatprep.mubr.bf16.mxu0 %v4638_v54  ;;  %2800 = vmatprep.mubr.bf16.mxu1 %v4640_v55  ;;  %v4691_v53 = vld [vmem:[%s4933_s29 + $0x40] ss:$24 sps:$4 sm:$0xff]   ;;  %v4692_v54 = vld [vmem:[%s4933_s29 + $0x6c] ss:$24 sps:$4 sm:$0xff]  }
 0x2c4   : > { %4015 = vmatprep.subr.bf16.mxu1 %v2186_v56  ;;  %4127 = vmatprep.subr.bf16.mxu0 %v2202_v57  ;;  %v4694_v55 = vld [vmem:[%s4933_s29 + $0x74] ss:$24 sps:$4 sm:$0xff]   ;;  %v4696_v56 = vld [vmem:[%s4933_s29 + $0x68] ss:$24 sps:$4 sm:$0xff]  }
 0x2c5   : > { %v4697_v57 = vld [vmem:[%s4933_s29 + $0x70] ss:$24 sps:$4 sm:$0xff]  }
 0x2c6   : > { %4016 = vmatpush3.bf16.msra.mxu1 %v2178_v58  ;;  %4128 = vmatpush3.bf16.msra.mxu0 %v2194_v59  ;;  %v4698_v58 = vld [vmem:[%s4933_s29 + $0x9c] ss:$24 sps:$4 sm:$0xff]  }
 0x2c7   : > { %4017 = vmatprep.subr.bf16.mxu1 %v2187_v61  ;;  %4129 = vmatprep.subr.bf16.mxu0 %v2203_v62  ;;  %v4700_v59 = vld [vmem:[%s4933_s29 + $0xa4] ss:$24 sps:$4 sm:$0xff]   ;;  %v4703_v61 = vld [vmem:[%s4933_s29 + $0xa0] ss:$24 sps:$4 sm:$0xff]  }
 0x2c8   : > { %v4704_v62 = vld [vmem:[%s4933_s29 + $0xcc] ss:$24 sps:$4 sm:$0xff]  }
 0x2c9   : > { %2737 = vmatmul.mubr.bf16.gmra.mrb[4].mxu0 %v4642_v60  ;;  %2801 = vmatmul.mubr.bf16.gmra.mrb[4].mxu1 %v4643_v63  ;;  %v4702_v60 = vld [vmem:[%s4933_s29 + $0x98] ss:$24 sps:$4 sm:$0xff]   ;;  %v4706_v63 = vld [vmem:[%s4933_s29 + $0xd4] ss:$24 sps:$4 sm:$0xff]  }
 0x2ca   : > { %2744 = vmatprep.mubr.bf16.mxu0 %v4644_v0  ;;  %2808 = vmatprep.mubr.bf16.mxu1 %v4646_v1  ;;  %v4708_v0 = vld [vmem:[%s4933_s29 + $0xc8] ss:$24 sps:$4 sm:$0xff]  }
 0x2cb   : > { %4018 = vmatpush3.bf16.msra.mxu1 %v2179_v2  ;;  %4130 = vmatpush3.bf16.msra.mxu0 %v2195_v3  ;;  %v4709_v1 = vld [vmem:[%s4933_s29 + $0xd0] ss:$24 sps:$4 sm:$0xff]   ;;  %v4710_v2 = vld [vmem:[%s4933_s29 + $0xfc] ss:$24 sps:$4 sm:$0xff]  }
 0x2cc   : > { %4019 = vmatprep.subr.bf16.mxu1 %v2188_v4  ;;  %4131 = vmatprep.subr.bf16.mxu0 %v2204_v5  ;;  %v4712_v3 = vld [vmem:[%s4933_s29 + $0x104] ss:$24 sps:$4 sm:$0xff]   ;;  %v4714_v4 = vld [vmem:[%s4933_s29 + $0xf8] ss:$24 sps:$4 sm:$0xff]  }
 0x2cd   : > { %v4715_v5 = vld [vmem:[%s4933_s29 + $0x100] ss:$24 sps:$4 sm:$0xff]  }
 0x2cf   : > { %4020 = vmatpush3.bf16.msra.mxu1 %v2180_v8  ;;  %4132 = vmatpush3.bf16.msra.mxu0 %v2196_v10  ;;  %v4720_v8 = vld [vmem:[%s4933_s29 + $0x128] ss:$24 sps:$4 sm:$0xff]   ;;  %v4722_v10 = vld [vmem:[%s4933_s29 + $0x15c] ss:$24 sps:$4 sm:$0xff]  }
 0x2d0   : > { %4021 = vmatprep.subr.bf16.mxu1 %v2189_v11  ;;  %4133 = vmatprep.subr.bf16.mxu0 %v2205_v12  ;;  %v4724_v11 = vld [vmem:[%s4933_s29 + $0x164] ss:$24 sps:$4 sm:$0xff]   ;;  %v4726_v12 = vld [vmem:[%s4933_s29 + $0x158] ss:$24 sps:$4 sm:$0xff]  }
 0x2d1   : > { %2745 = vmatmul.mubr.bf16.gmra.mrb[8].mxu0 %v4648_v6  ;;  %2809 = vmatmul.mubr.bf16.gmra.mrb[8].mxu1 %v4649_v7  ;;  %v4716_v6 = vld [vmem:[%s4933_s29 + $0x12c] ss:$24 sps:$4 sm:$0xff]  }
 0x2d2   : > { %2752 = vmatprep.mubr.bf16.mxu0 %v4650_v9  ;;  %2816 = vmatprep.mubr.bf16.mxu1 %v4652_v13  ;;  %v4718_v7 = vld [vmem:[%s4933_s29 + $0x134] ss:$24 sps:$4 sm:$0xff]   ;;  %v4721_v9 = vld [vmem:[%s4933_s29 + $0x130] ss:$24 sps:$4 sm:$0xff]   ;;  %v4727_v13 = vld [vmem:[%s4933_s29 + $0x160] ss:$24 sps:$4 sm:$0xff]  }
 0x2d3   : > { %4022 = vmatpush3.bf16.msra.mxu1 %v2181_v14  ;;  %4134 = vmatpush3.bf16.msra.mxu0 %v2197_v15  ;;  %v4728_v14 = vld [vmem:[%s4933_s29 + $0x18c] ss:$24 sps:$4 sm:$0xff]  }
 0x2d4   : > { %4023 = vmatprep.subr.bf16.mxu1 %v2190_v16  ;;  %4135 = vmatprep.subr.bf16.mxu0 %v2206_v17  ;;  %v4730_v15 = vld [vmem:[%s4933_s29 + $0x194] ss:$24 sps:$4 sm:$0xff]   ;;  %v4732_v16 = vld [vmem:[%s4933_s29 + $0x188] ss:$24 sps:$4 sm:$0xff]  }
 0x2d5   : > { %v4733_v17 = vld [vmem:[%s4933_s29 + $0x190] ss:$24 sps:$4 sm:$0xff]  }
 0x2d7   : > { %4024 = vmatpush3.bf16.msra.mxu1 %v2182_v20  ;;  %4136 = vmatpush3.bf16.msra.mxu0 %v2198_v22  ;;  %v4738_v20 = vld [vmem:[%s4933_s29 + $0x1b8] ss:$24 sps:$4 sm:$0xff]   ;;  %v4740_v22 = vld [vmem:[%s4933_s29 + $0x1ec] ss:$24 sps:$4 sm:$0xff]  }
 0x2d8   : > { %4025 = vmatprep.subr.bf16.mxu1 %v2191_v23  ;;  %4137 = vmatprep.subr.bf16.mxu0 %v2207_v34  ;;  %v4742_v23 = vld [vmem:[%s4933_s29 + $0x1f4] ss:$24 sps:$4 sm:$0xff]   ;;  %v4744_v34 = vld [vmem:[%s4933_s29 + $0x1e8] ss:$24 sps:$4 sm:$0xff]  }
 0x2d9   : > { %2753 = vmatmul.mubr.bf16.gmra.mrb[12].mxu0 %v4654_v18  ;;  %2817 = vmatmul.mubr.bf16.gmra.mrb[12].mxu1 %v4655_v19  ;;  %v4734_v18 = vld [vmem:[%s4933_s29 + $0x1bc] ss:$24 sps:$4 sm:$0xff]  }
 0x2da   : > { %2760 = vmatprep.mubr.bf16.mxu0 %v4656_v21  ;;  %2824 = vmatprep.mubr.bf16.mxu1 %v4658_v24  ;;  %v4736_v19 = vld [vmem:[%s4933_s29 + $0x1c4] ss:$24 sps:$4 sm:$0xff]   ;;  %v4739_v21 = vld [vmem:[%s4933_s29 + $0x1c0] ss:$24 sps:$4 sm:$0xff]   ;;  %v4745_v24 = vld [vmem:[%s4933_s29 + $0x1f0] ss:$24 sps:$4 sm:$0xff]  }
 0x2db   : > { %4026 = vmatpush3.bf16.msra.mxu1 %v2183_v25  ;;  %4138 = vmatpush3.bf16.msra.mxu0 %v2199_v26  ;;  %v4746_v25 = vld [vmem:[%s4933_s29 + $0x21c] ss:$24 sps:$4 sm:$0xff]  }
 0x2dc   : > { %4027 = vmatprep.subr.bf16.mxu1 %v2192_v27  ;;  %4139 = vmatprep.subr.bf16.mxu0 %v2208_v28  ;;  %v4748_v26 = vld [vmem:[%s4933_s29 + $0x224] ss:$24 sps:$4 sm:$0xff]   ;;  %v4750_v27 = vld [vmem:[%s4933_s29 + $0x218] ss:$24 sps:$4 sm:$0xff]  }
 0x2dd   : > { %v4751_v28 = vld [vmem:[%s4933_s29 + $0x220] ss:$24 sps:$4 sm:$0xff]  }
 0x2df   : > { %4028 = vmatpush3.bf16.msra.mxu1 %v2184_v31  ;;  %4140 = vmatpush3.bf16.msra.mxu0 %v2200_v32  ;;  %v4756_v31 = vld [vmem:[%s4933_s29 + $0x248] ss:$24 sps:$4 sm:$0xff]  }
 0x2e0   : > { %v4757_v32 = vld [vmem:[%s4933_s29 + $0x250] ss:$24 sps:$4 sm:$0xff]  }
 0x2e1   : > { %2761 = vmatmul.mubr.bf16.gmra.mrb[16].mxu0 %v4660_v29  ;;  %2825 = vmatmul.mubr.bf16.gmra.mrb[16].mxu1 %v4661_v30  ;;  %v4752_v29 = vld [vmem:[%s4933_s29 + $0x24c] ss:$24 sps:$4 sm:$0xff]  }
 0x2e2   : > { %2768 = vmatprep.mubr.bf16.mxu0 %v4662_v33  ;;  %2832 = vmatprep.mubr.bf16.mxu1 %v4664_v35  ;;  %v4754_v30 = vld [vmem:[%s4933_s29 + $0x254] ss:$24 sps:$4 sm:$0xff]   ;;  %v4760_v35 = vld [vmem:[%s4933_s29 + $0x284] ss:$24 sps:$4 sm:$0xff]  }
 0x2e3   : > { %v4758_v33 = vld [vmem:[%s4933_s29 + $0x27c] ss:$24 sps:$4 sm:$0xff]  }
 0x2e9   : > { %2769 = vmatmul.mubr.bf16.gmra.mrb[20].mxu0 %v4666_v36  ;;  %2833 = vmatmul.mubr.bf16.gmra.mrb[20].mxu1 %v4667_v37  ;;  %v4762_v36 = vld [vmem:[%s4933_s29 + $0x278] ss:$24 sps:$4 sm:$0xff]  }
 0x2ea   : > { %2776 = vmatprep.mubr.bf16.mxu0 %v4668_v38  ;;  %2840 = vmatprep.mubr.bf16.mxu1 %v4670_v39  ;;  %v4763_v37 = vld [vmem:[%s4933_s29 + $0x280] ss:$24 sps:$4 sm:$0xff]   ;;  %v4764_v38 = vld [vmem:[%s4933_s29 + $0x2ac] ss:$24 sps:$4 sm:$0xff]  }
 0x2eb   : > { %v4766_v39 = vld [vmem:[%s4933_s29 + $0x2b4] ss:$24 sps:$4 sm:$0xff]  }
 0x2f1   : > { %2777 = vmatmul.mubr.bf16.gmra.mrb[24].mxu0 %v4672_v40  ;;  %2841 = vmatmul.mubr.bf16.gmra.mrb[24].mxu1 %v4673_v41  ;;  %v4768_v40 = vld [vmem:[%s4933_s29 + $0x2a8] ss:$24 sps:$4 sm:$0xff]  }
 0x2f2   : > { %2784 = vmatprep.mubr.bf16.mxu0 %v4674_v42  ;;  %2848 = vmatprep.mubr.bf16.mxu1 %v4676_v43  ;;  %v4769_v41 = vld [vmem:[%s4933_s29 + $0x2b0] ss:$24 sps:$4 sm:$0xff]   ;;  %v4770_v42 = vld [vmem:[%s4933_s29 + $0x2dc] ss:$24 sps:$4 sm:$0xff]  }
 0x2f3   : > { %v4772_v43 = vld [vmem:[%s4933_s29 + $0x2e4] ss:$24 sps:$4 sm:$0xff]  }
 0x2f9   : > { %2785 = vmatmul.mubr.bf16.gmra.mrb[28].mxu0 %v4678_v44  ;;  %2849 = vmatmul.mubr.bf16.gmra.mrb[28].mxu1 %v4679_v45  ;;  %v4774_v44 = vld [vmem:[%s4933_s29 + $0x2d8] ss:$24 sps:$4 sm:$0xff]  }
 0x2fa   : > { %2889 = vmatprep.mubr.bf16.mxu1 %v4682_v46  ;;  %3050 = vmatprep.mubr.bf16.mxu0 %v4685_v47  ;;  %v4775_v45 = vld [vmem:[%s4933_s29 + $0x2e0] ss:$24 sps:$4 sm:$0xff]  }
 0x301   : > { %2890 = vmatmul.mubr.bf16.vlgmr.msra.gmra.mrb[32].mxu1 %v4680_v48  ;;  %3051 = vmatmul.mubr.bf16.vlgmr.msra.gmra.mrb[32].mxu0 %v4683_v49 }
 0x302   : > { %2897 = vmatprep.mubr.bf16.mxu1 %v4686_v50  ;;  %3058 = vmatprep.mubr.bf16.mxu0 %v4688_v51 }
 0x309   : > { %2898 = vmatmul.mubr.bf16.gmra.mrb[36].mxu1 %v4690_v52  ;;  %3059 = vmatmul.mubr.bf16.gmra.mrb[36].mxu0 %v4691_v53 }
 0x30a   : > { %2905 = vmatprep.mubr.bf16.mxu1 %v4692_v54  ;;  %3066 = vmatprep.mubr.bf16.mxu0 %v4694_v55 }
 0x311   : > { %2906 = vmatmul.mubr.bf16.gmra.mrb[40].mxu1 %v4696_v56  ;;  %3067 = vmatmul.mubr.bf16.gmra.mrb[40].mxu0 %v4697_v57 }
 0x312   : > { %2913 = vmatprep.mubr.bf16.mxu1 %v4698_v58  ;;  %3074 = vmatprep.mubr.bf16.mxu0 %v4700_v59 }
 0x319   : > { %2914 = vmatmul.mubr.bf16.gmra.mrb[44].mxu1 %v4702_v60  ;;  %3075 = vmatmul.mubr.bf16.gmra.mrb[44].mxu0 %v4703_v61 }
 0x31a   : > { %2921 = vmatprep.mubr.bf16.mxu1 %v4704_v62  ;;  %3082 = vmatprep.mubr.bf16.mxu0 %v4706_v63 }
 0x321   : > { %2922 = vmatmul.mubr.bf16.gmra.mrb[48].mxu1 %v4708_v0  ;;  %3083 = vmatmul.mubr.bf16.gmra.mrb[48].mxu0 %v4709_v1 }
 0x322   : > { %2929 = vmatprep.mubr.bf16.mxu1 %v4710_v2  ;;  %3090 = vmatprep.mubr.bf16.mxu0 %v4712_v3 }
 0x329   : > { %2930 = vmatmul.mubr.bf16.gmra.mrb[52].mxu1 %v4714_v4  ;;  %3091 = vmatmul.mubr.bf16.gmra.mrb[52].mxu0 %v4715_v5 }
 0x32a   : > { %2937 = vmatprep.mubr.bf16.mxu1 %v4716_v6  ;;  %3098 = vmatprep.mubr.bf16.mxu0 %v4718_v7 }
 0x331   : > { %2938 = vmatmul.mubr.bf16.gmra.mrb[56].mxu1 %v4720_v8  ;;  %3099 = vmatmul.mubr.bf16.gmra.mrb[56].mxu0 %v4721_v9 }
 0x332   : > { %2945 = vmatprep.mubr.bf16.mxu1 %v4722_v10  ;;  %3106 = vmatprep.mubr.bf16.mxu0 %v4724_v11 }
 0x339   : > { %2946 = vmatmul.mubr.bf16.gmra.mrb[60].mxu1 %v4726_v12  ;;  %3107 = vmatmul.mubr.bf16.gmra.mrb[60].mxu0 %v4727_v13 }
 0x33a   : > { %2953 = vmatprep.mubr.bf16.mxu1 %v4728_v14  ;;  %3114 = vmatprep.mubr.bf16.mxu0 %v4730_v15 }
 0x341   : > { %2954 = vmatmul.mubr.bf16.gmra.mrb[64].mxu1 %v4732_v16  ;;  %3115 = vmatmul.mubr.bf16.gmra.mrb[64].mxu0 %v4733_v17 }
 0x342   : > { %2961 = vmatprep.mubr.bf16.mxu1 %v4734_v18  ;;  %3122 = vmatprep.mubr.bf16.mxu0 %v4736_v19 }
 0x349   : > { %2962 = vmatmul.mubr.bf16.gmra.mrb[68].mxu1 %v4738_v20  ;;  %3123 = vmatmul.mubr.bf16.gmra.mrb[68].mxu0 %v4739_v21 }
 0x34a   : > { %2969 = vmatprep.mubr.bf16.mxu1 %v4740_v22  ;;  %3130 = vmatprep.mubr.bf16.mxu0 %v4742_v23 }
 0x351   : > { %2970 = vmatmul.mubr.bf16.gmra.mrb[72].mxu1 %v4744_v34  ;;  %3131 = vmatmul.mubr.bf16.gmra.mrb[72].mxu0 %v4745_v24 }
 0x352   : > { %2977 = vmatprep.mubr.bf16.mxu1 %v4746_v25  ;;  %3138 = vmatprep.mubr.bf16.mxu0 %v4748_v26 }
 0x359   : > { %2978 = vmatmul.mubr.bf16.gmra.mrb[76].mxu1 %v4750_v27  ;;  %3139 = vmatmul.mubr.bf16.gmra.mrb[76].mxu0 %v4751_v28 }
 0x35a   : > { %2985 = vmatprep.mubr.bf16.mxu1 %v4752_v29  ;;  %3146 = vmatprep.mubr.bf16.mxu0 %v4754_v30 }
 0x361   : > { %2986 = vmatmul.mubr.bf16.gmra.mrb[80].mxu1 %v4756_v31  ;;  %3147 = vmatmul.mubr.bf16.gmra.mrb[80].mxu0 %v4757_v32 }
 0x362   : > { %2993 = vmatprep.mubr.bf16.mxu1 %v4758_v33  ;;  %3154 = vmatprep.mubr.bf16.mxu0 %v4760_v35 }
 0x369   : > { %2994 = vmatmul.mubr.bf16.gmra.mrb[84].mxu1 %v4762_v36  ;;  %3155 = vmatmul.mubr.bf16.gmra.mrb[84].mxu0 %v4763_v37 }
 0x36a   : > { %3001 = vmatprep.mubr.bf16.mxu1 %v4764_v38  ;;  %3162 = vmatprep.mubr.bf16.mxu0 %v4766_v39 }
 0x371   : > { %3002 = vmatmul.mubr.bf16.gmra.mrb[88].mxu1 %v4768_v40  ;;  %3163 = vmatmul.mubr.bf16.gmra.mrb[88].mxu0 %v4769_v41 }
 0x372   : > { %3009 = vmatprep.mubr.bf16.mxu1 %v4770_v42  ;;  %3170 = vmatprep.mubr.bf16.mxu0 %v4772_v43 }
 0x379   : > { %3010 = vmatmul.mubr.bf16.gmra.mrb[92].mxu1 %v4774_v44  ;;  %3171 = vmatmul.mubr.bf16.gmra.mrb[92].mxu0 %v4775_v45 }
 0x394   : > { %v3917_v46 = vpop.f32.mrb[0].mxu0  ;;  %v3965_v47 = vpop.f32.mrb[0].mxu1 }
 0x395   : > { %v3918_v48 = vpop.f32.mrb[1].mxu0  ;;  %v3966_v49 = vpop.f32.mrb[1].mxu1 }
 0x396   : > { %v5534_v50 = vadd.f32 %v3918_v48, %v3917_v46  ;;  %v5536_v51 = vadd.f32 %v3966_v49, %v3965_v47  ;;  %v3920_v52 = vpop.f32.mrb[2].mxu0  ;;  %v3968_v53 = vpop.f32.mrb[2].mxu1 }
 0x397   : > { %v3921_v54 = vpop.f32.mrb[3].mxu0  ;;  %v3969_v55 = vpop.f32.mrb[3].mxu1 }
 0x398   : > { %v5538_v56 = vadd.f32 %v3921_v54, %v3920_v52  ;;  %v5540_v57 = vadd.f32 %v3969_v55, %v3968_v53 }
 0x39c   : > { %v3923_v58 = vpop.f32.mrb[4].mxu0  ;;  %v3971_v59 = vpop.f32.mrb[4].mxu1 }
 0x39d   : > { %v3924_v60 = vpop.f32.mrb[5].mxu0  ;;  %v3972_v61 = vpop.f32.mrb[5].mxu1 }
 0x39e   : > { %v5542_v62 = vadd.f32 %v3924_v60, %v3923_v58  ;;  %v5544_v63 = vadd.f32 %v3972_v61, %v3971_v59  ;;  %v3926_v0 = vpop.f32.mrb[6].mxu0  ;;  %v3974_v1 = vpop.f32.mrb[6].mxu1 }
 0x39f   : > { %v3927_v2 = vpop.f32.mrb[7].mxu0  ;;  %v3975_v3 = vpop.f32.mrb[7].mxu1 }
 0x3a0   : > { %v5546_v4 = vadd.f32 %v3927_v2, %v3926_v0  ;;  %v5548_v5 = vadd.f32 %v3975_v3, %v3974_v1 }
 0x3a4   : > { %v3929_v6 = vpop.f32.mrb[8].mxu0  ;;  %v3977_v7 = vpop.f32.mrb[8].mxu1 }
 0x3a5   : > { %v3930_v8 = vpop.f32.mrb[9].mxu0  ;;  %v3978_v9 = vpop.f32.mrb[9].mxu1 }
 0x3a6   : > { %v5550_v10 = vadd.f32 %v3930_v8, %v3929_v6  ;;  %v5552_v11 = vadd.f32 %v3978_v9, %v3977_v7  ;;  %v3932_v12 = vpop.f32.mrb[10].mxu0  ;;  %v3980_v13 = vpop.f32.mrb[10].mxu1 }
 0x3a7   : > { %v3933_v14 = vpop.f32.mrb[11].mxu0  ;;  %v3981_v15 = vpop.f32.mrb[11].mxu1 }
 0x3a8   : > { %v5554_v16 = vadd.f32 %v3933_v14, %v3932_v12  ;;  %v5556_v17 = vadd.f32 %v3981_v15, %v3980_v13 }
 0x3ac   : > { %v3935_v18 = vpop.f32.mrb[12].mxu0  ;;  %v3983_v19 = vpop.f32.mrb[12].mxu1 }
 0x3ad   : > { %v3936_v20 = vpop.f32.mrb[13].mxu0  ;;  %v3984_v21 = vpop.f32.mrb[13].mxu1 }
 0x3ae   : > { %v5558_v22 = vadd.f32 %v3936_v20, %v3935_v18  ;;  %v5560_v23 = vadd.f32 %v3984_v21, %v3983_v19  ;;  %v3938_v34 = vpop.f32.mrb[14].mxu0  ;;  %v3986_v24 = vpop.f32.mrb[14].mxu1 }
 0x3af   : > { %v3939_v25 = vpop.f32.mrb[15].mxu0  ;;  %v3987_v26 = vpop.f32.mrb[15].mxu1 }
 0x3b0   : > { %v5562_v27 = vadd.f32 %v3939_v25, %v3938_v34  ;;  %v5564_v28 = vadd.f32 %v3987_v26, %v3986_v24 }
 0x3b4   : > { %v3941_v29 = vpop.f32.mrb[16].mxu0  ;;  %v3989_v30 = vpop.f32.mrb[16].mxu1 }
 0x3b5   : > { %v3942_v31 = vpop.f32.mrb[17].mxu0  ;;  %v3990_v32 = vpop.f32.mrb[17].mxu1 }
 0x3b6   : > { %v5566_v33 = vadd.f32 %v3942_v31, %v3941_v29  ;;  %v5568_v35 = vadd.f32 %v3990_v32, %v3989_v30  ;;  %v3944_v36 = vpop.f32.mrb[18].mxu0  ;;  %v3992_v37 = vpop.f32.mrb[18].mxu1  ;;  %v5603_v29 = vld [vmem:[%s384_s22] ss:$0 sm:$0xff]  ;;  %s3732_s22 = sshll.u32 (!%p3731_p12), %s3232_s18, 3 }
 0x3b7   : > { %v3945_v38 = vpop.f32.mrb[19].mxu0  ;;  %v3993_v39 = vpop.f32.mrb[19].mxu1  ;;  %s3235_s20 = scalar_lea.vmem (!%p3731_p12), [#allocation2], %s3732_s22 }
 0x3b8   : > { %v5570_v40 = vadd.f32 %v3945_v38, %v3944_v36  ;;  %v5572_v41 = vadd.f32 %v3993_v39, %v3992_v37  ;;  %v2731_v37 = vadd.f32 %v5534_v50, %v5603_v29 }
 0x3bc   : > { %v3947_v42 = vpop.f32.mrb[20].mxu0  ;;  %v3995_v43 = vpop.f32.mrb[20].mxu1 }
 0x3bd   : > { %v3948_v44 = vpop.f32.mrb[21].mxu0  ;;  %v3996_v45 = vpop.f32.mrb[21].mxu1 }
 0x3be   : > { %v5574_v46 = vadd.f32 %v3948_v44, %v3947_v42  ;;  %v5576_v47 = vadd.f32 %v3996_v45, %v3995_v43  ;;  %v3950_v48 = vpop.f32.mrb[22].mxu0  ;;  %v3998_v49 = vpop.f32.mrb[22].mxu1 }
 0x3bf   : > { %v3951_v52 = vpop.f32.mrb[23].mxu0  ;;  %v3999_v53 = vpop.f32.mrb[23].mxu1 }
 0x3c0   : > { %v5578_v54 = vadd.f32 %v3951_v52, %v3950_v48  ;;  %v5580_v55 = vadd.f32 %v3999_v53, %v3998_v49  ;;  %v2734_v48 = vadd.f32 %v5538_v56, %v5603_v29 }
 0x3c4   : > { %v3953_v58 = vpop.f32.mrb[24].mxu0  ;;  %v4001_v59 = vpop.f32.mrb[24].mxu1 }
 0x3c5   : > { %v3954_v60 = vpop.f32.mrb[25].mxu0  ;;  %v4002_v61 = vpop.f32.mrb[25].mxu1 }
 0x3c6   : > { %v5582_v0 = vadd.f32 %v3954_v60, %v3953_v58  ;;  %v5584_v1 = vadd.f32 %v4002_v61, %v4001_v59  ;;  %v3956_v2 = vpop.f32.mrb[26].mxu0  ;;  %v4004_v3 = vpop.f32.mrb[26].mxu1 }
 0x3c7   : > { %v3957_v6 = vpop.f32.mrb[27].mxu0  ;;  %v4005_v7 = vpop.f32.mrb[27].mxu1 }
 0x3c8   : > { %v5586_v8 = vadd.f32 %v3957_v6, %v3956_v2  ;;  %v5588_v9 = vadd.f32 %v4005_v7, %v4004_v3  ;;  %v2739_v7 = vadd.f32 %v5542_v62, %v5603_v29 }
 0x3cc   : > { %v3959_v12 = vpop.f32.mrb[28].mxu0  ;;  %v4007_v13 = vpop.f32.mrb[28].mxu1 }
 0x3cd   : > { %v3960_v14 = vpop.f32.mrb[29].mxu0  ;;  %v4008_v15 = vpop.f32.mrb[29].mxu1 }
 0x3ce   : > { %v5590_v18 = vadd.f32 %v3960_v14, %v3959_v12  ;;  %v5592_v19 = vadd.f32 %v4008_v15, %v4007_v13  ;;  %v3962_v20 = vpop.f32.mrb[30].mxu0  ;;  %v4010_v21 = vpop.f32.mrb[30].mxu1 }
 0x3cf   : > { %v3963_v34 = vpop.f32.mrb[31].mxu0  ;;  %v4011_v24 = vpop.f32.mrb[31].mxu1 }
 0x3d0   : > { %v5594_v25 = vadd.f32 %v3963_v34, %v3962_v20  ;;  %v5596_v26 = vadd.f32 %v4011_v24, %v4010_v21  ;;  %v2742_v34 = vadd.f32 %v5546_v4, %v5603_v29 }
 0x3d4   : > { %v4029_v30 = vpop.f32.mrb[32].mxu1  ;;  %v4141_v31 = vpop.f32.mrb[32].mxu0 }
 0x3d5   : > { %v4030_v32 = vpop.f32.mrb[33].mxu1  ;;  %v4142_v36 = vpop.f32.mrb[33].mxu0 }
 0x3d6   : > { %v4031_v38 = vadd.f32 %v4030_v32, %v4029_v30  ;;  %v4143_v39 = vadd.f32 %v4142_v36, %v4141_v31  ;;  %v4032_v42 = vpop.f32.mrb[34].mxu1  ;;  %v4144_v43 = vpop.f32.mrb[34].mxu0 }
 0x3d7   : > { %v4033_v44 = vpop.f32.mrb[35].mxu1  ;;  %v4145_v45 = vpop.f32.mrb[35].mxu0 }
 0x3d8   : > { %v2892_v49 = vadd.f32 %v4031_v38, %v2731_v37  ;;  %v4034_v52 = vadd.f32 %v4033_v44, %v4032_v42  ;;  %v4146_v53 = vadd.f32 %v4145_v45, %v4144_v43  ;;  %v2747_v44 = vadd.f32 %v5550_v10, %v5603_v29 }
 0x3da   : > { %v5610_v58 = vadd.f32 %v4143_v39, %v2892_v49  ;;  %v2895_v59 = vadd.f32 %v4034_v52, %v2734_v48 }
 0x3dc   : > { %v3179_v60 = vmax.f32 %v5610_v58, 0.0  ;;  %v5613_v61 = vadd.f32 %v4146_v53, %v2895_v59  ;;  %v4035_v50 = vpop.f32.mrb[36].mxu1  ;;  %v4147_v2 = vpop.f32.mrb[36].mxu0 }
 0x3dd   : > { %v4036_v3 = vpop.f32.mrb[37].mxu1  ;;  %v4148_v6 = vpop.f32.mrb[37].mxu0 }
 0x3de   : > { %v3180_v12 = vmax.f32 %v5613_v61, 0.0  ;;  %v4037_v56 = vadd.f32 %v4036_v3, %v4035_v50  ;;  %v4149_v13 = vadd.f32 %v4148_v6, %v4147_v2  ;;  %v4038_v14 = vpop.f32.mrb[38].mxu1  ;;  %v4150_v15 = vpop.f32.mrb[38].mxu0  ;;  %v2750_v50 = vadd.f32 %v5554_v16, %v5603_v29 }
 0x3df   : > { %v4039_v20 = vpop.f32.mrb[39].mxu1  ;;  %v4151_v21 = vpop.f32.mrb[39].mxu0 }
 0x3e0   : > { %v2900_v24 = vadd.f32 %v4037_v56, %v2739_v7  ;;  %v4040_v30 = vadd.f32 %v4039_v20, %v4038_v14  ;;  %v4152_v31 = vadd.f32 %v4151_v21, %v4150_v15 }
 0x3e2   : > { %v5620_v32 = vadd.f32 %v4149_v13, %v2900_v24  ;;  %v2903_v36 = vadd.f32 %v4040_v30, %v2742_v34  ;;  %v2755_v34 = vadd.f32 %v5558_v22, %v5603_v29 }
 0x3e4   : > { %v3181_v37 = vmax.f32 %v5620_v32, 0.0  ;;  %v5623_v62 = vadd.f32 %v4152_v31, %v2903_v36  ;;  %v4041_v38 = vpop.f32.mrb[40].mxu1  ;;  %v4153_v39 = vpop.f32.mrb[40].mxu0 }
 0x3e5   : > { %v4042_v42 = vpop.f32.mrb[41].mxu1  ;;  %v4154_v43 = vpop.f32.mrb[41].mxu0 }
 0x3e6   : > { %v3182_v45 = vmax.f32 %v5623_v62, 0.0  ;;  %v4043_v4 = vadd.f32 %v4042_v42, %v4041_v38  ;;  %v4155_v48 = vadd.f32 %v4154_v43, %v4153_v39  ;;  %v4044_v49 = vpop.f32.mrb[42].mxu1  ;;  %v4156_v52 = vpop.f32.mrb[42].mxu0  ;;  %v2758_v42 = vadd.f32 %v5562_v27, %v5603_v29 }
 0x3e7   : > { %v4045_v53 = vpop.f32.mrb[43].mxu1  ;;  %v4157_v59 = vpop.f32.mrb[43].mxu0 }
 0x3e8   : > { %v2908_v2 = vadd.f32 %v4043_v4, %v2747_v44  ;;  %v4046_v3 = vadd.f32 %v4045_v53, %v4044_v49  ;;  %v4158_v6 = vadd.f32 %v4157_v59, %v4156_v52 }
 0x3ea   : > { %v5630_v7 = vadd.f32 %v4155_v48, %v2908_v2  ;;  %v2911_v56 = vadd.f32 %v4046_v3, %v2750_v50  ;;  %v2763_v3 = vadd.f32 %v5566_v33, %v5603_v29 }
 0x3ec   : > { %v3183_v13 = vmax.f32 %v5630_v7, 0.0  ;;  %v5633_v10 = vadd.f32 %v4158_v6, %v2911_v56  ;;  %v4047_v14 = vpop.f32.mrb[44].mxu1  ;;  %v4159_v15 = vpop.f32.mrb[44].mxu0 }
 0x3ed   : > { %v4048_v20 = vpop.f32.mrb[45].mxu1  ;;  %v4160_v21 = vpop.f32.mrb[45].mxu0 }
 0x3ee   : > { %v3184_v24 = vmax.f32 %v5633_v10, 0.0  ;;  %v4049_v16 = vadd.f32 %v4048_v20, %v4047_v14  ;;  %v4161_v30 = vadd.f32 %v4160_v21, %v4159_v15  ;;  %v4050_v31 = vpop.f32.mrb[46].mxu1  ;;  %v4162_v36 = vpop.f32.mrb[46].mxu0 }
 0x3ef   : > { %v4051_v38 = vpop.f32.mrb[47].mxu1  ;;  %v4163_v39 = vpop.f32.mrb[47].mxu0 }
 0x3f0   : > { %v2916_v43 = vadd.f32 %v4049_v16, %v2755_v34  ;;  %v4052_v44 = vadd.f32 %v4051_v38, %v4050_v31  ;;  %v4164_v4 = vadd.f32 %v4163_v39, %v4162_v36  ;;  %v2766_v34 = vadd.f32 %v5570_v40, %v5603_v29 }
 0x3f2   : > { %v5640_v48 = vadd.f32 %v4161_v30, %v2916_v43  ;;  %v2919_v49 = vadd.f32 %v4052_v44, %v2758_v42 }
 0x3f4   : > { %v3185_v52 = vmax.f32 %v5640_v48, 0.0  ;;  %v5643_v22 = vadd.f32 %v4164_v4, %v2919_v49  ;;  %v4053_v53 = vpop.f32.mrb[48].mxu1  ;;  %v4165_v59 = vpop.f32.mrb[48].mxu0  ;;  %v2771_v49 = vadd.f32 %v5574_v46, %v5603_v29 }
 0x3f5   : > { %v4054_v50 = vpop.f32.mrb[49].mxu1  ;;  %v4166_v2 = vpop.f32.mrb[49].mxu0 }
 0x3f6   : > { %v5961_v6 = vmax.f32 %v5643_v22, 0.0  ;;  %v4055_v27 = vadd.f32 %v4054_v50, %v4053_v53  ;;  %v4167_v56 = vadd.f32 %v4166_v2, %v4165_v59  ;;  %v4056_v14 = vpop.f32.mrb[50].mxu1  ;;  %v4168_v15 = vpop.f32.mrb[50].mxu0 }
 0x3f7   : > { %v4057_v20 = vpop.f32.mrb[51].mxu1  ;;  %v4169_v21 = vpop.f32.mrb[51].mxu0 }
 0x3f8   : > { %v2924_v16 = vadd.f32 %v4055_v27, %v2763_v3  ;;  %v4058_v30 = vadd.f32 %v4057_v20, %v4056_v14  ;;  %v4170_v31 = vadd.f32 %v4169_v21, %v4168_v15 }
 0x3fa   : > { %v5650_v36 = vadd.f32 %v4167_v56, %v2924_v16  ;;  %v2927_v38 = vadd.f32 %v4058_v30, %v2766_v34  ;;  %v2774_v56 = vadd.f32 %v5578_v54, %v5603_v29 }
 0x3fc   : > { %v5960_v39 = vmax.f32 %v5650_v36, 0.0  ;;  %v5653_v33 = vadd.f32 %v4170_v31, %v2927_v38  ;;  %v4059_v42 = vpop.f32.mrb[52].mxu1  ;;  %v4171_v43 = vpop.f32.mrb[52].mxu0 }
 0x3fd   : > { %v4060_v44 = vpop.f32.mrb[53].mxu1  ;;  %v4172_v4 = vpop.f32.mrb[53].mxu0 }
 0x3fe   : > { %v5958_v53 = vmax.f32 %v5653_v33, 0.0  ;;  %v4061_v40 = vadd.f32 %v4060_v44, %v4059_v42  ;;  %v4173_v59 = vadd.f32 %v4172_v4, %v4171_v43  ;;  %v4062_v50 = vpop.f32.mrb[54].mxu1  ;;  %v4174_v2 = vpop.f32.mrb[54].mxu0  ;;  %v2779_v43 = vadd.f32 %v5582_v0, %v5603_v29 }
 0x3ff   : > { %v4063_v3 = vpop.f32.mrb[55].mxu1  ;;  %v4175_v27 = vpop.f32.mrb[55].mxu0 }
 0x400   : > { %v2932_v14 = vadd.f32 %v4061_v40, %v2771_v49  ;;  %v4064_v15 = vadd.f32 %v4063_v3, %v4062_v50  ;;  %v4176_v20 = vadd.f32 %v4175_v27, %v4174_v2  ;;  %v2782_v2 = vadd.f32 %v5586_v8, %v5603_v29 }
 0x402   : > { %v5660_v21 = vadd.f32 %v4173_v59, %v2932_v14  ;;  %v2935_v34 = vadd.f32 %v4064_v15, %v2774_v56 }
 0x404   : > { %v5959_v16 = vmax.f32 %v5660_v21, 0.0  ;;  %v5663_v46 = vadd.f32 %v4176_v20, %v2935_v34  ;;  %v4065_v30 = vpop.f32.mrb[56].mxu1  ;;  %v4177_v31 = vpop.f32.mrb[56].mxu0 }
 0x405   : > { %v4066_v38 = vpop.f32.mrb[57].mxu1  ;;  %v4178_v42 = vpop.f32.mrb[57].mxu0 }
 0x406   : > { %v4067_v54 = vadd.f32 %v4066_v38, %v4065_v30  ;;  %v4179_v4 = vadd.f32 %v4178_v42, %v4177_v31  ;;  %v4068_v49 = vpop.f32.mrb[58].mxu1  ;;  %v4180_v40 = vpop.f32.mrb[58].mxu0  ;;  %v2787_v42 = vadd.f32 %v5590_v18, %v5603_v29 }
 0x407   : > { %v4069_v59 = vpop.f32.mrb[59].mxu1  ;;  %v4181_v50 = vpop.f32.mrb[59].mxu0 }
 0x408   : > { %v2940_v3 = vadd.f32 %v4067_v54, %v2779_v43  ;;  %v4070_v27 = vadd.f32 %v4069_v59, %v4068_v49  ;;  %v4182_v56 = vadd.f32 %v4181_v50, %v4180_v40  ;;  %v2790_v59 = vadd.f32 %v5594_v25, %v5603_v29 }
 0x40a   : > { %v5670_v14 = vadd.f32 %v4179_v4, %v2940_v3  ;;  %v2943_v15 = vadd.f32 %v4070_v27, %v2782_v2 }
 0x40c   : > { %v5673_v0 = vadd.f32 %v4182_v56, %v2943_v15  ;;  %v4071_v34 = vpop.f32.mrb[60].mxu1  ;;  %v4183_v30 = vpop.f32.mrb[60].mxu0 }
 0x40d   : > { %v4072_v31 = vpop.f32.mrb[61].mxu1  ;;  %v4184_v38 = vpop.f32.mrb[61].mxu0 }
 0x40e   : > { %v4073_v8 = vadd.f32 %v4072_v31, %v4071_v34  ;;  %v4185_v43 = vadd.f32 %v4184_v38, %v4183_v30  ;;  %v4074_v54 = vpop.f32.mrb[62].mxu1  ;;  %v4186_v49 = vpop.f32.mrb[62].mxu0  ;;  %v2795_v38 = vadd.f32 %v5536_v51, %v5603_v29 }
 0x40f   : > { %v4075_v4 = vpop.f32.mrb[63].mxu1  ;;  %v4187_v40 = vpop.f32.mrb[63].mxu0 }
 0x410   : > { %v2948_v50 = vadd.f32 %v4073_v8, %v2787_v42  ;;  %v4076_v2 = vadd.f32 %v4075_v4, %v4074_v54  ;;  %v4188_v3 = vadd.f32 %v4187_v40, %v4186_v49  ;;  %v2798_v4 = vadd.f32 %v5540_v57, %v5603_v29 }
 0x412   : > { %v5680_v27 = vadd.f32 %v4185_v43, %v2948_v50  ;;  %v2951_v56 = vadd.f32 %v4076_v2, %v2790_v59 }
 0x414   : > { %v5683_v18 = vadd.f32 %v4188_v3, %v2951_v56  ;;  %v4077_v44 = vpop.f32.mrb[64].mxu1  ;;  %v4189_v34 = vpop.f32.mrb[64].mxu0 }
 0x415   : > { %v4078_v30 = vpop.f32.mrb[65].mxu1  ;;  %v4190_v31 = vpop.f32.mrb[65].mxu0 }
 0x416   : > { %v4079_v25 = vadd.f32 %v4078_v30, %v4077_v44  ;;  %v4191_v42 = vadd.f32 %v4190_v31, %v4189_v34  ;;  %v4080_v8 = vpop.f32.mrb[66].mxu1  ;;  %v4192_v54 = vpop.f32.mrb[66].mxu0  ;;  %v2803_v31 = vadd.f32 %v5544_v63, %v5603_v29 }
 0x417   : > { %v4081_v43 = vpop.f32.mrb[67].mxu1  ;;  %v4193_v49 = vpop.f32.mrb[67].mxu0 }
 0x418   : > { %v2956_v40 = vadd.f32 %v4079_v25, %v2795_v38  ;;  %v4082_v59 = vadd.f32 %v4081_v43, %v4080_v8  ;;  %v4194_v50 = vadd.f32 %v4193_v49, %v4192_v54  ;;  %v2806_v43 = vadd.f32 %v5548_v5, %v5603_v29 }
 0x41a   : > { %v5690_v2 = vadd.f32 %v4191_v42, %v2956_v40  ;;  %v2959_v3 = vadd.f32 %v4082_v59, %v2798_v4 }
 0x41c   : > { %v5693_v51 = vadd.f32 %v4194_v50, %v2959_v3  ;;  %v4083_v20 = vpop.f32.mrb[68].mxu1  ;;  %v4195_v44 = vpop.f32.mrb[68].mxu0 }
 0x41d   : > { %v4084_v34 = vpop.f32.mrb[69].mxu1  ;;  %v4196_v30 = vpop.f32.mrb[69].mxu0 }
 0x41e   : > { %v4085_v57 = vadd.f32 %v4084_v34, %v4083_v20  ;;  %v4197_v38 = vadd.f32 %v4196_v30, %v4195_v44  ;;  %v4086_v25 = vpop.f32.mrb[70].mxu1  ;;  %v4198_v8 = vpop.f32.mrb[70].mxu0  ;;  %v2811_v30 = vadd.f32 %v5552_v11, %v5603_v29 }
 0x41f   : > { %v4087_v42 = vpop.f32.mrb[71].mxu1  ;;  %v4199_v54 = vpop.f32.mrb[71].mxu0 }
 0x420   : > { %v2964_v49 = vadd.f32 %v4085_v57, %v2803_v31  ;;  %v4088_v4 = vadd.f32 %v4087_v42, %v4086_v25  ;;  %v4200_v40 = vadd.f32 %v4199_v54, %v4198_v8  ;;  %v2814_v42 = vadd.f32 %v5556_v17, %v5603_v29 }
 0x422   : > { %v5700_v59 = vadd.f32 %v4197_v38, %v2964_v49  ;;  %v2967_v50 = vadd.f32 %v4088_v4, %v2806_v43 }
 0x424   : > { %v5703_v63 = vadd.f32 %v4200_v40, %v2967_v50  ;;  %v4089_v15 = vpop.f32.mrb[72].mxu1  ;;  %v4201_v20 = vpop.f32.mrb[72].mxu0 }
 0x425   : > { %v4090_v44 = vpop.f32.mrb[73].mxu1  ;;  %v4202_v34 = vpop.f32.mrb[73].mxu0 }
 0x426   : > { %v4091_v5 = vadd.f32 %v4090_v44, %v4089_v15  ;;  %v4203_v31 = vadd.f32 %v4202_v34, %v4201_v20  ;;  %v4092_v57 = vpop.f32.mrb[74].mxu1  ;;  %v4204_v25 = vpop.f32.mrb[74].mxu0  ;;  %v2819_v34 = vadd.f32 %v5560_v23, %v5603_v29 }
 0x427   : > { %v4093_v38 = vpop.f32.mrb[75].mxu1  ;;  %v4205_v8 = vpop.f32.mrb[75].mxu0 }
 0x428   : > { %v2972_v54 = vadd.f32 %v4091_v5, %v2811_v30  ;;  %v4094_v43 = vadd.f32 %v4093_v38, %v4092_v57  ;;  %v4206_v49 = vadd.f32 %v4205_v8, %v4204_v25  ;;  %v2822_v38 = vadd.f32 %v5564_v28, %v5603_v29 }
 0x42a   : > { %v5710_v4 = vadd.f32 %v4203_v31, %v2972_v54  ;;  %v2975_v40 = vadd.f32 %v4094_v43, %v2814_v42 }
 0x42c   : > { %v5713_v11 = vadd.f32 %v4206_v49, %v2975_v40  ;;  %v4095_v56 = vpop.f32.mrb[76].mxu1  ;;  %v4207_v15 = vpop.f32.mrb[76].mxu0 }
 0x42d   : > { %v4096_v20 = vpop.f32.mrb[77].mxu1  ;;  %v4208_v44 = vpop.f32.mrb[77].mxu0 }
 0x42e   : > { %v4097_v17 = vadd.f32 %v4096_v20, %v4095_v56  ;;  %v4209_v30 = vadd.f32 %v4208_v44, %v4207_v15  ;;  %v4098_v5 = vpop.f32.mrb[78].mxu1  ;;  %v4210_v57 = vpop.f32.mrb[78].mxu0  ;;  %v2827_v44 = vadd.f32 %v5568_v35, %v5603_v29 }
 0x42f   : > { %v4099_v31 = vpop.f32.mrb[79].mxu1  ;;  %v4211_v25 = vpop.f32.mrb[79].mxu0 }
 0x430   : > { %v2980_v8 = vadd.f32 %v4097_v17, %v2819_v34  ;;  %v4100_v42 = vadd.f32 %v4099_v31, %v4098_v5  ;;  %v4212_v54 = vadd.f32 %v4211_v25, %v4210_v57  ;;  %v2830_v31 = vadd.f32 %v5572_v41, %v5603_v29 }
 0x432   : > { %v5720_v43 = vadd.f32 %v4209_v30, %v2980_v8  ;;  %v2983_v49 = vadd.f32 %v4100_v42, %v2822_v38 }
 0x434   : > { %v5723_v23 = vadd.f32 %v4212_v54, %v2983_v49  ;;  %v4101_v3 = vpop.f32.mrb[80].mxu1  ;;  %v4213_v56 = vpop.f32.mrb[80].mxu0 }
 0x435   : > { %v4102_v15 = vpop.f32.mrb[81].mxu1  ;;  %v4214_v20 = vpop.f32.mrb[81].mxu0 }
 0x436   : > { %v4103_v28 = vadd.f32 %v4102_v15, %v4101_v3  ;;  %v4215_v34 = vadd.f32 %v4214_v20, %v4213_v56  ;;  %v4104_v17 = vpop.f32.mrb[82].mxu1  ;;  %v4216_v5 = vpop.f32.mrb[82].mxu0  ;;  %v2835_v20 = vadd.f32 %v5576_v47, %v5603_v29 }
 0x437   : > { %v4105_v30 = vpop.f32.mrb[83].mxu1  ;;  %v4217_v57 = vpop.f32.mrb[83].mxu0 }
 0x438   : > { %v2988_v25 = vadd.f32 %v4103_v28, %v2827_v44  ;;  %v4106_v38 = vadd.f32 %v4105_v30, %v4104_v17  ;;  %v4218_v8 = vadd.f32 %v4217_v57, %v4216_v5  ;;  %v2838_v30 = vadd.f32 %v5580_v55, %v5603_v29 }
 0x43a   : > { %v5730_v42 = vadd.f32 %v4215_v34, %v2988_v25  ;;  %v2991_v54 = vadd.f32 %v4106_v38, %v2830_v31 }
 0x43c   : > { %v5733_v35 = vadd.f32 %v4218_v8, %v2991_v54  ;;  %v4107_v50 = vpop.f32.mrb[84].mxu1  ;;  %v4219_v3 = vpop.f32.mrb[84].mxu0 }
 0x43d   : > { %v4108_v56 = vpop.f32.mrb[85].mxu1  ;;  %v4220_v15 = vpop.f32.mrb[85].mxu0 }
 0x43e   : > { %v4109_v41 = vadd.f32 %v4108_v56, %v4107_v50  ;;  %v4221_v44 = vadd.f32 %v4220_v15, %v4219_v3  ;;  %v4110_v28 = vpop.f32.mrb[86].mxu1  ;;  %v4222_v17 = vpop.f32.mrb[86].mxu0  ;;  %v2843_v15 = vadd.f32 %v5584_v1, %v5603_v29 }
 0x43f   : > { %v4111_v34 = vpop.f32.mrb[87].mxu1  ;;  %v4223_v5 = vpop.f32.mrb[87].mxu0 }
 0x440   : > { %v2996_v57 = vadd.f32 %v4109_v41, %v2835_v20  ;;  %v4112_v31 = vadd.f32 %v4111_v34, %v4110_v28  ;;  %v4224_v25 = vadd.f32 %v4223_v5, %v4222_v17  ;;  %v2846_v34 = vadd.f32 %v5588_v9, %v5603_v29 }
 0x442   : > { %v5740_v38 = vadd.f32 %v4221_v44, %v2996_v57  ;;  %v2999_v8 = vadd.f32 %v4112_v31, %v2838_v30 }
 0x444   : > { %v5743_v47 = vadd.f32 %v4224_v25, %v2999_v8  ;;  %v4113_v40 = vpop.f32.mrb[88].mxu1  ;;  %v4225_v50 = vpop.f32.mrb[88].mxu0 }
 0x445   : > { %v4114_v3 = vpop.f32.mrb[89].mxu1  ;;  %v4226_v56 = vpop.f32.mrb[89].mxu0 }
 0x446   : > { %v4115_v55 = vadd.f32 %v4114_v3, %v4113_v40  ;;  %v4227_v20 = vadd.f32 %v4226_v56, %v4225_v50  ;;  %v4116_v41 = vpop.f32.mrb[90].mxu1  ;;  %v4228_v28 = vpop.f32.mrb[90].mxu0  ;;  %v2851_v56 = vadd.f32 %v5592_v19, %v5603_v29 }
 0x447   : > { %v4117_v44 = vpop.f32.mrb[91].mxu1  ;;  %v4229_v17 = vpop.f32.mrb[91].mxu0 }
 0x448   : > { %v3004_v5 = vadd.f32 %v4115_v55, %v2843_v15  ;;  %v4118_v30 = vadd.f32 %v4117_v44, %v4116_v41  ;;  %v4230_v57 = vadd.f32 %v4229_v17, %v4228_v28  ;;  %v2854_v44 = vadd.f32 %v5596_v26, %v5603_v29 }
 0x449   : > { %v3216_v26 = vpack.c.bf16 (!%p3731_p12), %v3180_v12, %v3179_v60  ;;  %v3217_v29 = vpack.c.bf16 (!%p3731_p12), %v3182_v45, %v3181_v37 }
 0x44a   : > { %v5750_v31 = vadd.f32 %v4227_v20, %v3004_v5  ;;  %v3007_v25 = vadd.f32 %v4118_v30, %v2846_v34 }
 0x44b   : > { %3236 = vst [vmem:[%s3235_s20] sm:$0xff] (!%p3731_p12), %v3216_v26  ;;  %3237 = vst [vmem:[%s3235_s20 + $0x8] sm:$0xff] (!%p3731_p12), %v3217_v29 }
 0x44c   : > { %v3207_v8 = vmax.f32 %v5750_v31, 0.0  ;;  %v5753_v1 = vadd.f32 %v4230_v57, %v3007_v25  ;;  %v4119_v49 = vpop.f32.mrb[92].mxu1  ;;  %v4231_v40 = vpop.f32.mrb[92].mxu0 }
 0x44d   : > { %v4120_v50 = vpop.f32.mrb[93].mxu1  ;;  %v4232_v3 = vpop.f32.mrb[93].mxu0 }
 0x44e   : > { %v3208_v54 = vmax.f32 %v5753_v1, 0.0  ;;  %v4121_v9 = vadd.f32 %v4120_v50, %v4119_v49  ;;  %v4233_v15 = vadd.f32 %v4232_v3, %v4231_v40  ;;  %v4122_v55 = vpop.f32.mrb[94].mxu1  ;;  %v4234_v41 = vpop.f32.mrb[94].mxu0  ;;  %v3218_v40 = vpack.c.bf16 (!%p3731_p12), %v3184_v24, %v3183_v13 }
 0x44f   : > { %v4123_v20 = vpop.f32.mrb[95].mxu1  ;;  %v4235_v28 = vpop.f32.mrb[95].mxu0  ;;  %v3219_v50 = vpack.c.bf16 (!%p3731_p12), %v5961_v6, %v3185_v52  ;;  %v3220_v3 = vpack.c.bf16 (!%p3731_p12), %v5958_v53, %v5960_v39  ;;  %v5972_v53 = vmax.f32 (!%p3731_p12), %v5703_v63, 0.0  ;;  %v5974_v39 = vmax.f32 (!%p3731_p12), %v5713_v11, 0.0 }
 0x450   : > { %v3012_v17 = vadd.f32 %v4121_v9, %v2851_v56  ;;  %v4124_v34 = vadd.f32 %v4123_v20, %v4122_v55  ;;  %v4236_v5 = vadd.f32 %v4235_v28, %v4234_v41  ;;  %3215 = sbr.rel (%p3731_p12) target bundleno = 1116 (0x45c), region = 68  ;;  %v5964_v56 = vmax.f32 (!%p3731_p12), %v5663_v46, 0.0  ;;  %3238 = vst [vmem:[%s3235_s20 + $0x10] sm:$0xff] (!%p3731_p12), %v3218_v40 }
 0x451   : > { %v5966_v55 = vmax.f32 (!%p3731_p12), %v5673_v0, 0.0  ;;  %v5967_v20 = vmax.f32 (!%p3731_p12), %v5680_v27, 0.0  ;;  %v5968_v28 = vmax.f32 (!%p3731_p12), %v5683_v18, 0.0  ;;  %v5976_v6 = vmax.f32 (!%p3731_p12), %v5723_v23, 0.0  ;;  %3239 = vst [vmem:[%s3235_s20 + $0x18] sm:$0xff] (!%p3731_p12), %v3219_v50  ;;  %3240 = vst [vmem:[%s3235_s20 + $0x20] sm:$0xff] (!%p3731_p12), %v3220_v3 }
 0x452   : > { %v5760_v30 = vadd.f32 %v4233_v15, %v3012_v17  ;;  %v3015_v57 = vadd.f32 %v4124_v34, %v2854_v44  ;;  %v3221_v9 = vpack.c.bf16 (!%p3731_p12), %v5964_v56, %v5959_v16  ;;  %v5965_v15 = vmax.f32 (!%p3731_p12), %v5670_v14, 0.0 }
 0x453   : > { %v3223_v44 = vpack.c.bf16 (!%p3731_p12), %v5968_v28, %v5967_v20  ;;  %v5969_v17 = vmax.f32 (!%p3731_p12), %v5690_v2, 0.0  ;;  %v5970_v34 = vmax.f32 (!%p3731_p12), %v5693_v51, 0.0  ;;  %v5973_v16 = vmax.f32 (!%p3731_p12), %v5710_v4, 0.0 }
 0x454   : > { %v3209_v25 = vmax.f32 %v5760_v30, 0.0  ;;  %v5763_v19 = vadd.f32 %v4236_v5, %v3015_v57  ;;  %v3222_v41 = vpack.c.bf16 (!%p3731_p12), %v5966_v55, %v5965_v15  ;;  %v5971_v57 = vmax.f32 (!%p3731_p12), %v5700_v59, 0.0  ;;  %3241 = vst [vmem:[%s3235_s20 + $0x28] sm:$0xff] (!%p3731_p12), %v3221_v9 }
 0x455   : > { %v3224_v5 = vpack.c.bf16 (!%p3731_p12), %v5970_v34, %v5969_v17  ;;  %v3226_v15 = vpack.c.bf16 (!%p3731_p12), %v5974_v39, %v5973_v16  ;;  %v5975_v55 = vmax.f32 (!%p3731_p12), %v5720_v43, 0.0  ;;  %3243 = vst [vmem:[%s3235_s20 + $0x38] sm:$0xff] (!%p3731_p12), %v3223_v44  ;;  %v5978_v28 = vmax.f32 (!%p3731_p12), %v5733_v35, 0.0 }
 0x456   : > { %v3210_v49 = vmax.f32 %v5763_v19, 0.0  ;;  %v3225_v56 = vpack.c.bf16 (!%p3731_p12), %v5972_v53, %v5971_v57  ;;  %3242 = vst [vmem:[%s3235_s20 + $0x30] sm:$0xff] (!%p3731_p12), %v3222_v41  ;;  %v5977_v53 = vmax.f32 (!%p3731_p12), %v5730_v42, 0.0  ;;  %v5979_v39 = vmax.f32 (!%p3731_p12), %v5740_v38, 0.0 }
 0x457   : > { %v3227_v20 = vpack.c.bf16 %v5976_v6, %v5975_v55  ;;  %v5980_v16 = vmax.f32 %v5743_v47, 0.0  ;;  %v3230_v6 = vpack.c.bf16 %v3208_v54, %v3207_v8  ;;  %3244 = vst [vmem:[%s3235_s20 + $0x40] sm:$0xff] %v3224_v5  ;;  %3246 = vst [vmem:[%s3235_s20 + $0x50] sm:$0xff] %v3226_v15 }
 0x458   : > { %v3228_v17 = vpack.c.bf16 %v5978_v28, %v5977_v53  ;;  %v3231_v26 = vpack.c.bf16 %v3210_v49, %v3209_v25  ;;  %3245 = vst [vmem:[%s3235_s20 + $0x48] sm:$0xff] %v3225_v56 }
 0x459   : > { %v3229_v34 = vpack.c.bf16 %v5980_v16, %v5979_v39  ;;  %3247 = vst [vmem:[%s3235_s20 + $0x58] sm:$0xff] %v3227_v20  ;;  %3250 = vst [vmem:[%s3235_s20 + $0x70] sm:$0xff] %v3230_v6 }
 0x45a   : > { %3248 = vst [vmem:[%s3235_s20 + $0x60] sm:$0xff] %v3228_v17  ;;  %3251 = vst [vmem:[%s3235_s20 + $0x78] sm:$0xff] %v3231_v26 }
 0x45b   : > { %3249 = vst [vmem:[%s3235_s20 + $0x68] sm:$0xff] %v3229_v34 }
 0x45c PF: > { %p3252_p13 = scmp.eq.s32.totalorder %s4812_s10, 3  ;;  %p3733_p0 = scmp.ne.s32.totalorder %s4812_s10, 3 }
 0x45d   : > { %v5981_v29 = vmax.f32 (!%p3733_p0), %v5690_v2, 0.0  ;;  %v5982_v40 = vmax.f32 (!%p3733_p0), %v5693_v51, 0.0  ;;  %v3258_v3 = vpack.c.bf16 (!%p3733_p0), %v3180_v12, %v3179_v60  ;;  %v5983_v9 = vmax.f32 (!%p3733_p0), %v5700_v59, 0.0  ;;  %v3257_v5 = vld [vmem:[%s4939_s16] sm:$0xff] (!%p3733_p0) }
 0x45e   : > { %3255 = sbr.rel (%p3733_p0) target bundleno = 1371 (0x55b), region = 72  ;;  %v5984_v41 = vmax.f32 (!%p3733_p0), %v5703_v63, 0.0  ;;  %v3259_v2 = vpack.c.bf16 (!%p3733_p0), %v3182_v45, %v3181_v37  ;;  %v5985_v51 = vmax.f32 (!%p3733_p0), %v5710_v4, 0.0  ;;  %v5986_v58 = vmax.f32 (!%p3733_p0), %v5713_v11, 0.0  ;;  %v3256_v31 = vld [vmem:[#allocation4] sm:$0xff] (!%p3733_p0) }
 0x45f   : > { %v3266_v50 = vpack.c.bf16 (!%p3733_p0), %v5982_v40, %v5981_v29  ;;  %v3735_v60 = vcombine.high (!%p3733_p0), %v3257_v5, %v3257_v5  ;;  %v3260_v12 = vpack.c.bf16 (!%p3733_p0), %v3184_v24, %v3183_v13  ;;  %v5987_v32 = vmax.f32 (!%p3733_p0), %v5720_v43, 0.0 }
 0x460   : > { %v3267_v44 = vpack.c.bf16 (!%p3733_p0), %v5984_v41, %v5983_v9  ;;  %v3268_v61 = vpack.c.bf16 (!%p3733_p0), %v5986_v58, %v5985_v51  ;;  %v5988_v62 = vmax.f32 (!%p3733_p0), %v5723_v23, 0.0  ;;  %v5989_v45 = vmax.f32 (!%p3733_p0), %v5643_v22, 0.0 }
 0x461   : > { %4237 = vmatprep.subr.bf16.mxu0 (!%p3733_p0), %v3266_v50  ;;  %3313 = vmatprep.mubr.bf16.mxu0 (!%p3733_p0), %v3735_v60  ;;  %v5990_v63 = vmax.f32 (!%p3733_p0), %v5730_v42, 0.0  ;;  %v5991_v7 = vmax.f32 (!%p3733_p0), %v5733_v35, 0.0  ;;  %v5992_v13 = vmax.f32 (!%p3733_p0), %v5650_v36, 0.0  ;;  %v5993_v10 = vmax.f32 (!%p3733_p0), %v5653_v33, 0.0 }
 0x462   : > { %4238 = vmatpush3.bf16.msra.mxu0 (!%p3733_p0), %v3258_v3  ;;  %v3269_v37 = vpack.c.bf16 (!%p3733_p0), %v5988_v62, %v5987_v32  ;;  %v3261_v59 = vpack.c.bf16 (!%p3733_p0), %v5989_v45, %v3185_v52  ;;  %v5994_v11 = vmax.f32 (!%p3733_p0), %v5740_v38, 0.0  ;;  %v5995_v48 = vmax.f32 (!%p3733_p0), %v5743_v47, 0.0 }
 0x463   : > { %4239 = vmatprep.subr.bf16.mxu0 (!%p3733_p0), %v3267_v44  ;;  %v3270_v4 = vpack.c.bf16 (!%p3733_p0), %v5991_v7, %v5990_v63  ;;  %v3262_v24 = vpack.c.bf16 (!%p3733_p0), %v5993_v10, %v5992_v13  ;;  %v5996_v52 = vmax.f32 (!%p3733_p0), %v5660_v21, 0.0  ;;  %v5997_v22 = vmax.f32 (!%p3733_p0), %v5663_v46, 0.0 }
 0x464   : > { %v3271_v43 = vpack.c.bf16 (!%p3733_p0), %v5995_v48, %v5994_v11  ;;  %v3272_v36 = vpack.c.bf16 (!%p3733_p0), %v3208_v54, %v3207_v8  ;;  %v5998_v33 = vmax.f32 (!%p3733_p0), %v5670_v14, 0.0  ;;  %v5999_v42 = vmax.f32 (!%p3733_p0), %v5673_v0, 0.0 }
 0x465   : > { %v3263_v23 = vpack.c.bf16 %v5997_v22, %v5996_v52  ;;  %v3273_v21 = vpack.c.bf16 %v3210_v49, %v3209_v25  ;;  %v6000_v46 = vmax.f32 %v5680_v27, 0.0  ;;  %v6001_v38 = vmax.f32 %v5683_v18, 0.0 }
 0x466   : > { %4240 = vmatpush3.bf16.msra.mxu0 %v3259_v2  ;;  %v3264_v35 = vpack.c.bf16 %v5999_v42, %v5998_v33  ;;  %v3734_v54 = vcombine.low %v3257_v5, %v3257_v5 }
 0x467   : > { %4241 = vmatprep.subr.bf16.mxu0 %v3268_v61  ;;  %v3265_v47 = vpack.c.bf16 %v6001_v38, %v6000_v46 }
 0x46a   : > { %4242 = vmatpush3.bf16.msra.mxu0 %v3260_v12 }
 0x46b   : > { %4243 = vmatprep.subr.bf16.mxu0 %v3269_v37 }
 0x46e   : > { %4244 = vmatpush3.bf16.msra.mxu0 %v3261_v59 }
 0x46f   : > { %4245 = vmatprep.subr.bf16.mxu0 %v3270_v4 }
 0x472   : > { %4246 = vmatpush3.bf16.msra.mxu0 %v3262_v24 }
 0x473   : > { %4247 = vmatprep.subr.bf16.mxu0 %v3271_v43 }
 0x476   : > { %4248 = vmatpush3.bf16.msra.mxu0 %v3263_v23 }
 0x477   : > { %4249 = vmatprep.subr.bf16.mxu0 %v3272_v36 }
 0x47a   : > { %4250 = vmatpush3.bf16.msra.mxu0 %v3264_v35 }
 0x47b   : > { %4251 = vmatprep.subr.bf16.mxu0 %v3273_v21 }
 0x47e   : > { %4252 = vmatpush3.bf16.msra.mxu0 %v3265_v47 }
 0x481   : > { %3314 = vmatmul.mubr.bf16.vlgmr.msra.gmra.mrb[0].mxu0 %v3734_v54 }
 0x554   : > { %v4253_v14 = vpop.f32.mrb[0].mxu0 }
 0x555   : > { %v4254_v0 = vpop.f32.mrb[1].mxu0 }
 0x556   : > { %v4255_v8 = vadd.f32 %v4254_v0, %v4253_v14  ;;  %v4256_v1 = vpop.f32.mrb[2].mxu0 }
 0x557   : > { %v4257_v57 = vpop.f32.mrb[3].mxu0 }
 0x558   : > { %v3321_v30 = vadd.f32 %v4255_v8, %v3256_v31 }
 0x55a   : > { %3322 = vst [vmem:[#allocation4] sm:$0xff] %v3321_v30 }
 0x55b PF: > { %p3323_p1 = scmp.eq.s32.totalorder %s4808_s30, 2 }
 0x55d   : > { %p3324_p2 = pnand %p3323_p1, %p3252_p13 }
 0x55e   : > { %v4778_v27 = vld [vmem:[%s5955_s7] sm:$0xff] (!%p3324_p2)   ;;  %v4827_v18 = vmov (!%p3324_p2), 0.0   ;;  %v4779_v25 = vld [vmem:[%s5955_s7 + $0x8] sm:$0xff] (!%p3324_p2)   ;;  %vm4828_vm2 = vmmov (!%p3324_p2), 0   ;;  %v4780_v19 = vld [vmem:[%s5955_s7 + $0x10] sm:$0xff] (!%p3324_p2)  }
 0x55f   : > { %3327 = sbr.rel (%p3324_p2) target bundleno = 1622 (0x656), region = 76  ;;  %4526 = vmatprep.subr.bf16.mxu0 (!%p3324_p2), %v4827_v18  ;;  %4542 = vmatprep.mubr.msk.bf16.mxu0 (!%p3324_p2), %vm4828_vm2, %v4827_v18  ;;  %v4781_v49 = vld [vmem:[%s5955_s7 + $0x18] sm:$0xff] (!%p3324_p2)   ;;  %v4782_v56 = vld [vmem:[%s5955_s7 + $0x20] sm:$0xff] (!%p3324_p2)   ;;  %v4783_v15 = vld [vmem:[%s5955_s7 + $0x28] sm:$0xff] (!%p3324_p2)  }
 0x560   : > { %4527 = vmatpush3.bf16.msra.mxu0 (!%p3324_p2), %v4778_v27  ;;  %v4784_v55 = vld [vmem:[%s5955_s7 + $0x30] sm:$0xff] (!%p3324_p2)   ;;  %v4785_v20 = vld [vmem:[%s5955_s7 + $0x38] sm:$0xff] (!%p3324_p2)   ;;  %v3736_v17 = vld [vmem:[%s5956_s8] ss:$0 sm:$0xff] (!%p3324_p2) }
 0x561   : > { %4528 = vmatprep.subr.bf16.mxu0 (!%p3324_p2), %v4827_v18  ;;  %v3328_v53 = vld [vmem:[#allocation4] sm:$0xff] (!%p3324_p2) }
 0x562   : > { %v3329_v28 = vpack.c.bf16 (!%p3324_p2), %v3328_v53, %v3328_v53 }
 0x564   : > { %4529 = vmatpush3.bf16.msra.mxu0 (!%p3324_p2), %v4779_v25 }
 0x565   : > { %4530 = vmatprep.subr.bf16.mxu0 (!%p3324_p2), %v4827_v18 }
 0x568   : > { %4531 = vmatpush3.bf16.msra.mxu0 %v4780_v19 }
 0x569   : > { %4532 = vmatprep.subr.bf16.mxu0 %v4827_v18 }
 0x56c   : > { %4533 = vmatpush3.bf16.msra.mxu0 %v4781_v49 }
 0x56d   : > { %4534 = vmatprep.subr.bf16.mxu0 %v4827_v18 }
 0x570   : > { %4535 = vmatpush3.bf16.msra.mxu0 %v4782_v56 }
 0x571   : > { %4536 = vmatprep.subr.bf16.mxu0 %v4827_v18 }
 0x574   : > { %4537 = vmatpush3.bf16.msra.mxu0 %v4783_v15 }
 0x575   : > { %4538 = vmatprep.subr.bf16.mxu0 %v4827_v18 }
 0x578   : > { %4539 = vmatpush3.bf16.msra.mxu0 %v4784_v55 }
 0x579   : > { %4540 = vmatprep.subr.bf16.mxu0 %v4827_v18 }
 0x57c   : > { %4541 = vmatpush3.bf16.msra.mxu0 %v4785_v20 }
 0x57f   : > { %4543 = vmatmul.mubr.bf16.vlgmr.msra.gmra.mrb[0].mxu0 %v3329_v28 }
 0x652   : > { %v3435_v39 = vpop.f32.mrb[0].mxu0 }
 0x653   : > { %v3436_v16 = vadd.f32 %v3736_v17, %v3435_v39  ;;  %v4544_v34 = vpop.f32.mrb[1].mxu0 }
 0x654   : > { %v3438_v6 = vpop.f32.mrb[2].mxu0 }
 0x655   : > { %3441 = vst [vmem:[%s5957_s9] sm:$0xff] %v3436_v16  ;;  %v4545_v26 = vpop.f32.mrb[3].mxu0 }
 0x656 PF: > { %s19_s13 = sadd.s32 1, %s4824_s13   ;;  %s6002_s19 = sld [smem:[#allocation5_spill]] }
 0x657   : > { %p16_p3 = scmp.ge.s32.totalorder %s19_s13, 14   ;;  %s6003_s24 = sld [smem:[#allocation6_spill]] }
 0x658   : > { %s6004_s30 = smov %s4816_s11  ;;  %s6005_s10 = smov %s4820_s12 }
 0x659   :  { %18 = sbr.rel (!%p16_p3) target bundleno = 3 (0x3), region = 112 }
 0x65c   : > { %s6006_s11 = smov %s6002_s19 }
 0x65d   : > { %s6007_s12 = smov %s6003_s24 }

</bundles_post_ra>
